<compile_context>
chip_gen: v6e
topology: v6e:2x2x1
jax: 0.10.0
libtpu: 0.0.40
codegen_flags: <defaults>
</compile_context>

<pallas_src>
import math
import functools

import jax
import jax.numpy as jnp
import numpy as np
from jax.experimental import pallas as pl
from jax.experimental.pallas import tpu as pltpu

# Force true-f32 matmuls in BOTH the Pallas kernel and the pure-JAX reference so the
# final check can use a tight tolerance (TPU default silently uses single-pass bf16).
jax.config.update("jax_default_matmul_precision", "highest")

LANE = 128  # TPU lane width; fused-QKV and final-output lane dims are padded to this.


# ----------------------------- shared math helper -----------------------------
def _layer_norm(x, gamma, beta, eps=1e-5):
    mean = jnp.mean(x, axis=-1, keepdims=True)
    var = jnp.mean((x - mean) ** 2, axis=-1, keepdims=True)
    return (x - mean) * jax.lax.rsqrt(var + eps) * gamma + beta


# Row layout of the packed per-layer vector block (L, 8, LANE); each row zero-padded to LANE.
_BQKV, _BO, _G1, _BE1, _B1, _B2, _G2, _BE2 = range(8)


# ----------------------------- fused Pallas kernel -----------------------------
def make_fused_kernel(seq, d_model, d_ff, num_heads, num_layers):
    S, D, F, H, L = seq, d_model, d_ff, num_heads, num_layers
    hd = D // H

    def kernel(x_ref, w_in_ref, wqkv_ref, wo_ref, w1_ref, w2_ref,
               vecs_ref, w_out_ref, gvec_ref, o_ref):
        f32 = jnp.float32

        def mm(a, w):  # MXU matmul with f32 accumulation; lhs cast to the weight dtype.
            return jnp.dot(a.astype(w.dtype), w, preferred_element_type=f32)

        gvec = gvec_ref[...]                                    # (2, LANE) f32

        # ---- input projection: (S, Din) @ (Din, D) ----
        h = mm(x_ref[...], w_in_ref[...]) + gvec[0:1, :D]       # (S, D) f32

        # ---- encoder layers (L small -> static unroll; per-layer params on axis 0) ----
        # TODO(synk): for large L, move layers onto an "arbitrary" grid axis and stream weights.
        for l in range(L):
            vec = vecs_ref[l]                                   # (8, LANE) f32
            wo_l = wo_ref[l]                                    # (D, D)

            # Fused QKV projection: one 128-lane-dense matmul (Q-scale pre-folded into W/b).
            qkv = mm(h, wqkv_ref[l]) + vec[_BQKV:_BQKV + 1, :]  # (S, LANE); cols >= 3D are 0

            # Per-head attention; output projection accumulated straight into one (S, D) tile.
            attn = jnp.zeros((S, D), f32)
            for hh in range(H):
                q = qkv[:, hh * hd:(hh + 1) * hd]                        # (S, hd)
                k = qkv[:, D + hh * hd:D + (hh + 1) * hd]
                v = qkv[:, 2 * D + hh * hd:2 * D + (hh + 1) * hd]
                s = jnp.einsum('qd,kd->qk', q, k, preferred_element_type=f32)
                s = s - jnp.max(s, axis=-1, keepdims=True)
                p = jnp.exp(s)
                p = p / jnp.sum(p, axis=-1, keepdims=True)               # exact divide
                o_h = jnp.dot(p, v, preferred_element_type=f32)          # (S, hd)
                attn = attn + mm(o_h, wo_l[hh * hd:(hh + 1) * hd, :])    # (S, D)
            attn = attn + vec[_BO:_BO + 1, :D]

            h = _layer_norm(h + attn, vec[_G1:_G1 + 1, :D], vec[_BE1:_BE1 + 1, :D])

            ff = jnp.maximum(mm(h, w1_ref[l]) + vec[_B1:_B1 + 1, :F], 0.0)
            ff = mm(ff, w2_ref[l]) + vec[_B2:_B2 + 1, :D]
            h = _layer_norm(h + ff, vec[_G2:_G2 + 1, :D], vec[_BE2:_BE2 + 1, :D])

        # ---- output projection (padded to 128 lanes -> unmasked lane-dense stores) ----
        out = mm(h, w_out_ref[...]) + gvec[1:2, :]
        o_ref[...] = out.astype(o_ref.dtype)

    return kernel


@functools.partial(jax.jit, static_argnames=("num_heads", "num_layers", "num_targets"))
def simple_transformer_pallas(x, fused_params, *, num_heads, num_layers, num_targets):
    w_in, wqkv, wo, w1, w2, vecs, w_out, gvec = fused_params
    B, S, Din = x.shape
    D = w_in.shape[1]
    F = w1.shape[-1]
    x2 = x.reshape(B * S, Din)

    kernel = make_fused_kernel(S, D, F, num_heads, num_layers)

    def full(a):  # whole array resident; constant block index -> no per-step re-DMA.
        return pl.BlockSpec(a.shape, (lambda b, nd=a.ndim: (0,) * nd))

    out = pl.pallas_call(
        kernel,
        out_shape=jax.ShapeDtypeStruct((B * S, LANE), jnp.float32),
        grid=(B,),
        in_specs=[
            pl.BlockSpec((S, Din), lambda b: (b, 0)),   # one batch element per grid step
            full(w_in), full(wqkv), full(wo), full(w1), full(w2),
            full(vecs), full(w_out), full(gvec),
        ],
        out_specs=pl.BlockSpec((S, LANE), lambda b: (b, 0)),
        compiler_params=pltpu.CompilerParams(
            dimension_semantics=("parallel",),          # shard batch across TCs on v7x
            vmem_limit_bytes=32 * 1024 * 1024,
        ),
    )(x2, *fused_params)
    return out[:, :num_targets].reshape(B, S, num_targets)


# ----------------------------- parameter init ---------------------------------
def init_linear(key, fan_in, fan_out):
    """PyTorch-style uniform init; weight returned already transposed to (in, out)."""
    k1, k2 = jax.random.split(key)
    bound = 1.0 / math.sqrt(fan_in)
    w = jax.random.uniform(k1, (fan_in, fan_out), jnp.float32, -bound, bound)
    b = jax.random.uniform(k2, (1, fan_out), jnp.float32, -bound, bound)
    return w, b


def init_encoder_layer(key, d_model, dim_feedforward):
    ks = jax.random.split(key, 4)
    wqkv, bqkv = init_linear(ks[0], d_model, 3 * d_model)
    wo, bo = init_linear(ks[1], d_model, d_model)
    w1, b1 = init_linear(ks[2], d_model, dim_feedforward)
    w2, b2 = init_linear(ks[3], dim_feedforward, d_model)
    g1 = jnp.ones((1, d_model), jnp.float32)
    be1 = jnp.zeros((1, d_model), jnp.float32)
    g2 = jnp.ones((1, d_model), jnp.float32)
    be2 = jnp.zeros((1, d_model), jnp.float32)
    return (wqkv, bqkv, wo, bo, g1, be1, w1, b1, w2, b2, g2, be2)


def _pad_lanes(v, width=LANE):
    return jnp.pad(v, ((0, 0), (0, width - v.shape[1])))


def prepare_fused_params(in_params, layer_params, out_params, num_heads,
                         param_dtype=jnp.float32):
    """Torch-layout params -> fused-kernel layout:
      * W_qkv columns [Q|K|V] zero-padded to 128 lanes, Q columns pre-scaled by 1/sqrt(hd)
      * per-layer matrices stacked on a leading L axis (batch-independent, no replication)
      * the ten tiny 1-row vectors packed into one (L, 8, 128) array (+ a (2,128) globals pack)
      * output linear zero-padded to 128 lanes.
    Big matrices are cast to `param_dtype` (use bf16 to halve DMA/VMEM at scale; f32 default
    keeps the toy-scale numerical check tight)."""
    w_in, b_in = in_params
    D = w_in.shape[1]
    H = num_heads
    hd = D // H
    assert hd * H == D
    assert 3 * D <= LANE and D <= LANE

    scale = jnp.concatenate([jnp.full((D,), 1.0 / math.sqrt(hd), jnp.float32),
                             jnp.ones((2 * D,), jnp.float32)])

    wqkv_l, wo_l, w1_l, w2_l, vec_l = [], [], [], [], []
    for (wqkv, bqkv, wo, bo, g1, be1, w1, b1, w2, b2, g2, be2) in layer_params:
        assert w1.shape[1] <= LANE
        wqkv_l.append(_pad_lanes(wqkv * scale[None, :]))          # (D, LANE)
        wo_l.append(wo)                                           # (D, D)
        w1_l.append(w1)                                           # (D, F)
        w2_l.append(w2)                                           # (F, D)
        vec_l.append(jnp.concatenate(                             # (8, LANE)
            [_pad_lanes(r) for r in
             (bqkv * scale[None, :], bo, g1, be1, b1, b2, g2, be2)], axis=0))

    w_out, b_out = out_params
    gvec = jnp.concatenate([_pad_lanes(b_in), _pad_lanes(b_out)], axis=0)   # (2, LANE)

    cast = lambda a: a.astype(param_dtype)
    return (cast(w_in),
            cast(jnp.stack(wqkv_l)), cast(jnp.stack(wo_l)),
            cast(jnp.stack(w1_l)), cast(jnp.stack(w2_l)),
            jnp.stack(vec_l).astype(jnp.float32),
            cast(_pad_lanes(w_out)),
            gvec.astype(jnp.float32))


# ----------------------------- pure-JAX reference ------------------------------
def ref_encoder_layer(x, p, num_heads):
    wqkv, bqkv, wo, bo, g1, be1, w1, b1, w2, b2, g2, be2 = p
    B, S, D = x.shape
    hd = D // num_heads
    qkv = x @ wqkv + bqkv
    q, k, v = qkv[..., :D], qkv[..., D:2 * D], qkv[..., 2 * D:]
    qh = q.reshape(B, S, num_heads, hd).transpose(0, 2, 1, 3)
    kh = k.reshape(B, S, num_heads, hd).transpose(0, 2, 1, 3)
    vh = v.reshape(B, S, num_heads, hd).transpose(0, 2, 1, 3)
    s = jnp.einsum('bhqd,bhkd->bhqk', qh, kh) / math.sqrt(hd)
    pw = jax.nn.softmax(s, axis=-1)
    o = jnp.einsum('bhqk,bhkd->bhqd', pw, vh).transpose(0, 2, 1, 3).reshape(B, S, D)
    x = _layer_norm(x + (o @ wo + bo), g1, be1)
    ff = jnp.maximum(x @ w1 + b1, 0.0) @ w2 + b2
    x = _layer_norm(x + ff, g2, be2)
    return x


def ref_forward(x, in_params, layer_params, out_params, num_heads):
    x = x @ in_params[0] + in_params[1]
    for p in layer_params:
        x = ref_encoder_layer(x, p, num_heads)
    return x @ out_params[0] + out_params[1]


# ----------------------------- main --------------------------------------------
if __name__ == "__main__":
    # model config (matches SimpleTransformer at small scale)
    input_dim = 16
    d_model = 32
    nhead = 4
    dim_feedforward = 64
    num_layers = 2
    num_targets = 5
    batch, seq = 2, 8

    key = jax.random.PRNGKey(0)
    k_in, k_out, k_x, *k_layers = jax.random.split(key, 3 + num_layers)

    in_params = init_linear(k_in, input_dim, d_model)
    layer_params = [init_encoder_layer(k, d_model, dim_feedforward) for k in k_layers]
    out_params = init_linear(k_out, d_model, num_targets)

    fused_params = prepare_fused_params(in_params, layer_params, out_params, nhead)

    x = jax.random.normal(k_x, (batch, seq, input_dim), jnp.float32)

    out = simple_transformer_pallas(x, fused_params, num_heads=nhead,
                                    num_layers=num_layers, num_targets=num_targets)
    out = jax.block_until_ready(out)

    ref = ref_forward(x, in_params, layer_params, out_params, nhead)
    # Exact softmax divide + f32 (highest-precision) matmuls on both sides -> tight tolerance.
    np.testing.assert_allclose(np.asarray(out), np.asarray(ref), rtol=1e-4, atol=1e-4)

    # TODO(synk): dropout implemented as identity (inference mode); training-mode RNG dropout not modeled.
    print("KERNEL_OK")
</pallas_src>

<mosaic_0001>
module attributes {stable_mosaic.version = 11 : i64} {
  func.func @kernel(%arg0: i32, %arg1: memref<8x16xf32, #tpu.memory_space<vmem>>, %arg2: memref<16x32xf32, #tpu.memory_space<vmem>>, %arg3: memref<2x32x128xf32, #tpu.memory_space<vmem>>, %arg4: memref<2x32x32xf32, #tpu.memory_space<vmem>>, %arg5: memref<2x32x64xf32, #tpu.memory_space<vmem>>, %arg6: memref<2x64x32xf32, #tpu.memory_space<vmem>>, %arg7: memref<2x8x128xf32, #tpu.memory_space<vmem>>, %arg8: memref<32x128xf32, #tpu.memory_space<vmem>>, %arg9: memref<2x128xf32, #tpu.memory_space<vmem>>, %arg10: memref<8x128xf32, #tpu.memory_space<vmem>>) attributes {dimension_semantics = [#tpu.dimension_semantics<parallel>], iteration_bounds = array<i64: 2>, scalar_prefetch = 0 : i64, scratch_operands = 0 : i64, tpu.core_type = #tpu.core_type<tc>, window_params = [{transform_indices = @transform_0, window_bounds = array<i64: 8, 16>}, {pipeline_mode = #tpu.pipeline_mode<synchronous>, transform_indices = @transform_1, window_bounds = array<i64: 16, 32>}, {pipeline_mode = #tpu.pipeline_mode<synchronous>, transform_indices = @transform_2, window_bounds = array<i64: 2, 32, 128>}, {pipeline_mode = #tpu.pipeline_mode<synchronous>, transform_indices = @transform_3, window_bounds = array<i64: 2, 32, 32>}, {pipeline_mode = #tpu.pipeline_mode<synchronous>, transform_indices = @transform_4, window_bounds = array<i64: 2, 32, 64>}, {pipeline_mode = #tpu.pipeline_mode<synchronous>, transform_indices = @transform_5, window_bounds = array<i64: 2, 64, 32>}, {pipeline_mode = #tpu.pipeline_mode<synchronous>, transform_indices = @transform_6, window_bounds = array<i64: 2, 8, 128>}, {pipeline_mode = #tpu.pipeline_mode<synchronous>, transform_indices = @transform_7, window_bounds = array<i64: 32, 128>}, {pipeline_mode = #tpu.pipeline_mode<synchronous>, transform_indices = @transform_8, window_bounds = array<i64: 2, 128>}, {transform_indices = @transform_9, window_bounds = array<i64: 8, 128>}]} {
    %c0 = arith.constant 0 : index
    %c0_0 = arith.constant 0 : index
    %0 = vector.load %arg9[%c0, %c0_0] : memref<2x128xf32, #tpu.memory_space<vmem>>, vector<2x128xf32>
    %c0_1 = arith.constant 0 : index
    %c0_2 = arith.constant 0 : index
    %1 = vector.load %arg1[%c0_1, %c0_2] : memref<8x16xf32, #tpu.memory_space<vmem>>, vector<8x16xf32>
    %c0_3 = arith.constant 0 : index
    %c0_4 = arith.constant 0 : index
    %2 = vector.load %arg2[%c0_3, %c0_4] : memref<16x32xf32, #tpu.memory_space<vmem>>, vector<16x32xf32>
    %cst = arith.constant dense<0.000000e+00> : vector<8x32xf32>
    %3 = tpu.matmul %1, %2, %cst {dimension_numbers = #tpu.dot_dimension_numbers<[1], [0], [0], [1], [0, 0, 1, 1], [], []>, precision = #tpu.contract_precision<fp32>} : vector<8x16xf32>, vector<16x32xf32>, vector<8x32xf32> -> vector<8x32xf32>
    %4 = vector.extract_strided_slice %0 {offsets = [0, 0], sizes = [1, 32], strides = [1, 1]} : vector<2x128xf32> to vector<1x32xf32>
    %5 = vector.broadcast %4 : vector<1x32xf32> to vector<8x32xf32>
    %6 = arith.addf %3, %5 : vector<8x32xf32>
    %c0_5 = arith.constant 0 : index
    %c0_6 = arith.constant 0 : index
    %c0_7 = arith.constant 0 : index
    %7 = vector.load %arg7[%c0_5, %c0_6, %c0_7] : memref<2x8x128xf32, #tpu.memory_space<vmem>>, vector<1x8x128xf32>
    %8 = vector.shape_cast %7 : vector<1x8x128xf32> to vector<8x128xf32>
    %c0_8 = arith.constant 0 : index
    %c0_9 = arith.constant 0 : index
    %c0_10 = arith.constant 0 : index
    %9 = vector.load %arg4[%c0_8, %c0_9, %c0_10] : memref<2x32x32xf32, #tpu.memory_space<vmem>>, vector<1x32x32xf32>
    %10 = vector.shape_cast %9 : vector<1x32x32xf32> to vector<32x32xf32>
    %c0_11 = arith.constant 0 : index
    %c0_12 = arith.constant 0 : index
    %c0_13 = arith.constant 0 : index
    %11 = vector.load %arg3[%c0_11, %c0_12, %c0_13] : memref<2x32x128xf32, #tpu.memory_space<vmem>>, vector<1x32x128xf32>
    %12 = vector.shape_cast %11 : vector<1x32x128xf32> to vector<32x128xf32>
    %cst_14 = arith.constant dense<0.000000e+00> : vector<8x128xf32>
    %13 = tpu.matmul %6, %12, %cst_14 {dimension_numbers = #tpu.dot_dimension_numbers<[1], [0], [0], [1], [0, 0, 1, 1], [], []>, precision = #tpu.contract_precision<fp32>} : vector<8x32xf32>, vector<32x128xf32>, vector<8x128xf32> -> vector<8x128xf32>
    %14 = vector.extract_strided_slice %8 {offsets = [0, 0], sizes = [1, 128], strides = [1, 1]} : vector<8x128xf32> to vector<1x128xf32>
    %15 = vector.broadcast %14 : vector<1x128xf32> to vector<8x128xf32>
    %16 = arith.addf %13, %15 : vector<8x128xf32>
    %cst_15 = arith.constant 0.000000e+00 : f32
    %17 = vector.broadcast %cst_15 : f32 to vector<8x32xf32>
    %18 = vector.extract_strided_slice %16 {offsets = [0, 0], sizes = [8, 8], strides = [1, 1]} : vector<8x128xf32> to vector<8x8xf32>
    %19 = vector.extract_strided_slice %16 {offsets = [0, 32], sizes = [8, 8], strides = [1, 1]} : vector<8x128xf32> to vector<8x8xf32>
    %20 = vector.extract_strided_slice %16 {offsets = [0, 64], sizes = [8, 8], strides = [1, 1]} : vector<8x128xf32> to vector<8x8xf32>
    "tpu.trace_start"() <{level = 10 : i32, message = "qd,kd->qk"}> : () -> ()
    %cst_16 = arith.constant dense<0.000000e+00> : vector<8x8xf32>
    %21 = tpu.matmul %18, %19, %cst_16 {dimension_numbers = #tpu.dot_dimension_numbers<[1], [1], [0], [0], [0, 0, 1, 0], [], []>, precision = #tpu.contract_precision<fp32>} : vector<8x8xf32>, vector<8x8xf32>, vector<8x8xf32> -> vector<8x8xf32>
    "tpu.trace_stop"() : () -> ()
    %cst_17 = arith.constant dense<0xFF800000> : vector<8xf32>
    %22 = vector.multi_reduction <maximumf>, %21, %cst_17 [1] : vector<8x8xf32> to vector<8xf32>
    %23 = vector.shape_cast %22 : vector<8xf32> to vector<8x1xf32>
    %24 = vector.broadcast %23 : vector<8x1xf32> to vector<8x8xf32>
    %25 = arith.subf %21, %24 : vector<8x8xf32>
    %26 = math.exp %25 : vector<8x8xf32>
    %cst_18 = arith.constant dense<0.000000e+00> : vector<8xf32>
    %27 = vector.multi_reduction <add>, %26, %cst_18 [1] : vector<8x8xf32> to vector<8xf32>
    %28 = vector.shape_cast %27 : vector<8xf32> to vector<8x1xf32>
    %29 = vector.broadcast %28 : vector<8x1xf32> to vector<8x8xf32>
    %30 = arith.divf %26, %29 : vector<8x8xf32>
    %cst_19 = arith.constant dense<0.000000e+00> : vector<8x8xf32>
    %31 = tpu.matmul %30, %20, %cst_19 {dimension_numbers = #tpu.dot_dimension_numbers<[1], [0], [0], [1], [0, 0, 1, 1], [], []>, precision = #tpu.contract_precision<fp32>} : vector<8x8xf32>, vector<8x8xf32>, vector<8x8xf32> -> vector<8x8xf32>
    %32 = vector.extract_strided_slice %10 {offsets = [0, 0], sizes = [8, 32], strides = [1, 1]} : vector<32x32xf32> to vector<8x32xf32>
    %cst_20 = arith.constant dense<0.000000e+00> : vector<8x32xf32>
    %33 = tpu.matmul %31, %32, %cst_20 {dimension_numbers = #tpu.dot_dimension_numbers<[1], [0], [0], [1], [0, 0, 1, 1], [], []>, precision = #tpu.contract_precision<fp32>} : vector<8x8xf32>, vector<8x32xf32>, vector<8x32xf32> -> vector<8x32xf32>
    %34 = arith.addf %17, %33 : vector<8x32xf32>
    %35 = vector.extract_strided_slice %16 {offsets = [0, 8], sizes = [8, 8], strides = [1, 1]} : vector<8x128xf32> to vector<8x8xf32>
    %36 = vector.extract_strided_slice %16 {offsets = [0, 40], sizes = [8, 8], strides = [1, 1]} : vector<8x128xf32> to vector<8x8xf32>
    %37 = vector.extract_strided_slice %16 {offsets = [0, 72], sizes = [8, 8], strides = [1, 1]} : vector<8x128xf32> to vector<8x8xf32>
    "tpu.trace_start"() <{level = 10 : i32, message = "qd,kd->qk"}> : () -> ()
    %cst_21 = arith.constant dense<0.000000e+00> : vector<8x8xf32>
    %38 = tpu.matmul %35, %36, %cst_21 {dimension_numbers = #tpu.dot_dimension_numbers<[1], [1], [0], [0], [0, 0, 1, 0], [], []>, precision = #tpu.contract_precision<fp32>} : vector<8x8xf32>, vector<8x8xf32>, vector<8x8xf32> -> vector<8x8xf32>
    "tpu.trace_stop"() : () -> ()
    %cst_22 = arith.constant dense<0xFF800000> : vector<8xf32>
    %39 = vector.multi_reduction <maximumf>, %38, %cst_22 [1] : vector<8x8xf32> to vector<8xf32>
    %40 = vector.shape_cast %39 : vector<8xf32> to vector<8x1xf32>
    %41 = vector.broadcast %40 : vector<8x1xf32> to vector<8x8xf32>
    %42 = arith.subf %38, %41 : vector<8x8xf32>
    %43 = math.exp %42 : vector<8x8xf32>
    %cst_23 = arith.constant dense<0.000000e+00> : vector<8xf32>
    %44 = vector.multi_reduction <add>, %43, %cst_23 [1] : vector<8x8xf32> to vector<8xf32>
    %45 = vector.shape_cast %44 : vector<8xf32> to vector<8x1xf32>
    %46 = vector.broadcast %45 : vector<8x1xf32> to vector<8x8xf32>
    %47 = arith.divf %43, %46 : vector<8x8xf32>
    %cst_24 = arith.constant dense<0.000000e+00> : vector<8x8xf32>
    %48 = tpu.matmul %47, %37, %cst_24 {dimension_numbers = #tpu.dot_dimension_numbers<[1], [0], [0], [1], [0, 0, 1, 1], [], []>, precision = #tpu.contract_precision<fp32>} : vector<8x8xf32>, vector<8x8xf32>, vector<8x8xf32> -> vector<8x8xf32>
    %49 = vector.extract_strided_slice %10 {offsets = [8, 0], sizes = [8, 32], strides = [1, 1]} : vector<32x32xf32> to vector<8x32xf32>
    %cst_25 = arith.constant dense<0.000000e+00> : vector<8x32xf32>
    %50 = tpu.matmul %48, %49, %cst_25 {dimension_numbers = #tpu.dot_dimension_numbers<[1], [0], [0], [1], [0, 0, 1, 1], [], []>, precision = #tpu.contract_precision<fp32>} : vector<8x8xf32>, vector<8x32xf32>, vector<8x32xf32> -> vector<8x32xf32>
    %51 = arith.addf %34, %50 : vector<8x32xf32>
    %52 = vector.extract_strided_slice %16 {offsets = [0, 16], sizes = [8, 8], strides = [1, 1]} : vector<8x128xf32> to vector<8x8xf32>
    %53 = vector.extract_strided_slice %16 {offsets = [0, 48], sizes = [8, 8], strides = [1, 1]} : vector<8x128xf32> to vector<8x8xf32>
    %54 = vector.extract_strided_slice %16 {offsets = [0, 80], sizes = [8, 8], strides = [1, 1]} : vector<8x128xf32> to vector<8x8xf32>
    "tpu.trace_start"() <{level = 10 : i32, message = "qd,kd->qk"}> : () -> ()
    %cst_26 = arith.constant dense<0.000000e+00> : vector<8x8xf32>
    %55 = tpu.matmul %52, %53, %cst_26 {dimension_numbers = #tpu.dot_dimension_numbers<[1], [1], [0], [0], [0, 0, 1, 0], [], []>, precision = #tpu.contract_precision<fp32>} : vector<8x8xf32>, vector<8x8xf32>, vector<8x8xf32> -> vector<8x8xf32>
    "tpu.trace_stop"() : () -> ()
    %cst_27 = arith.constant dense<0xFF800000> : vector<8xf32>
    %56 = vector.multi_reduction <maximumf>, %55, %cst_27 [1] : vector<8x8xf32> to vector<8xf32>
    %57 = vector.shape_cast %56 : vector<8xf32> to vector<8x1xf32>
    %58 = vector.broadcast %57 : vector<8x1xf32> to vector<8x8xf32>
    %59 = arith.subf %55, %58 : vector<8x8xf32>
    %60 = math.exp %59 : vector<8x8xf32>
    %cst_28 = arith.constant dense<0.000000e+00> : vector<8xf32>
    %61 = vector.multi_reduction <add>, %60, %cst_28 [1] : vector<8x8xf32> to vector<8xf32>
    %62 = vector.shape_cast %61 : vector<8xf32> to vector<8x1xf32>
    %63 = vector.broadcast %62 : vector<8x1xf32> to vector<8x8xf32>
    %64 = arith.divf %60, %63 : vector<8x8xf32>
    %cst_29 = arith.constant dense<0.000000e+00> : vector<8x8xf32>
    %65 = tpu.matmul %64, %54, %cst_29 {dimension_numbers = #tpu.dot_dimension_numbers<[1], [0], [0], [1], [0, 0, 1, 1], [], []>, precision = #tpu.contract_precision<fp32>} : vector<8x8xf32>, vector<8x8xf32>, vector<8x8xf32> -> vector<8x8xf32>
    %66 = vector.extract_strided_slice %10 {offsets = [16, 0], sizes = [8, 32], strides = [1, 1]} : vector<32x32xf32> to vector<8x32xf32>
    %cst_30 = arith.constant dense<0.000000e+00> : vector<8x32xf32>
    %67 = tpu.matmul %65, %66, %cst_30 {dimension_numbers = #tpu.dot_dimension_numbers<[1], [0], [0], [1], [0, 0, 1, 1], [], []>, precision = #tpu.contract_precision<fp32>} : vector<8x8xf32>, vector<8x32xf32>, vector<8x32xf32> -> vector<8x32xf32>
    %68 = arith.addf %51, %67 : vector<8x32xf32>
    %69 = vector.extract_strided_slice %16 {offsets = [0, 24], sizes = [8, 8], strides = [1, 1]} : vector<8x128xf32> to vector<8x8xf32>
    %70 = vector.extract_strided_slice %16 {offsets = [0, 56], sizes = [8, 8], strides = [1, 1]} : vector<8x128xf32> to vector<8x8xf32>
    %71 = vector.extract_strided_slice %16 {offsets = [0, 88], sizes = [8, 8], strides = [1, 1]} : vector<8x128xf32> to vector<8x8xf32>
    "tpu.trace_start"() <{level = 10 : i32, message = "qd,kd->qk"}> : () -> ()
    %cst_31 = arith.constant dense<0.000000e+00> : vector<8x8xf32>
    %72 = tpu.matmul %69, %70, %cst_31 {dimension_numbers = #tpu.dot_dimension_numbers<[1], [1], [0], [0], [0, 0, 1, 0], [], []>, precision = #tpu.contract_precision<fp32>} : vector<8x8xf32>, vector<8x8xf32>, vector<8x8xf32> -> vector<8x8xf32>
    "tpu.trace_stop"() : () -> ()
    %cst_32 = arith.constant dense<0xFF800000> : vector<8xf32>
    %73 = vector.multi_reduction <maximumf>, %72, %cst_32 [1] : vector<8x8xf32> to vector<8xf32>
    %74 = vector.shape_cast %73 : vector<8xf32> to vector<8x1xf32>
    %75 = vector.broadcast %74 : vector<8x1xf32> to vector<8x8xf32>
    %76 = arith.subf %72, %75 : vector<8x8xf32>
    %77 = math.exp %76 : vector<8x8xf32>
    %cst_33 = arith.constant dense<0.000000e+00> : vector<8xf32>
    %78 = vector.multi_reduction <add>, %77, %cst_33 [1] : vector<8x8xf32> to vector<8xf32>
    %79 = vector.shape_cast %78 : vector<8xf32> to vector<8x1xf32>
    %80 = vector.broadcast %79 : vector<8x1xf32> to vector<8x8xf32>
    %81 = arith.divf %77, %80 : vector<8x8xf32>
    %cst_34 = arith.constant dense<0.000000e+00> : vector<8x8xf32>
    %82 = tpu.matmul %81, %71, %cst_34 {dimension_numbers = #tpu.dot_dimension_numbers<[1], [0], [0], [1], [0, 0, 1, 1], [], []>, precision = #tpu.contract_precision<fp32>} : vector<8x8xf32>, vector<8x8xf32>, vector<8x8xf32> -> vector<8x8xf32>
    %83 = vector.extract_strided_slice %10 {offsets = [24, 0], sizes = [8, 32], strides = [1, 1]} : vector<32x32xf32> to vector<8x32xf32>
    %cst_35 = arith.constant dense<0.000000e+00> : vector<8x32xf32>
    %84 = tpu.matmul %82, %83, %cst_35 {dimension_numbers = #tpu.dot_dimension_numbers<[1], [0], [0], [1], [0, 0, 1, 1], [], []>, precision = #tpu.contract_precision<fp32>} : vector<8x8xf32>, vector<8x32xf32>, vector<8x32xf32> -> vector<8x32xf32>
    %85 = arith.addf %68, %84 : vector<8x32xf32>
    %86 = vector.extract_strided_slice %8 {offsets = [1, 0], sizes = [1, 32], strides = [1, 1]} : vector<8x128xf32> to vector<1x32xf32>
    %87 = vector.broadcast %86 : vector<1x32xf32> to vector<8x32xf32>
    %88 = arith.addf %85, %87 : vector<8x32xf32>
    %89 = arith.addf %6, %88 : vector<8x32xf32>
    %90 = vector.extract_strided_slice %8 {offsets = [2, 0], sizes = [1, 32], strides = [1, 1]} : vector<8x128xf32> to vector<1x32xf32>
    %91 = vector.extract_strided_slice %8 {offsets = [3, 0], sizes = [1, 32], strides = [1, 1]} : vector<8x128xf32> to vector<1x32xf32>
    %cst_36 = arith.constant dense<0.000000e+00> : vector<8xf32>
    %92 = vector.multi_reduction <add>, %89, %cst_36 [1] : vector<8x32xf32> to vector<8xf32>
    %93 = vector.shape_cast %92 : vector<8xf32> to vector<8x1xf32>
    %cst_37 = arith.constant 3.200000e+01 : f32
    %94 = vector.broadcast %cst_37 : f32 to vector<8x1xf32>
    %95 = arith.divf %93, %94 : vector<8x1xf32>
    %96 = vector.broadcast %95 : vector<8x1xf32> to vector<8x32xf32>
    %97 = arith.subf %89, %96 : vector<8x32xf32>
    %98 = arith.mulf %97, %97 : vector<8x32xf32>
    %cst_38 = arith.constant dense<0.000000e+00> : vector<8xf32>
    %99 = vector.multi_reduction <add>, %98, %cst_38 [1] : vector<8x32xf32> to vector<8xf32>
    %100 = vector.shape_cast %99 : vector<8xf32> to vector<8x1xf32>
    %cst_39 = arith.constant 3.200000e+01 : f32
    %101 = vector.broadcast %cst_39 : f32 to vector<8x1xf32>
    %102 = arith.divf %100, %101 : vector<8x1xf32>
    %103 = vector.broadcast %95 : vector<8x1xf32> to vector<8x32xf32>
    %104 = arith.subf %89, %103 : vector<8x32xf32>
    %cst_40 = arith.constant 9.99999974E-6 : f32
    %105 = vector.broadcast %cst_40 : f32 to vector<8x1xf32>
    %106 = arith.addf %102, %105 : vector<8x1xf32>
    %107 = math.rsqrt %106 : vector<8x1xf32>
    %108 = vector.broadcast %107 : vector<8x1xf32> to vector<8x32xf32>
    %109 = arith.mulf %104, %108 : vector<8x32xf32>
    %110 = vector.broadcast %90 : vector<1x32xf32> to vector<8x32xf32>
    %111 = arith.mulf %109, %110 : vector<8x32xf32>
    %112 = vector.broadcast %91 : vector<1x32xf32> to vector<8x32xf32>
    %113 = arith.addf %111, %112 : vector<8x32xf32>
    %c0_41 = arith.constant 0 : index
    %c0_42 = arith.constant 0 : index
    %c0_43 = arith.constant 0 : index
    %114 = vector.load %arg5[%c0_41, %c0_42, %c0_43] : memref<2x32x64xf32, #tpu.memory_space<vmem>>, vector<1x32x64xf32>
    %115 = vector.shape_cast %114 : vector<1x32x64xf32> to vector<32x64xf32>
    %cst_44 = arith.constant dense<0.000000e+00> : vector<8x64xf32>
    %116 = tpu.matmul %113, %115, %cst_44 {dimension_numbers = #tpu.dot_dimension_numbers<[1], [0], [0], [1], [0, 0, 1, 1], [], []>, precision = #tpu.contract_precision<fp32>} : vector<8x32xf32>, vector<32x64xf32>, vector<8x64xf32> -> vector<8x64xf32>
    %117 = vector.extract_strided_slice %8 {offsets = [4, 0], sizes = [1, 64], strides = [1, 1]} : vector<8x128xf32> to vector<1x64xf32>
    %118 = vector.broadcast %117 : vector<1x64xf32> to vector<8x64xf32>
    %119 = arith.addf %116, %118 : vector<8x64xf32>
    %cst_45 = arith.constant 0.000000e+00 : f32
    %120 = vector.broadcast %cst_45 : f32 to vector<8x64xf32>
    %121 = arith.maximumf %119, %120 : vector<8x64xf32>
    %c0_46 = arith.constant 0 : index
    %c0_47 = arith.constant 0 : index
    %c0_48 = arith.constant 0 : index
    %122 = vector.load %arg6[%c0_46, %c0_47, %c0_48] : memref<2x64x32xf32, #tpu.memory_space<vmem>>, vector<1x64x32xf32>
    %123 = vector.shape_cast %122 : vector<1x64x32xf32> to vector<64x32xf32>
    %cst_49 = arith.constant dense<0.000000e+00> : vector<8x32xf32>
    %124 = tpu.matmul %121, %123, %cst_49 {dimension_numbers = #tpu.dot_dimension_numbers<[1], [0], [0], [1], [0, 0, 1, 1], [], []>, precision = #tpu.contract_precision<fp32>} : vector<8x64xf32>, vector<64x32xf32>, vector<8x32xf32> -> vector<8x32xf32>
    %125 = vector.extract_strided_slice %8 {offsets = [5, 0], sizes = [1, 32], strides = [1, 1]} : vector<8x128xf32> to vector<1x32xf32>
    %126 = vector.broadcast %125 : vector<1x32xf32> to vector<8x32xf32>
    %127 = arith.addf %124, %126 : vector<8x32xf32>
    %128 = arith.addf %113, %127 : vector<8x32xf32>
    %129 = vector.extract_strided_slice %8 {offsets = [6, 0], sizes = [1, 32], strides = [1, 1]} : vector<8x128xf32> to vector<1x32xf32>
    %130 = vector.extract_strided_slice %8 {offsets = [7, 0], sizes = [1, 32], strides = [1, 1]} : vector<8x128xf32> to vector<1x32xf32>
    %cst_50 = arith.constant dense<0.000000e+00> : vector<8xf32>
    %131 = vector.multi_reduction <add>, %128, %cst_50 [1] : vector<8x32xf32> to vector<8xf32>
    %132 = vector.shape_cast %131 : vector<8xf32> to vector<8x1xf32>
    %cst_51 = arith.constant 3.200000e+01 : f32
    %133 = vector.broadcast %cst_51 : f32 to vector<8x1xf32>
    %134 = arith.divf %132, %133 : vector<8x1xf32>
    %135 = vector.broadcast %134 : vector<8x1xf32> to vector<8x32xf32>
    %136 = arith.subf %128, %135 : vector<8x32xf32>
    %137 = arith.mulf %136, %136 : vector<8x32xf32>
    %cst_52 = arith.constant dense<0.000000e+00> : vector<8xf32>
    %138 = vector.multi_reduction <add>, %137, %cst_52 [1] : vector<8x32xf32> to vector<8xf32>
    %139 = vector.shape_cast %138 : vector<8xf32> to vector<8x1xf32>
    %cst_53 = arith.constant 3.200000e+01 : f32
    %140 = vector.broadcast %cst_53 : f32 to vector<8x1xf32>
    %141 = arith.divf %139, %140 : vector<8x1xf32>
    %142 = vector.broadcast %134 : vector<8x1xf32> to vector<8x32xf32>
    %143 = arith.subf %128, %142 : vector<8x32xf32>
    %cst_54 = arith.constant 9.99999974E-6 : f32
    %144 = vector.broadcast %cst_54 : f32 to vector<8x1xf32>
    %145 = arith.addf %141, %144 : vector<8x1xf32>
    %146 = math.rsqrt %145 : vector<8x1xf32>
    %147 = vector.broadcast %146 : vector<8x1xf32> to vector<8x32xf32>
    %148 = arith.mulf %143, %147 : vector<8x32xf32>
    %149 = vector.broadcast %129 : vector<1x32xf32> to vector<8x32xf32>
    %150 = arith.mulf %148, %149 : vector<8x32xf32>
    %151 = vector.broadcast %130 : vector<1x32xf32> to vector<8x32xf32>
    %152 = arith.addf %150, %151 : vector<8x32xf32>
    %c1 = arith.constant 1 : index
    %c0_55 = arith.constant 0 : index
    %c0_56 = arith.constant 0 : index
    %153 = vector.load %arg7[%c1, %c0_55, %c0_56] : memref<2x8x128xf32, #tpu.memory_space<vmem>>, vector<1x8x128xf32>
    %154 = vector.shape_cast %153 : vector<1x8x128xf32> to vector<8x128xf32>
    %c1_57 = arith.constant 1 : index
    %c0_58 = arith.constant 0 : index
    %c0_59 = arith.constant 0 : index
    %155 = vector.load %arg4[%c1_57, %c0_58, %c0_59] : memref<2x32x32xf32, #tpu.memory_space<vmem>>, vector<1x32x32xf32>
    %156 = vector.shape_cast %155 : vector<1x32x32xf32> to vector<32x32xf32>
    %c1_60 = arith.constant 1 : index
    %c0_61 = arith.constant 0 : index
    %c0_62 = arith.constant 0 : index
    %157 = vector.load %arg3[%c1_60, %c0_61, %c0_62] : memref<2x32x128xf32, #tpu.memory_space<vmem>>, vector<1x32x128xf32>
    %158 = vector.shape_cast %157 : vector<1x32x128xf32> to vector<32x128xf32>
    %cst_63 = arith.constant dense<0.000000e+00> : vector<8x128xf32>
    %159 = tpu.matmul %152, %158, %cst_63 {dimension_numbers = #tpu.dot_dimension_numbers<[1], [0], [0], [1], [0, 0, 1, 1], [], []>, precision = #tpu.contract_precision<fp32>} : vector<8x32xf32>, vector<32x128xf32>, vector<8x128xf32> -> vector<8x128xf32>
    %160 = vector.extract_strided_slice %154 {offsets = [0, 0], sizes = [1, 128], strides = [1, 1]} : vector<8x128xf32> to vector<1x128xf32>
    %161 = vector.broadcast %160 : vector<1x128xf32> to vector<8x128xf32>
    %162 = arith.addf %159, %161 : vector<8x128xf32>
    %cst_64 = arith.constant 0.000000e+00 : f32
    %163 = vector.broadcast %cst_64 : f32 to vector<8x32xf32>
    %164 = vector.extract_strided_slice %162 {offsets = [0, 0], sizes = [8, 8], strides = [1, 1]} : vector<8x128xf32> to vector<8x8xf32>
    %165 = vector.extract_strided_slice %162 {offsets = [0, 32], sizes = [8, 8], strides = [1, 1]} : vector<8x128xf32> to vector<8x8xf32>
    %166 = vector.extract_strided_slice %162 {offsets = [0, 64], sizes = [8, 8], strides = [1, 1]} : vector<8x128xf32> to vector<8x8xf32>
    "tpu.trace_start"() <{level = 10 : i32, message = "qd,kd->qk"}> : () -> ()
    %cst_65 = arith.constant dense<0.000000e+00> : vector<8x8xf32>
    %167 = tpu.matmul %164, %165, %cst_65 {dimension_numbers = #tpu.dot_dimension_numbers<[1], [1], [0], [0], [0, 0, 1, 0], [], []>, precision = #tpu.contract_precision<fp32>} : vector<8x8xf32>, vector<8x8xf32>, vector<8x8xf32> -> vector<8x8xf32>
    "tpu.trace_stop"() : () -> ()
    %cst_66 = arith.constant dense<0xFF800000> : vector<8xf32>
    %168 = vector.multi_reduction <maximumf>, %167, %cst_66 [1] : vector<8x8xf32> to vector<8xf32>
    %169 = vector.shape_cast %168 : vector<8xf32> to vector<8x1xf32>
    %170 = vector.broadcast %169 : vector<8x1xf32> to vector<8x8xf32>
    %171 = arith.subf %167, %170 : vector<8x8xf32>
    %172 = math.exp %171 : vector<8x8xf32>
    %cst_67 = arith.constant dense<0.000000e+00> : vector<8xf32>
    %173 = vector.multi_reduction <add>, %172, %cst_67 [1] : vector<8x8xf32> to vector<8xf32>
    %174 = vector.shape_cast %173 : vector<8xf32> to vector<8x1xf32>
    %175 = vector.broadcast %174 : vector<8x1xf32> to vector<8x8xf32>
    %176 = arith.divf %172, %175 : vector<8x8xf32>
    %cst_68 = arith.constant dense<0.000000e+00> : vector<8x8xf32>
    %177 = tpu.matmul %176, %166, %cst_68 {dimension_numbers = #tpu.dot_dimension_numbers<[1], [0], [0], [1], [0, 0, 1, 1], [], []>, precision = #tpu.contract_precision<fp32>} : vector<8x8xf32>, vector<8x8xf32>, vector<8x8xf32> -> vector<8x8xf32>
    %178 = vector.extract_strided_slice %156 {offsets = [0, 0], sizes = [8, 32], strides = [1, 1]} : vector<32x32xf32> to vector<8x32xf32>
    %cst_69 = arith.constant dense<0.000000e+00> : vector<8x32xf32>
    %179 = tpu.matmul %177, %178, %cst_69 {dimension_numbers = #tpu.dot_dimension_numbers<[1], [0], [0], [1], [0, 0, 1, 1], [], []>, precision = #tpu.contract_precision<fp32>} : vector<8x8xf32>, vector<8x32xf32>, vector<8x32xf32> -> vector<8x32xf32>
    %180 = arith.addf %163, %179 : vector<8x32xf32>
    %181 = vector.extract_strided_slice %162 {offsets = [0, 8], sizes = [8, 8], strides = [1, 1]} : vector<8x128xf32> to vector<8x8xf32>
    %182 = vector.extract_strided_slice %162 {offsets = [0, 40], sizes = [8, 8], strides = [1, 1]} : vector<8x128xf32> to vector<8x8xf32>
    %183 = vector.extract_strided_slice %162 {offsets = [0, 72], sizes = [8, 8], strides = [1, 1]} : vector<8x128xf32> to vector<8x8xf32>
    "tpu.trace_start"() <{level = 10 : i32, message = "qd,kd->qk"}> : () -> ()
    %cst_70 = arith.constant dense<0.000000e+00> : vector<8x8xf32>
    %184 = tpu.matmul %181, %182, %cst_70 {dimension_numbers = #tpu.dot_dimension_numbers<[1], [1], [0], [0], [0, 0, 1, 0], [], []>, precision = #tpu.contract_precision<fp32>} : vector<8x8xf32>, vector<8x8xf32>, vector<8x8xf32> -> vector<8x8xf32>
    "tpu.trace_stop"() : () -> ()
    %cst_71 = arith.constant dense<0xFF800000> : vector<8xf32>
    %185 = vector.multi_reduction <maximumf>, %184, %cst_71 [1] : vector<8x8xf32> to vector<8xf32>
    %186 = vector.shape_cast %185 : vector<8xf32> to vector<8x1xf32>
    %187 = vector.broadcast %186 : vector<8x1xf32> to vector<8x8xf32>
    %188 = arith.subf %184, %187 : vector<8x8xf32>
    %189 = math.exp %188 : vector<8x8xf32>
    %cst_72 = arith.constant dense<0.000000e+00> : vector<8xf32>
    %190 = vector.multi_reduction <add>, %189, %cst_72 [1] : vector<8x8xf32> to vector<8xf32>
    %191 = vector.shape_cast %190 : vector<8xf32> to vector<8x1xf32>
    %192 = vector.broadcast %191 : vector<8x1xf32> to vector<8x8xf32>
    %193 = arith.divf %189, %192 : vector<8x8xf32>
    %cst_73 = arith.constant dense<0.000000e+00> : vector<8x8xf32>
    %194 = tpu.matmul %193, %183, %cst_73 {dimension_numbers = #tpu.dot_dimension_numbers<[1], [0], [0], [1], [0, 0, 1, 1], [], []>, precision = #tpu.contract_precision<fp32>} : vector<8x8xf32>, vector<8x8xf32>, vector<8x8xf32> -> vector<8x8xf32>
    %195 = vector.extract_strided_slice %156 {offsets = [8, 0], sizes = [8, 32], strides = [1, 1]} : vector<32x32xf32> to vector<8x32xf32>
    %cst_74 = arith.constant dense<0.000000e+00> : vector<8x32xf32>
    %196 = tpu.matmul %194, %195, %cst_74 {dimension_numbers = #tpu.dot_dimension_numbers<[1], [0], [0], [1], [0, 0, 1, 1], [], []>, precision = #tpu.contract_precision<fp32>} : vector<8x8xf32>, vector<8x32xf32>, vector<8x32xf32> -> vector<8x32xf32>
    %197 = arith.addf %180, %196 : vector<8x32xf32>
    %198 = vector.extract_strided_slice %162 {offsets = [0, 16], sizes = [8, 8], strides = [1, 1]} : vector<8x128xf32> to vector<8x8xf32>
    %199 = vector.extract_strided_slice %162 {offsets = [0, 48], sizes = [8, 8], strides = [1, 1]} : vector<8x128xf32> to vector<8x8xf32>
    %200 = vector.extract_strided_slice %162 {offsets = [0, 80], sizes = [8, 8], strides = [1, 1]} : vector<8x128xf32> to vector<8x8xf32>
    "tpu.trace_start"() <{level = 10 : i32, message = "qd,kd->qk"}> : () -> ()
    %cst_75 = arith.constant dense<0.000000e+00> : vector<8x8xf32>
    %201 = tpu.matmul %198, %199, %cst_75 {dimension_numbers = #tpu.dot_dimension_numbers<[1], [1], [0], [0], [0, 0, 1, 0], [], []>, precision = #tpu.contract_precision<fp32>} : vector<8x8xf32>, vector<8x8xf32>, vector<8x8xf32> -> vector<8x8xf32>
    "tpu.trace_stop"() : () -> ()
    %cst_76 = arith.constant dense<0xFF800000> : vector<8xf32>
    %202 = vector.multi_reduction <maximumf>, %201, %cst_76 [1] : vector<8x8xf32> to vector<8xf32>
    %203 = vector.shape_cast %202 : vector<8xf32> to vector<8x1xf32>
    %204 = vector.broadcast %203 : vector<8x1xf32> to vector<8x8xf32>
    %205 = arith.subf %201, %204 : vector<8x8xf32>
    %206 = math.exp %205 : vector<8x8xf32>
    %cst_77 = arith.constant dense<0.000000e+00> : vector<8xf32>
    %207 = vector.multi_reduction <add>, %206, %cst_77 [1] : vector<8x8xf32> to vector<8xf32>
    %208 = vector.shape_cast %207 : vector<8xf32> to vector<8x1xf32>
    %209 = vector.broadcast %208 : vector<8x1xf32> to vector<8x8xf32>
    %210 = arith.divf %206, %209 : vector<8x8xf32>
    %cst_78 = arith.constant dense<0.000000e+00> : vector<8x8xf32>
    %211 = tpu.matmul %210, %200, %cst_78 {dimension_numbers = #tpu.dot_dimension_numbers<[1], [0], [0], [1], [0, 0, 1, 1], [], []>, precision = #tpu.contract_precision<fp32>} : vector<8x8xf32>, vector<8x8xf32>, vector<8x8xf32> -> vector<8x8xf32>
    %212 = vector.extract_strided_slice %156 {offsets = [16, 0], sizes = [8, 32], strides = [1, 1]} : vector<32x32xf32> to vector<8x32xf32>
    %cst_79 = arith.constant dense<0.000000e+00> : vector<8x32xf32>
    %213 = tpu.matmul %211, %212, %cst_79 {dimension_numbers = #tpu.dot_dimension_numbers<[1], [0], [0], [1], [0, 0, 1, 1], [], []>, precision = #tpu.contract_precision<fp32>} : vector<8x8xf32>, vector<8x32xf32>, vector<8x32xf32> -> vector<8x32xf32>
    %214 = arith.addf %197, %213 : vector<8x32xf32>
    %215 = vector.extract_strided_slice %162 {offsets = [0, 24], sizes = [8, 8], strides = [1, 1]} : vector<8x128xf32> to vector<8x8xf32>
    %216 = vector.extract_strided_slice %162 {offsets = [0, 56], sizes = [8, 8], strides = [1, 1]} : vector<8x128xf32> to vector<8x8xf32>
    %217 = vector.extract_strided_slice %162 {offsets = [0, 88], sizes = [8, 8], strides = [1, 1]} : vector<8x128xf32> to vector<8x8xf32>
    "tpu.trace_start"() <{level = 10 : i32, message = "qd,kd->qk"}> : () -> ()
    %cst_80 = arith.constant dense<0.000000e+00> : vector<8x8xf32>
    %218 = tpu.matmul %215, %216, %cst_80 {dimension_numbers = #tpu.dot_dimension_numbers<[1], [1], [0], [0], [0, 0, 1, 0], [], []>, precision = #tpu.contract_precision<fp32>} : vector<8x8xf32>, vector<8x8xf32>, vector<8x8xf32> -> vector<8x8xf32>
    "tpu.trace_stop"() : () -> ()
    %cst_81 = arith.constant dense<0xFF800000> : vector<8xf32>
    %219 = vector.multi_reduction <maximumf>, %218, %cst_81 [1] : vector<8x8xf32> to vector<8xf32>
    %220 = vector.shape_cast %219 : vector<8xf32> to vector<8x1xf32>
    %221 = vector.broadcast %220 : vector<8x1xf32> to vector<8x8xf32>
    %222 = arith.subf %218, %221 : vector<8x8xf32>
    %223 = math.exp %222 : vector<8x8xf32>
    %cst_82 = arith.constant dense<0.000000e+00> : vector<8xf32>
    %224 = vector.multi_reduction <add>, %223, %cst_82 [1] : vector<8x8xf32> to vector<8xf32>
    %225 = vector.shape_cast %224 : vector<8xf32> to vector<8x1xf32>
    %226 = vector.broadcast %225 : vector<8x1xf32> to vector<8x8xf32>
    %227 = arith.divf %223, %226 : vector<8x8xf32>
    %cst_83 = arith.constant dense<0.000000e+00> : vector<8x8xf32>
    %228 = tpu.matmul %227, %217, %cst_83 {dimension_numbers = #tpu.dot_dimension_numbers<[1], [0], [0], [1], [0, 0, 1, 1], [], []>, precision = #tpu.contract_precision<fp32>} : vector<8x8xf32>, vector<8x8xf32>, vector<8x8xf32> -> vector<8x8xf32>
    %229 = vector.extract_strided_slice %156 {offsets = [24, 0], sizes = [8, 32], strides = [1, 1]} : vector<32x32xf32> to vector<8x32xf32>
    %cst_84 = arith.constant dense<0.000000e+00> : vector<8x32xf32>
    %230 = tpu.matmul %228, %229, %cst_84 {dimension_numbers = #tpu.dot_dimension_numbers<[1], [0], [0], [1], [0, 0, 1, 1], [], []>, precision = #tpu.contract_precision<fp32>} : vector<8x8xf32>, vector<8x32xf32>, vector<8x32xf32> -> vector<8x32xf32>
    %231 = arith.addf %214, %230 : vector<8x32xf32>
    %232 = vector.extract_strided_slice %154 {offsets = [1, 0], sizes = [1, 32], strides = [1, 1]} : vector<8x128xf32> to vector<1x32xf32>
    %233 = vector.broadcast %232 : vector<1x32xf32> to vector<8x32xf32>
    %234 = arith.addf %231, %233 : vector<8x32xf32>
    %235 = arith.addf %152, %234 : vector<8x32xf32>
    %236 = vector.extract_strided_slice %154 {offsets = [2, 0], sizes = [1, 32], strides = [1, 1]} : vector<8x128xf32> to vector<1x32xf32>
    %237 = vector.extract_strided_slice %154 {offsets = [3, 0], sizes = [1, 32], strides = [1, 1]} : vector<8x128xf32> to vector<1x32xf32>
    %cst_85 = arith.constant dense<0.000000e+00> : vector<8xf32>
    %238 = vector.multi_reduction <add>, %235, %cst_85 [1] : vector<8x32xf32> to vector<8xf32>
    %239 = vector.shape_cast %238 : vector<8xf32> to vector<8x1xf32>
    %cst_86 = arith.constant 3.200000e+01 : f32
    %240 = vector.broadcast %cst_86 : f32 to vector<8x1xf32>
    %241 = arith.divf %239, %240 : vector<8x1xf32>
    %242 = vector.broadcast %241 : vector<8x1xf32> to vector<8x32xf32>
    %243 = arith.subf %235, %242 : vector<8x32xf32>
    %244 = arith.mulf %243, %243 : vector<8x32xf32>
    %cst_87 = arith.constant dense<0.000000e+00> : vector<8xf32>
    %245 = vector.multi_reduction <add>, %244, %cst_87 [1] : vector<8x32xf32> to vector<8xf32>
    %246 = vector.shape_cast %245 : vector<8xf32> to vector<8x1xf32>
    %cst_88 = arith.constant 3.200000e+01 : f32
    %247 = vector.broadcast %cst_88 : f32 to vector<8x1xf32>
    %248 = arith.divf %246, %247 : vector<8x1xf32>
    %249 = vector.broadcast %241 : vector<8x1xf32> to vector<8x32xf32>
    %250 = arith.subf %235, %249 : vector<8x32xf32>
    %cst_89 = arith.constant 9.99999974E-6 : f32
    %251 = vector.broadcast %cst_89 : f32 to vector<8x1xf32>
    %252 = arith.addf %248, %251 : vector<8x1xf32>
    %253 = math.rsqrt %252 : vector<8x1xf32>
    %254 = vector.broadcast %253 : vector<8x1xf32> to vector<8x32xf32>
    %255 = arith.mulf %250, %254 : vector<8x32xf32>
    %256 = vector.broadcast %236 : vector<1x32xf32> to vector<8x32xf32>
    %257 = arith.mulf %255, %256 : vector<8x32xf32>
    %258 = vector.broadcast %237 : vector<1x32xf32> to vector<8x32xf32>
    %259 = arith.addf %257, %258 : vector<8x32xf32>
    %c1_90 = arith.constant 1 : index
    %c0_91 = arith.constant 0 : index
    %c0_92 = arith.constant 0 : index
    %260 = vector.load %arg5[%c1_90, %c0_91, %c0_92] : memref<2x32x64xf32, #tpu.memory_space<vmem>>, vector<1x32x64xf32>
    %261 = vector.shape_cast %260 : vector<1x32x64xf32> to vector<32x64xf32>
    %cst_93 = arith.constant dense<0.000000e+00> : vector<8x64xf32>
    %262 = tpu.matmul %259, %261, %cst_93 {dimension_numbers = #tpu.dot_dimension_numbers<[1], [0], [0], [1], [0, 0, 1, 1], [], []>, precision = #tpu.contract_precision<fp32>} : vector<8x32xf32>, vector<32x64xf32>, vector<8x64xf32> -> vector<8x64xf32>
    %263 = vector.extract_strided_slice %154 {offsets = [4, 0], sizes = [1, 64], strides = [1, 1]} : vector<8x128xf32> to vector<1x64xf32>
    %264 = vector.broadcast %263 : vector<1x64xf32> to vector<8x64xf32>
    %265 = arith.addf %262, %264 : vector<8x64xf32>
    %cst_94 = arith.constant 0.000000e+00 : f32
    %266 = vector.broadcast %cst_94 : f32 to vector<8x64xf32>
    %267 = arith.maximumf %265, %266 : vector<8x64xf32>
    %c1_95 = arith.constant 1 : index
    %c0_96 = arith.constant 0 : index
    %c0_97 = arith.constant 0 : index
    %268 = vector.load %arg6[%c1_95, %c0_96, %c0_97] : memref<2x64x32xf32, #tpu.memory_space<vmem>>, vector<1x64x32xf32>
    %269 = vector.shape_cast %268 : vector<1x64x32xf32> to vector<64x32xf32>
    %cst_98 = arith.constant dense<0.000000e+00> : vector<8x32xf32>
    %270 = tpu.matmul %267, %269, %cst_98 {dimension_numbers = #tpu.dot_dimension_numbers<[1], [0], [0], [1], [0, 0, 1, 1], [], []>, precision = #tpu.contract_precision<fp32>} : vector<8x64xf32>, vector<64x32xf32>, vector<8x32xf32> -> vector<8x32xf32>
    %271 = vector.extract_strided_slice %154 {offsets = [5, 0], sizes = [1, 32], strides = [1, 1]} : vector<8x128xf32> to vector<1x32xf32>
    %272 = vector.broadcast %271 : vector<1x32xf32> to vector<8x32xf32>
    %273 = arith.addf %270, %272 : vector<8x32xf32>
    %274 = arith.addf %259, %273 : vector<8x32xf32>
    %275 = vector.extract_strided_slice %154 {offsets = [6, 0], sizes = [1, 32], strides = [1, 1]} : vector<8x128xf32> to vector<1x32xf32>
    %276 = vector.extract_strided_slice %154 {offsets = [7, 0], sizes = [1, 32], strides = [1, 1]} : vector<8x128xf32> to vector<1x32xf32>
    %cst_99 = arith.constant dense<0.000000e+00> : vector<8xf32>
    %277 = vector.multi_reduction <add>, %274, %cst_99 [1] : vector<8x32xf32> to vector<8xf32>
    %278 = vector.shape_cast %277 : vector<8xf32> to vector<8x1xf32>
    %cst_100 = arith.constant 3.200000e+01 : f32
    %279 = vector.broadcast %cst_100 : f32 to vector<8x1xf32>
    %280 = arith.divf %278, %279 : vector<8x1xf32>
    %281 = vector.broadcast %280 : vector<8x1xf32> to vector<8x32xf32>
    %282 = arith.subf %274, %281 : vector<8x32xf32>
    %283 = arith.mulf %282, %282 : vector<8x32xf32>
    %cst_101 = arith.constant dense<0.000000e+00> : vector<8xf32>
    %284 = vector.multi_reduction <add>, %283, %cst_101 [1] : vector<8x32xf32> to vector<8xf32>
    %285 = vector.shape_cast %284 : vector<8xf32> to vector<8x1xf32>
    %cst_102 = arith.constant 3.200000e+01 : f32
    %286 = vector.broadcast %cst_102 : f32 to vector<8x1xf32>
    %287 = arith.divf %285, %286 : vector<8x1xf32>
    %288 = vector.broadcast %280 : vector<8x1xf32> to vector<8x32xf32>
    %289 = arith.subf %274, %288 : vector<8x32xf32>
    %cst_103 = arith.constant 9.99999974E-6 : f32
    %290 = vector.broadcast %cst_103 : f32 to vector<8x1xf32>
    %291 = arith.addf %287, %290 : vector<8x1xf32>
    %292 = math.rsqrt %291 : vector<8x1xf32>
    %293 = vector.broadcast %292 : vector<8x1xf32> to vector<8x32xf32>
    %294 = arith.mulf %289, %293 : vector<8x32xf32>
    %295 = vector.broadcast %275 : vector<1x32xf32> to vector<8x32xf32>
    %296 = arith.mulf %294, %295 : vector<8x32xf32>
    %297 = vector.broadcast %276 : vector<1x32xf32> to vector<8x32xf32>
    %298 = arith.addf %296, %297 : vector<8x32xf32>
    %c0_104 = arith.constant 0 : index
    %c0_105 = arith.constant 0 : index
    %299 = vector.load %arg8[%c0_104, %c0_105] : memref<32x128xf32, #tpu.memory_space<vmem>>, vector<32x128xf32>
    %cst_106 = arith.constant dense<0.000000e+00> : vector<8x128xf32>
    %300 = tpu.matmul %298, %299, %cst_106 {dimension_numbers = #tpu.dot_dimension_numbers<[1], [0], [0], [1], [0, 0, 1, 1], [], []>, precision = #tpu.contract_precision<fp32>} : vector<8x32xf32>, vector<32x128xf32>, vector<8x128xf32> -> vector<8x128xf32>
    %301 = vector.extract_strided_slice %0 {offsets = [1, 0], sizes = [1, 128], strides = [1, 1]} : vector<2x128xf32> to vector<1x128xf32>
    %302 = vector.broadcast %301 : vector<1x128xf32> to vector<8x128xf32>
    %303 = arith.addf %300, %302 : vector<8x128xf32>
    %c0_107 = arith.constant 0 : index
    %c0_108 = arith.constant 0 : index
    %304 = vector.load %arg10[%c0_107, %c0_108] : memref<8x128xf32, #tpu.memory_space<vmem>>, vector<8x128xf32>
    tpu.vector_store %arg10[%c0_107, %c0_108], %303 {strides = array<i32>} : memref<8x128xf32, #tpu.memory_space<vmem>>, vector<8x128xf32>,
    return
  }
  func.func @transform_0(%arg0: i32) -> (i32, i32) {
    %c0_i32 = arith.constant 0 : i32
    %c0_i32_0 = arith.constant 0 : i32
    return %arg0, %c0_i32 : i32, i32
  }
  func.func @transform_1(%arg0: i32) -> (i32, i32) {
    %c0_i32 = arith.constant 0 : i32
    %c0_i32_0 = arith.constant 0 : i32
    %c0_i32_1 = arith.constant 0 : i32
    return %c0_i32, %c0_i32_0 : i32, i32
  }
  func.func @transform_2(%arg0: i32) -> (i32, i32, i32) {
    %c0_i32 = arith.constant 0 : i32
    %c0_i32_0 = arith.constant 0 : i32
    %c0_i32_1 = arith.constant 0 : i32
    %c0_i32_2 = arith.constant 0 : i32
    return %c0_i32, %c0_i32_0, %c0_i32_1 : i32, i32, i32
  }
  func.func @transform_3(%arg0: i32) -> (i32, i32, i32) {
    %c0_i32 = arith.constant 0 : i32
    %c0_i32_0 = arith.constant 0 : i32
    %c0_i32_1 = arith.constant 0 : i32
    %c0_i32_2 = arith.constant 0 : i32
    return %c0_i32, %c0_i32_0, %c0_i32_1 : i32, i32, i32
  }
  func.func @transform_4(%arg0: i32) -> (i32, i32, i32) {
    %c0_i32 = arith.constant 0 : i32
    %c0_i32_0 = arith.constant 0 : i32
    %c0_i32_1 = arith.constant 0 : i32
    %c0_i32_2 = arith.constant 0 : i32
    return %c0_i32, %c0_i32_0, %c0_i32_1 : i32, i32, i32
  }
  func.func @transform_5(%arg0: i32) -> (i32, i32, i32) {
    %c0_i32 = arith.constant 0 : i32
    %c0_i32_0 = arith.constant 0 : i32
    %c0_i32_1 = arith.constant 0 : i32
    %c0_i32_2 = arith.constant 0 : i32
    return %c0_i32, %c0_i32_0, %c0_i32_1 : i32, i32, i32
  }
  func.func @transform_6(%arg0: i32) -> (i32, i32, i32) {
    %c0_i32 = arith.constant 0 : i32
    %c0_i32_0 = arith.constant 0 : i32
    %c0_i32_1 = arith.constant 0 : i32
    %c0_i32_2 = arith.constant 0 : i32
    return %c0_i32, %c0_i32_0, %c0_i32_1 : i32, i32, i32
  }
  func.func @transform_7(%arg0: i32) -> (i32, i32) {
    %c0_i32 = arith.constant 0 : i32
    %c0_i32_0 = arith.constant 0 : i32
    %c0_i32_1 = arith.constant 0 : i32
    return %c0_i32, %c0_i32_0 : i32, i32
  }
  func.func @transform_8(%arg0: i32) -> (i32, i32) {
    %c0_i32 = arith.constant 0 : i32
    %c0_i32_0 = arith.constant 0 : i32
    %c0_i32_1 = arith.constant 0 : i32
    return %c0_i32, %c0_i32_0 : i32, i32
  }
  func.func @transform_9(%arg0: i32) -> (i32, i32) {
    %c0_i32 = arith.constant 0 : i32
    %c0_i32_0 = arith.constant 0 : i32
    return %arg0, %c0_i32 : i32, i32
  }
}

</mosaic_0001>

<bundles_post_ra>
// kernel: simple_transformer_pallas.1
= control target key start
LH: loop header
LB: loop body
LE: loop exit
PB: predicated region body
PF: predicated region fallthrough
CT: control target
= control target key end

     0   :  { %14 = vsyncpa [#allocation3], 0  ;;  %s19726_s0 = inlined_call_operand.hbm [shape: f32[16,16], index: 0, kind: input, shape index: {}]   ;;  %s19727_s1 = inlined_call_operand.hbm [shape: f32[16,32], index: 1, kind: input, shape index: {}]   ;;  %s19728_s2 = inlined_call_operand.vmem [shape: f32[2,32,128], index: 2, kind: input, shape index: {}]   ;;  %s19729_s3 = inlined_call_operand.vmem [shape: f32[2,32,32], index: 3, kind: input, shape index: {}]   ;;  %s19730_s4 = inlined_call_operand.vmem [shape: f32[2,32,64], index: 4, kind: input, shape index: {}]   ;;  %s19731_s5 = inlined_call_operand.vmem [shape: f32[2,64,32], index: 5, kind: input, shape index: {}]   ;;  %s19732_s6 = inlined_call_operand.hbm [shape: f32[2,8,128], index: 6, kind: input, shape index: {}]   ;;  %s19733_s7 = inlined_call_operand.hbm [shape: f32[32,128], index: 7, kind: input, shape index: {}]   ;;  %s19734_s8 = inlined_call_operand.vmem [shape: f32[2,128], index: 8, kind: input, shape index: {}]   ;;  %s19735_s9 = inlined_call_operand.vmem [shape: f32[16,128], index: 9, kind: output, shape index: {}]  }
   0x1   :  { %16 = vsyncpa [#allocation3 + $0x1], 0 }
   0x2   :  { %17 = vsyncpa [#allocation5], 0 }
   0x3   :  { %18 = vsyncpa [#allocation8], 0  ;;  %s17866_s30 = smov 0   ;;  %s17868_s10 = smov 0  }
   0x4   :  { %s17870_s11 = smov 0   ;;  %s17872_s12 = smov 0  }
   0x5 LB: > { %s17885_s13 = sadd.s32 4294967295, %s17795_s12   ;;  %p44_p0 = scmp.ne.s32.totalorder %s17787_s10, %s17783_s30  ;;  %s17795_s12 = sphi %s17872_s12, %s19758_s12   ;;  %s17791_s11 = sphi %s17870_s11, %s19757_s11   ;;  %s17787_s10 = sphi %s17868_s10, %s19756_s10   ;;  %s17783_s30 = sphi %s17866_s30, %s19755_s30  }
   0x6   : > { %p19736_p1 = scmp.eq.s32.totalorder %s17885_s13, 0  ;;  %p15600_p2 = scmp.ge.s32.totalorder %s17795_s12, 1 }
   0x7   : > { %p249_p3 = scmp.lt.s32.totalorder %s17795_s12, 3  ;;  %s17797_s16 = smov [#allocation4]  }
   0x8   : > { %p17893_p4 = por %p19736_p1, %p44_p0  ;;  %s261_s17 = sshll.u32 %s17797_s16, 4  ;;  %s262_s17 = int_to_ptr.vmem [resolvable:$true] %s261_s17 }
   0x9   : > { %p17897_p5 = pnand %p15600_p2, %p249_p3  ;;  %s17798_s19 = smov [#allocation6]  }
   0xa   : > { %s19742_s14 = scalar_select %p17893_p4, 1, 0 }
   0xb   : > { %s19743_s15 = scalar_select %p17897_p5, 1, 0 }
   0xc   : > { %p17533_p6 = pneg %p17897_p5  ;;  %s286_s20 = sshll.u32 %s17798_s19, 4  ;;  %s287_s20 = int_to_ptr.vmem [resolvable:$true] %s286_s20 }
   0xd   : > { %s17799_s21 = smov [#allocation7]   ;;  %s17658_s23 = scalar_lea.vmem %s262_s17, 256 }
   0xe   : > { %p17905_p7 = pnand %p17533_p6, %p19736_p1  ;;  %s299_s22 = sshll.u32 %s17799_s21, 4  ;;  %s300_s22 = int_to_ptr.vmem [resolvable:$true] %s299_s22 }
   0xf   : > { %p17659_p9 = scmp.ne.s32.totalorder %s262_s17, %s17658_s23  ;;  %p17666_p12 = scmp.lt.s32.totalorder %s262_s17, %s262_s17 }
  0x10   : > { %p17649_p8 = pneg %p17905_p7  ;;  %p17667_p13 = scmp.lt.s32.totalorder %s17658_s23, %s17658_s23 }
  0x12   : > { %p17661_p10 = pnand %p17659_p9, %p17649_p8  ;;  %p17668_p0 = por %p17667_p13, %p17666_p12 }
  0x14   : > { %p17662_p11 = pneg %p17661_p10 }
  0x16   : > { %p17669_p2 = pnand %p17668_p0, %p17662_p11 }
  0x18   : > { %17672 = shalt.err (!%p17669_p2)
}
  0x19   : > { %s17800_s24 = smov 128   ;;  %s17801_s25 = smov 8  }
  0x1a   : > { %17536 = dma.hbm_to_vmem [thread:$0]  (!%p17905_p7), %s19727_s1, 256, %s262_s17, [#allocation5], %s17800_s24, %s17800_s24, %s17801_s25  }
  0x1b   : > { %s17684_s28 = scalar_lea.vmem %s287_s20, 256  ;;  %p17692_p10 = scmp.lt.s32.totalorder %s287_s20, %s287_s20 }
  0x1c   : > { %p17685_p3 = scmp.ne.s32.totalorder %s287_s20, %s17684_s28  ;;  %p17693_p1 = scmp.lt.s32.totalorder %s17684_s28, %s17684_s28 }
  0x1e   : > { %p17687_p6 = pnand %p17685_p3, %p17649_p8  ;;  %p17694_p12 = por %p17693_p1, %p17692_p10 }
  0x20   : > { %p17688_p9 = pneg %p17687_p6 }
  0x22   : > { %p17695_p11 = pnand %p17694_p12, %p17688_p9 }
  0x24   : > { %17698 = shalt.err (!%p17695_p11)
}
  0x25   : > { %17539 = dma.hbm_to_vmem [thread:$0]  (!%p17905_p7), %s19732_s6, 256, %s287_s20, [#allocation5], %s17800_s24, %s17800_s24, %s17801_s25  }
  0x26   : > { %s17710_s16 = scalar_lea.vmem %s300_s22, 512  ;;  %p17718_p3 = scmp.lt.s32.totalorder %s300_s22, %s300_s22 }
  0x27   : > { %p17711_p13 = scmp.ne.s32.totalorder %s300_s22, %s17710_s16  ;;  %p17719_p6 = scmp.lt.s32.totalorder %s17710_s16, %s17710_s16 }
  0x29   : > { %p17713_p0 = pnand %p17711_p13, %p17649_p8  ;;  %p17720_p4 = por %p17719_p6, %p17718_p3 }
  0x2b   : > { %p17714_p2 = pneg %p17713_p0 }
  0x2d   : > { %p17721_p1 = pnand %p17720_p4, %p17714_p2 }
  0x2f   : > { %17724 = shalt.err (!%p17721_p1)
}
  0x30   : > { %17542 = dma.hbm_to_vmem [thread:$0]  (!%p17905_p7), %s19733_s7, 512, %s300_s22, [#allocation8], %s17800_s24, %s17800_s24, %s17801_s25  }
  0x31   : > { %s17936_s20 = sadd.s32 1, %s17795_s12   ;;  %s31_s23 = sadd.s32 1, %s17791_s11 }
  0x32   : > { %s28_s21 = ssub.s32 %s17795_s12, %s17936_s20  ;;  %p38_p8 = scmp.ne.s32.totalorder %s17791_s11, %s17787_s10 }
  0x33   : > { %p29_p4 = scmp.eq.s32.totalorder %s28_s21, 0  ;;  %p39_p9 = scmp.eq.s32.totalorder %s17795_s12, 0 }
  0x34   : > { %p17550_p10 = scmp.lt.s32.totalorder %s17795_s12, 2  ;;  %s316_s26 = sand.u32 1, %s17791_s11  }
  0x35   : > { %s17946_s18 = scalar_select %p29_p4, %s17791_s11, %s31_s23  }
  0x36   : > { %p40_p12 = por %p39_p9, %p38_p8  ;;  %s15605_s27 = sshll.u32 %s316_s26, 3 }
  0x37   : > { %s15606_s28 = sshll.u32 %s17795_s12, 7  ;;  %s320_s22 = scalar_lea.vmem [#allocation2], %s15605_s27 }
  0x38   : > { %s17953_s16 = scalar_lea.hbm %s19726_s0, %s15606_s28  ;;  %s327_s24 = sshll.u32 %s320_s22, 4  ;;  %s328_s24 = int_to_ptr.vmem [resolvable:$true] %s327_s24 }
  0x39   : > { %p17955_p7 = pnand %p17550_p10, %p40_p12  ;;  %s317_s17 = scalar_lea.sflag [#allocation3], %s316_s26 }
  0x3a   : > { %s17725_s19 = scalar_lea.hbm %s17953_s16, 128  ;;  %s17730_s23 = scalar_lea.hbm %s19726_s0, 256 }
  0x3b   : > { %p17726_p11 = scmp.ne.s32.totalorder %s17953_s16, %s17725_s19  ;;  %p17727_p13 = pneg %p17955_p7 }
  0x3c   : > { %p17731_p3 = scmp.lt.s32.totalorder %s17953_s16, %s19726_s0  ;;  %p17732_p6 = scmp.lt.s32.totalorder %s17730_s23, %s17725_s19 }
  0x3d   : > { %p17728_p0 = pnand %p17727_p13, %p17726_p11 }
  0x3e   : > { %p17733_p1 = por %p17732_p6, %p17731_p3 }
  0x3f   : > { %p17729_p2 = pneg %p17728_p0 }
  0x41   : > { %p17734_p4 = pnand %p17733_p1, %p17729_p2 }
  0x43   : > { %17737 = shalt.err (!%p17734_p4)
}
  0x44   : > { %s17738_s29 = scalar_lea.vmem %s328_s24, 128  ;;  %s17802_s26 = smov [#allocation2]  }
  0x45   : > { %p17739_p8 = scmp.ne.s32.totalorder %s328_s24, %s17738_s29  ;;  %s17743_s30 = sshll.u32 %s17802_s26, 4  ;;  %s17744_s30 = int_to_ptr.vmem [resolvable:$false] %s17743_s30 }
  0x46   : > { %s17745_s22 = scalar_lea.vmem %s17744_s30, 256  ;;  %p17746_p12 = scmp.lt.s32.totalorder %s328_s24, %s17744_s30 }
  0x47   : > { %p17741_p9 = pnand %p17739_p8, %p17727_p13  ;;  %p17747_p11 = scmp.lt.s32.totalorder %s17745_s22, %s17738_s29 }
  0x49   : > { %p17742_p10 = pneg %p17741_p9  ;;  %p17748_p0 = por %p17747_p11, %p17746_p12 }
  0x4b   : > { %p17749_p5 = pnand %p17748_p0, %p17742_p10 }
  0x4d   : > { %17752 = shalt.err (!%p17749_p5)
}
  0x4e   : > { %17546 = dma.hbm_to_vmem [thread:$0]  (!%p17955_p7), %s17953_s16, 128, %s328_s24, %s317_s17  }
  0x4f   : > { %p19746_p2 = scmp.ne.s32.totalorder %s19743_s15, 0 }
  0x50   : > { %s338_s19 = sand.u32 (!%p19746_p2), 1, %s17787_s10   ;;  %p19747_p13 = scmp.ne.s32.totalorder (!%p19746_p2), %s19742_s14, 0 }
  0x51   : > { %336 = sbr.rel (%p19746_p2) target bundleno = 9462 (0x24f6), region = 56  ;;  %s15608_s12 = sshll.u32 (!%p19746_p2), %s338_s19, 3 }
  0x52   : > { %s339_s21 = scalar_lea.sflag (!%p19746_p2), [#allocation3], %s338_s19  ;;  %s342_s23 = scalar_lea.vmem (!%p19746_p2), [#allocation2], %s15608_s12 }
  0x56   : > { %17770 = dma.done.wait (%p19747_p13), %s339_s21, 128  }
  0x57   : > { %17772 = vsyncadd (%p19747_p13), %s339_s21, 4294967168  ;;  %p19748_p5 = scmp.eq.s32.totalorder %s17885_s13, 0 }
  0x59   : > { %17774 = dma.done.wait (%p19748_p5), [#allocation5], 512   ;;  %p19749_p3 = pmov %p19748_p5 }
  0x5b   : > { %17776 = vsyncadd (%p19749_p3), [#allocation5], 4294966784  ;;  %p19750_p7 = pmov %p19749_p3 }
  0x5c   : > { %p19751_p6 = pmov %p19749_p3 }
  0x5d   : > { %17778 = dma.done.wait (%p19750_p7), [#allocation8], 512  }
  0x5e   : > { %17780 = vsyncadd (%p19751_p6), [#allocation8], 4294966784  ;;  %v17803_v0 = vmov 0.0   ;;  %vm17804_vm0 = vmmov 0   ;;  %vm400_vm1 = vcmask 130048   ;;  %v395_v1 = vld [vmem:[#allocation4 + $0x8] sm:$0xff]  ;;  %v396_v44 = vlaneseq }
  0x5f   : > { %16199 = vmatprep.subr.mxu0 %v17803_v0  ;;  %16206 = vmatprep.subr.mxu1 %v17803_v0  ;;  %v394_v2 = vld [vmem:[#allocation4] sm:$0xff]  ;;  %v393_v3 = vld [vmem:[%s342_s23] sm:$0xff]  ;;  %v433_v4 = vand.u32 4294901760, %v395_v1  ;;  %v871_v20 = vld [vmem:[%s19728_s2 + $0x18] sm:$0xff]  ;;  %vm876_vm2 = vcmask 261120   ;;  %s17805_s30 = smov 64  }
  0x60   : > { %16203 = vmatprep.mubr.msk.f32.mxu0 %vm17804_vm0, %v17803_v0  ;;  %16210 = vmatprep.mubr.msk.f32.mxu1 %vm17804_vm0, %v17803_v0  ;;  %v436_v5 = vand.u32 4294901760, %v394_v2  ;;  %v402_v6 = vsel %vm400_vm1, %v393_v3, 0  ;;  %v18021_v21 = vand.u32 4294901760, %v871_v20  ;;  %v870_v22 = vld [vmem:[%s19728_s2 + $0x10] sm:$0xff]  ;;  %v869_v25 = vld [vmem:[%s19728_s2 + $0x8] sm:$0xff]  ;;  %v868_v29 = vld [vmem:[%s19728_s2] sm:$0xff] }
  0x61   : > { %v471_v7 = vand.u32 4294901760, %v402_v6  ;;  %16200 = vmatpush3.msra.mxu0 %v433_v4  ;;  %v511_v8 = vsub.f32 %v395_v1, %v433_v4  ;;  %v18029_v24 = vand.u32 4294901760, %v870_v22  ;;  %v18040_v28 = vand.u32 4294901760, %v869_v25  ;;  %v392_v47 = vld [vmem:[%s19734_s8] sm:$0x3]  ;;  %s17806_s22 = smov 96  }
  0x62   : > { %v518_v9 = vsub.f32 %v394_v2, %v436_v5  ;;  %16201 = vmatprep.subr.mxu0 %v17803_v0  ;;  %v18027_v23 = vsub.f32 %v871_v20, %v18021_v21  ;;  %v18054_v33 = vand.u32 4294901760, %v868_v29  ;;  %v18078_v45 = vshrl.u32 %v396_v44, 7  ;;  %s17807_s19 = smov 88   ;;  %s17808_s12 = smov 120  }
  0x63   : > { %v472_v10 = vsub.f32 %v402_v6, %v471_v7  ;;  %16202 = vmatpush3.msra.mxu0 %v436_v5  ;;  %v512_v11 = vand.u32 4294901760, %v511_v8  ;;  %v18038_v27 = vsub.f32 %v870_v22, %v18029_v24  ;;  %v18052_v32 = vsub.f32 %v869_v25, %v18040_v28  ;;  %s17809_s21 = smov 56   ;;  %s17810_s23 = smov 80  }
  0x64   : > { %v519_v12 = vand.u32 4294901760, %v518_v9  ;;  %16213 = vmatprep.subr.mxu0 %v17803_v0  ;;  %v986_v26 = vand.u32 4294901760, %v18027_v23  ;;  %v18063_v37 = vsub.f32 %v868_v29, %v18054_v33  ;;  %v18081_v46 = vsub.s32 0, %v18078_v45  ;;  %s17811_s14 = smov 112   ;;  %s17812_s17 = smov 48  }
  0x65   : > { %v473_v13 = vand.u32 4294901760, %v472_v10  ;;  %v513_v14 = vsub.f32 %v511_v8, %v512_v11  ;;  %v993_v31 = vand.u32 4294901760, %v18038_v27  ;;  %v1000_v36 = vand.u32 4294901760, %v18052_v32  ;;  %s19741_s28 = smov 72   ;;  %s19740_s27 = smov 104  }
  0x66   : > { %v520_v15 = vsub.f32 %v518_v9, %v519_v12  ;;  %v987_v30 = vsub.f32 %v18027_v23, %v986_v26  ;;  %v1007_v40 = vand.u32 4294901760, %v18063_v37  ;;  %v399_v48 = vrot.slane %v392_v47, %v18081_v46  ;;  %s19739_s15 = smov 40   ;;  %p388_p1 = scmp.lt.s32.totalorder %s17885_s13, 1 }
  0x67   : > { %v474_v16 = vsub.f32 %v472_v10, %v473_v13  ;;  %v514_v17 = vand.u32 4294901760, %v513_v14  ;;  %v994_v35 = vsub.f32 %v18038_v27, %v993_v31  ;;  %v1001_v39 = vsub.f32 %v18052_v32, %v1000_v36 }
  0x68   : > { %v521_v18 = vand.u32 4294901760, %v520_v15  ;;  %v988_v34 = vand.u32 4294901760, %v987_v30  ;;  %v1008_v42 = vsub.f32 %v18063_v37, %v1007_v40  ;;  %vm1368_vm3 = vcmask 64512   ;;  %s19760_s13 = smov (!%p388_p1, %s17885_s13), 1 }
  0x69   : > { %v475_v19 = vand.u32 4294901760, %v474_v16  ;;  %16207 = vmatpush3.msra.mxu1 %v514_v17  ;;  %v995_v38 = vand.u32 4294901760, %v994_v35  ;;  %v1002_v41 = vand.u32 4294901760, %v1001_v39  ;;  %vm7370_vm4 = vcmask 523264  }
  0x6a   : > { %16208 = vmatprep.subr.mxu1 %v17803_v0  ;;  %v1009_v43 = vand.u32 4294901760, %v1008_v42 }
  0x6b   : > { %16204 = vmatmul.mubr.f32.vlgmr.msra.gmra.mxu0 %v475_v19  ;;  %16209 = vmatpush3.msra.mxu1 %v521_v18 }
  0x6c   : > { %16214 = vmatpush3.msra.mxu0 %v511_v8  ;;  %16211 = vmatmul.mubr.f32.vlgmr.msra.gmra.mxu1 %v471_v7 }
  0x6d   : > { %16215 = vmatprep.subr.mxu0 %v17803_v0  ;;  %16220 = vmatprep.subr.mxu1 %v17803_v0 }
  0x6e   : > { %16216 = vmatpush3.msra.mxu0 %v518_v9  ;;  %16217 = vmatprep.mubr.msk.f32.mxu0 %vm17804_vm0, %v17803_v0 }
  0x6f   : > { %16221 = vmatpush3.msra.mxu1 %v433_v4  ;;  %16218 = vmatmul.mubr.f32.vlgmr.msra.gmra.mxu0 %v472_v10 }
  0x70   : > { %16222 = vmatprep.subr.mxu1 %v17803_v0  ;;  %16227 = vmatprep.subr.mxu0 %v17803_v0 }
  0x71   : > { %16223 = vmatpush3.msra.mxu1 %v436_v5  ;;  %16224 = vmatprep.mubr.msk.f32.mxu1 %vm17804_vm0, %v17803_v0 }
  0x72   : > { %16228 = vmatpush3.msra.mxu0 %v512_v11  ;;  %16225 = vmatmul.mubr.f32.vlgmr.msra.gmra.mxu1 %v473_v13  ;;  %v863_v13 = vld [vmem:[#allocation6] sm:$0xff] }
  0x73   : > { %16229 = vmatprep.subr.mxu0 %v17803_v0  ;;  %16234 = vmatprep.subr.mxu1 %v17803_v0  ;;  %v875_v16 = vrot.slane %v863_v13, %v18081_v46 }
  0x74   : > { %16230 = vmatpush3.msra.mxu0 %v519_v12  ;;  %16231 = vmatprep.mubr.msk.f32.mxu0 %vm17804_vm0, %v17803_v0 }
  0x75   : > { %16235 = vmatpush3.msra.mxu1 %v433_v4  ;;  %16232 = vmatmul.mubr.f32.vlgmr.msra.gmra.mxu0 %v471_v7 }
  0x76   : > { %16236 = vmatprep.subr.mxu1 %v17803_v0  ;;  %16238 = vmatprep.mubr.msk.f32.mxu1 %vm17804_vm0, %v17803_v0 }
  0x77   : > { %16237 = vmatpush3.msra.mxu1 %v436_v5  ;;  %16241 = vmatprep.subr.mxu0 %v17803_v0 }
  0x78   : > { %16239 = vmatmul.mubr.f32.vlgmr.msra.gmra.mxu1 %v471_v7  ;;  %16252 = vmatprep.subr.mxu1 %v17803_v0 }
  0x79   : > { %16260 = vmatprep.mubr.msk.f32.mxu1 %vm17804_vm0, %v17803_v0  ;;  %16249 = vmatprep.mubr.msk.f32.mxu0 %vm17804_vm0, %v17803_v0 }
  0x7a   : > { %16242 = vmatpush3.msra.mxu0 %v18021_v21  ;;  %16253 = vmatpush3.msra.mxu1 %v988_v34 }
  0x7b   : > { %16243 = vmatprep.subr.mxu0 %v17803_v0  ;;  %16254 = vmatprep.subr.mxu1 %v17803_v0 }
  0x7c   : > { %16244 = vmatpush3.msra.mxu0 %v18029_v24  ;;  %16255 = vmatpush3.msra.mxu1 %v995_v38 }
  0x7d   : > { %16245 = vmatprep.subr.mxu0 %v17803_v0  ;;  %16256 = vmatprep.subr.mxu1 %v17803_v0 }
  0x7e   : > { %16246 = vmatpush3.msra.mxu0 %v18040_v28  ;;  %16257 = vmatpush3.msra.mxu1 %v1002_v41 }
  0x7f   : > { %16247 = vmatprep.subr.mxu0 %v17803_v0  ;;  %16258 = vmatprep.subr.mxu1 %v17803_v0 }
  0x80   : > { %16248 = vmatpush3.msra.mxu0 %v18054_v33  ;;  %16259 = vmatpush3.msra.mxu1 %v1009_v43 }
  0x81   : > { %16263 = vmatprep.subr.mxu0 %v17803_v0  ;;  %16274 = vmatprep.subr.mxu1 %v17803_v0 }
 0x12b   : > { %v477_v49 = vpop.f32.mrf.mxu0 }
 0x12c   : > { %v478_v50 = vadd.f32 %v477_v49, %v399_v48  ;;  %v558_v52 = vpop.f32.mrf.mxu1 }
 0x12d   : > { %v16205_v51 = vpop.f32.mrf.mxu0 }
 0x12e   : > { %v559_v53 = vadd.f32 %v558_v52, %v478_v50  ;;  %v16212_v54 = vpop.f32.mrf.mxu1 }
 0x12f   : > { %v634_v55 = vpop.f32.mrf.mxu0 }
 0x130   : > { %v635_v56 = vadd.f32 %v634_v55, %v559_v53 }
 0x131   : > { %v16219_v57 = vpop.f32.mrf.mxu0 }
 0x132   : > { %v709_v58 = vpop.f32.mrf.mxu1 }
 0x133   : > { %v710_v59 = vadd.f32 %v709_v58, %v635_v56 }
 0x134   : > { %v16226_v60 = vpop.f32.mrf.mxu1 }
 0x135   : > { %v786_v61 = vpop.f32.mrf.mxu0 }
 0x136   : > { %v787_v62 = vadd.f32 %v786_v61, %v710_v59 }
 0x137   : > { %v16233_v63 = vpop.f32.mrf.mxu0 }
 0x138   : > { %v859_v1 = vpop.f32.mrf.mxu1 }
 0x139   : > { %v18087_v2 = vadd.f32 %v859_v1, %v787_v62 }
 0x13a   : > { %v16240_v3 = vpop.f32.mrf.mxu1 }
 0x13b   : > { %v878_v4 = vsel %vm876_vm2, %v18087_v2, 0 }
 0x13c   : > { %v949_v5 = vand.u32 4294901760, %v878_v4 }
 0x13e   : > { %v950_v6 = vsub.f32 %v878_v4, %v949_v5  ;;  %16261 = vmatmul.mubr.f32.vlgmr.msra.gmra.mxu1 %v949_v5 }
 0x13f   : > { %16275 = vmatpush3.msra.mxu1 %v18021_v21  ;;  %16282 = vmatprep.mubr.msk.f32.mxu1 %vm17804_vm0, %v17803_v0 }
 0x140   : > { %16276 = vmatprep.subr.mxu1 %v17803_v0  ;;  %v951_v7 = vand.u32 4294901760, %v950_v6 }
 0x141   : > { %16277 = vmatpush3.msra.mxu1 %v18029_v24 }
 0x142   : > { %16278 = vmatprep.subr.mxu1 %v17803_v0  ;;  %v952_v8 = vsub.f32 %v950_v6, %v951_v7 }
 0x143   : > { %16279 = vmatpush3.msra.mxu1 %v18040_v28 }
 0x144   : > { %16280 = vmatprep.subr.mxu1 %v17803_v0  ;;  %v953_v9 = vand.u32 4294901760, %v952_v8 }
 0x145   : > { %16281 = vmatpush3.msra.mxu1 %v18054_v33 }
 0x146   : > { %16283 = vmatmul.mubr.f32.vlgmr.msra.gmra.mxu1 %v951_v7  ;;  %16296 = vmatprep.subr.mxu1 %v17803_v0 }
 0x147   : > { %16250 = vmatmul.mubr.f32.vlgmr.msra.gmra.mxu0 %v953_v9  ;;  %16297 = vmatpush3.msra.mxu1 %v18021_v21 }
 0x148   : > { %16264 = vmatpush3.msra.mxu0 %v18027_v23  ;;  %16298 = vmatprep.subr.mxu1 %v17803_v0 }
 0x149   : > { %16265 = vmatprep.subr.mxu0 %v17803_v0  ;;  %16299 = vmatpush3.msra.mxu1 %v18029_v24 }
 0x14a   : > { %16266 = vmatpush3.msra.mxu0 %v18038_v27  ;;  %16300 = vmatprep.subr.mxu1 %v17803_v0 }
 0x14b   : > { %16267 = vmatprep.subr.mxu0 %v17803_v0  ;;  %16301 = vmatpush3.msra.mxu1 %v18040_v28 }
 0x14c   : > { %16268 = vmatpush3.msra.mxu0 %v18052_v32  ;;  %16302 = vmatprep.subr.mxu1 %v17803_v0 }
 0x14d   : > { %16269 = vmatprep.subr.mxu0 %v17803_v0  ;;  %16271 = vmatprep.mubr.msk.f32.mxu0 %vm17804_vm0, %v17803_v0 }
 0x14e   : > { %16270 = vmatpush3.msra.mxu0 %v18063_v37  ;;  %16303 = vmatpush3.msra.mxu1 %v18054_v33 }
 0x14f   : > { %16304 = vmatprep.mubr.msk.f32.mxu1 %vm17804_vm0, %v17803_v0  ;;  %16272 = vmatmul.mubr.f32.vlgmr.msra.gmra.mxu0 %v950_v6 }
 0x150   : > { %16285 = vmatprep.subr.mxu0 %v17803_v0  ;;  %16305 = vmatmul.mubr.f32.vlgmr.msra.gmra.mxu1 %v949_v5 }
 0x151   : > { %16286 = vmatpush3.msra.mxu0 %v986_v26  ;;  %16293 = vmatprep.mubr.msk.f32.mxu0 %vm17804_vm0, %v17803_v0 }
 0x152   : > { %16287 = vmatprep.subr.mxu0 %v17803_v0  ;;  %16312 = vmatprep.subr.mxu1 %v17803_v0 }
 0x153   : > { %16288 = vmatpush3.msra.mxu0 %v993_v31  ;;  %16314 = vmatprep.mubr.msk.f32.mxu1 %vm17804_vm0, %v17803_v0 }
 0x154   : > { %16289 = vmatprep.subr.mxu0 %v17803_v0 }
 0x155   : > { %16290 = vmatpush3.msra.mxu0 %v1000_v36 }
 0x156   : > { %16291 = vmatprep.subr.mxu0 %v17803_v0 }
 0x157   : > { %16292 = vmatpush3.msra.mxu0 %v1007_v40 }
 0x158   : > { %16294 = vmatmul.mubr.f32.vlgmr.msra.gmra.mxu0 %v949_v5  ;;  %16307 = vmatprep.subr.mxu0 %v17803_v0 }
 0x159   : > { %16309 = vmatprep.mubr.msk.f32.mxu0 %vm17804_vm0, %v17803_v0 }
 0x1fe   : > { %v1046_v10 = vpop.f32.mrf.mxu1 }
 0x200   : > { %v16262_v11 = vpop.f32.mrf.mxu1 }
 0x206   : > { %v1203_v12 = vpop.f32.mrf.mxu1 }
 0x207   : > { %v955_v14 = vpop.f32.mrf.mxu0 }
 0x208   : > { %v16284_v15 = vpop.f32.mrf.mxu1  ;;  %v956_v18 = vadd.f32 %v955_v14, %v875_v16 }
 0x209   : > { %v16251_v17 = vpop.f32.mrf.mxu0 }
 0x20a   : > { %v1047_v21 = vadd.f32 %v1046_v10, %v956_v18 }
 0x20f   : > { %v1126_v19 = vpop.f32.mrf.mxu0 }
 0x210   : > { %v1361_v20 = vpop.f32.mrf.mxu1  ;;  %v1127_v24 = vadd.f32 %v1126_v19, %v1047_v21 }
 0x211   : > { %v16273_v22 = vpop.f32.mrf.mxu0 }
 0x212   : > { %v16306_v23 = vpop.f32.mrf.mxu1  ;;  %v1204_v25 = vadd.f32 %v1203_v12, %v1127_v24 }
 0x218   : > { %v1286_v26 = vpop.f32.mrf.mxu0 }
 0x219   : > { %v1287_v27 = vadd.f32 %v1286_v26, %v1204_v25 }
 0x21a   : > { %v16295_v28 = vpop.f32.mrf.mxu0 }
 0x21b   : > { %v18140_v29 = vadd.f32 %v1361_v20, %v1287_v27 }
 0x21d   : > { %1830 = vrot.lane.b32.xlu1 %v18140_v29, %s17805_s30  ;;  %1366 = vrot.lane.b32.xlu0 %v18140_v29, %s17806_s22  ;;  %v1369_v30 = vsel %vm1368_vm3, %v18140_v29, 0 }
 0x21e   : > { %v1439_v31 = vand.u32 4294901760, %v1369_v30 }
 0x220   : > { %v1440_v32 = vsub.f32 %v1369_v30, %v1439_v31 }
 0x222   : > { %v1441_v33 = vand.u32 4294901760, %v1440_v32 }
 0x224   : > { %v1442_v36 = vsub.f32 %v1440_v32, %v1441_v33 }
 0x226   : > { %v1443_v40 = vand.u32 4294901760, %v1442_v36 }
 0x28f   : > { %v1367_v34 = vpop.permute.xlu0 %1366  ;;  %v1831_v38 = vpop.permute.xlu1 %1830 }
 0x290   : > { %v1371_v35 = vsel %vm1368_vm3, %v1367_v34, 0  ;;  %v18150_v41 = vand.u32 4294901760, %v1831_v38 }
 0x291   : > { %v1404_v37 = vand.u32 4294901760, %v1371_v35 }
 0x292   : > { %v18156_v44 = vsub.f32 %v1831_v38, %v18150_v41 }
 0x293   : > { %v1481_v39 = vsub.f32 %v1371_v35, %v1404_v37  ;;  %16308 = vmatpush3.xpose.msra.mxu0 %v1404_v37 }
 0x294   : > { %16317 = vmatprep.subr.mxu0 %v17803_v0  ;;  %v1945_v48 = vand.u32 4294901760, %v18156_v44 }
 0x295   : > { %v1482_v42 = vand.u32 4294901760, %v1481_v39 }
 0x296   : > { %16310 = vmatmul.mubr.f32.vlgmr.msra.gmra.mxu0 %v1443_v40  ;;  %v1946_v49 = vsub.f32 %v18156_v44, %v1945_v48 }
 0x297   : > { %v1483_v43 = vsub.f32 %v1481_v39, %v1482_v42  ;;  %16318 = vmatpush3.xpose.msra.mxu0 %v1481_v39  ;;  %16319 = vmatprep.mubr.msk.f32.mxu0 %vm17804_vm0, %v17803_v0 }
 0x298   : > { %16327 = vmatprep.subr.mxu0 %v17803_v0  ;;  %v1947_v50 = vand.u32 4294901760, %v1946_v49 }
 0x299   : > { %v1484_v47 = vand.u32 4294901760, %v1483_v43 }
 0x29a   : > { %16320 = vmatmul.mubr.f32.vlgmr.msra.gmra.mxu0 %v1440_v32 }
 0x29b   : > { %16313 = vmatpush3.xpose.msra.mxu1 %v1484_v47  ;;  %16328 = vmatpush3.xpose.msra.mxu0 %v1482_v42 }
 0x29c   : > { %16329 = vmatprep.mubr.msk.f32.mxu0 %vm17804_vm0, %v17803_v0  ;;  %16322 = vmatprep.subr.mxu1 %v17803_v0 }
 0x29d   : > { %16337 = vmatprep.subr.mxu0 %v17803_v0 }
 0x29e   : > { %16315 = vmatmul.mubr.f32.vlgmr.msra.gmra.mxu1 %v1439_v31  ;;  %16330 = vmatmul.mubr.f32.vlgmr.msra.gmra.mxu0 %v1439_v31 }
 0x29f   : > { %16323 = vmatpush3.xpose.msra.mxu1 %v1404_v37  ;;  %16338 = vmatpush3.msra.mxu0 %v18150_v41 }
 0x2a0   : > { %16324 = vmatprep.mubr.msk.f32.mxu1 %vm17804_vm0, %v17803_v0  ;;  %16332 = vmatprep.subr.mxu1 %v17803_v0 }
 0x2a1   : > { %16339 = vmatprep.mubr.msk.f32.mxu0 %vm17804_vm0, %v17803_v0  ;;  %16347 = vmatprep.subr.mxu0 %v17803_v0 }
 0x2a2   : > { %16325 = vmatmul.mubr.f32.vlgmr.msra.gmra.mxu1 %v1441_v33 }
 0x2a3   : > { %16333 = vmatpush3.xpose.msra.mxu1 %v1404_v37  ;;  %16334 = vmatprep.mubr.msk.f32.mxu1 %vm17804_vm0, %v17803_v0 }
 0x2a4   : > { %16342 = vmatprep.subr.mxu1 %v17803_v0 }
 0x2a6   : > { %16335 = vmatmul.mubr.f32.vlgmr.msra.gmra.mxu1 %v1439_v31 }
 0x2a7   : > { %16343 = vmatpush3.msra.mxu1 %v1947_v50  ;;  %16344 = vmatprep.mubr.msk.f32.mxu1 %vm17804_vm0, %v17803_v0 }
 0x2a8   : > { %16352 = vmatprep.subr.mxu1 %v17803_v0 }
 0x356   : > { %v1445_v51 = vpop.f32.mrf.mxu0 }
 0x358   : > { %v16311_v52 = vpop.f32.mrf.mxu0 }
 0x35a   : > { %v1595_v53 = vpop.f32.mrf.mxu0 }
 0x35c   : > { %v16321_v54 = vpop.f32.mrf.mxu0 }
 0x35e   : > { %v1521_v55 = vpop.f32.mrf.mxu1  ;;  %v1743_v56 = vpop.f32.mrf.mxu0 }
 0x35f   : > { %v1522_v57 = vadd.f32 %v1521_v55, %v1445_v51 }
 0x360   : > { %v16316_v58 = vpop.f32.mrf.mxu1  ;;  %v16331_v59 = vpop.f32.mrf.mxu0 }
 0x361   : > { %v1596_v60 = vadd.f32 %v1595_v53, %v1522_v57 }
 0x362   : > { %v1669_v61 = vpop.f32.mrf.mxu1 }
 0x363   : > { %v1670_v62 = vadd.f32 %v1669_v61, %v1596_v60 }
 0x364   : > { %v16326_v63 = vpop.f32.mrf.mxu1 }
 0x365   : > { %v1744_v1 = vadd.f32 %v1743_v56, %v1670_v62 }
 0x366   : > { %v1815_v3 = vpop.f32.mrf.mxu1 }
 0x367   : > { %v1816_v4 = vadd.f32 %v1815_v3, %v1744_v1 }
 0x368   : > { %v16336_v5 = vpop.f32.mrf.mxu1 }
 0x369   : > { %v1819_v6 = vsel %vm1368_vm3, %v1816_v4, -inf }
 0x36a   : > { %1820 = vmax.xlane.f32.xlu0 %v1819_v6 }
 0x3f3   : > { %v1821_v7 = vpop.xlane.xlu0 %1820 }
 0x3f4   : > { %v1822_v8 = vsub.f32 %v1816_v4, %v1821_v7 }
 0x3f6   : > { %v1823_v9 = vmul.f32 1.442695, %v1822_v8 }
 0x3f8   : > { %17604 = vpow2.f32 %v1823_v9 }
 0x405   : > { %v17605_v10 = vpop.eup %17604 }
 0x406   : > { %v1825_v11 = vsel %vm1368_vm3, %v17605_v10, 0.0 }
 0x407   : > { %1826 = vadd.xlane.f32.xlu1 %v1825_v11 }
 0x418   : > { %2284 = vrot.lane.b32.xlu1 %v18140_v29, %s17807_s19 }
 0x41c   : > { %2282 = vrot.lane.b32.xlu1 %v18140_v29, %s17808_s12 }
 0x490   : > { %v1827_v12 = vpop.xlane.xlu1 %1826 }
 0x491   : > { %17606 = vrcp.f32 %v1827_v12 }
 0x494   : > { %v2285_v13 = vpop.permute.xlu1 %2284 }
 0x495   : > { %v2288_v14 = vsel %vm1368_vm3, %v2285_v13, 0 }
 0x496   : > { %v2321_v15 = vand.u32 4294901760, %v2288_v14 }
 0x498   : > { %v2398_v17 = vsub.f32 %v2288_v14, %v2321_v15  ;;  %v2283_v19 = vpop.permute.xlu1 %2282 }
 0x499   : > { %v2286_v23 = vsel %vm1368_vm3, %v2283_v19, 0 }
 0x49a   : > { %v2399_v22 = vand.u32 4294901760, %v2398_v17  ;;  %v2356_v25 = vand.u32 4294901760, %v2286_v23 }
 0x49c   : > { %v2400_v27 = vsub.f32 %v2398_v17, %v2399_v22  ;;  %v2357_v30 = vsub.f32 %v2286_v23, %v2356_v25 }
 0x49e   : > { %v17607_v16 = vpop.eup %17606  ;;  %v2401_v32 = vand.u32 4294901760, %v2400_v27  ;;  %v2358_v33 = vand.u32 4294901760, %v2357_v30 }
 0x49f   : > { %v1829_v18 = vmul.f32 %v17607_v16, %v17605_v10 }
 0x4a0   : > { %v2359_v34 = vsub.f32 %v2357_v30, %v2358_v33 }
 0x4a1   : > { %v1834_v20 = vsel %vm1368_vm3, %v1829_v18, 0 }
 0x4a2   : > { %v1902_v21 = vand.u32 4294901760, %v1834_v20  ;;  %v2360_v35 = vand.u32 4294901760, %v2359_v34 }
 0x4a4   : > { %v1903_v24 = vsub.f32 %v1834_v20, %v1902_v21  ;;  %16345 = vmatmul.mubr.f32.vlgmr.msra.gmra.mxu1 %v1902_v21 }
 0x4a5   : > { %16353 = vmatpush3.msra.mxu1 %v18150_v41  ;;  %16354 = vmatprep.mubr.msk.f32.mxu1 %vm17804_vm0, %v17803_v0 }
 0x4a6   : > { %16362 = vmatprep.subr.mxu1 %v17803_v0  ;;  %v1904_v26 = vand.u32 4294901760, %v1903_v24 }
 0x4a8   : > { %16355 = vmatmul.mubr.f32.vlgmr.msra.gmra.mxu1 %v1904_v26  ;;  %v1905_v28 = vsub.f32 %v1903_v24, %v1904_v26 }
 0x4a9   : > { %16363 = vmatpush3.msra.mxu1 %v18150_v41  ;;  %16364 = vmatprep.mubr.msk.f32.mxu1 %vm17804_vm0, %v17803_v0 }
 0x4aa   : > { %16372 = vmatprep.subr.mxu1 %v17803_v0  ;;  %v1906_v31 = vand.u32 4294901760, %v1905_v28 }
 0x4ac   : > { %16340 = vmatmul.mubr.f32.vlgmr.msra.gmra.mxu0 %v1906_v31  ;;  %16365 = vmatmul.mubr.f32.vlgmr.msra.gmra.mxu1 %v1902_v21 }
 0x4ad   : > { %16348 = vmatpush3.msra.mxu0 %v18156_v44  ;;  %16373 = vmatpush3.xpose.msra.mxu1 %v2401_v32  ;;  %v865_v32 = vld [vmem:[%s19729_s3 + $0x8] sm:$0xff] }
 0x4ae   : > { %16349 = vmatprep.mubr.msk.f32.mxu0 %vm17804_vm0, %v17803_v0  ;;  %16357 = vmatprep.subr.mxu0 %v17803_v0 }
 0x4af   : > { %16374 = vmatprep.mubr.msk.f32.mxu1 %vm17804_vm0, %v17803_v0  ;;  %16382 = vmatprep.subr.mxu1 %v17803_v0 }
 0x4b0   : > { %16350 = vmatmul.mubr.f32.vlgmr.msra.gmra.mxu0 %v1903_v24  ;;  %16375 = vmatmul.mubr.f32.vlgmr.msra.gmra.mxu1 %v2356_v25 }
 0x4b1   : > { %16358 = vmatpush3.msra.mxu0 %v1945_v48  ;;  %16383 = vmatpush3.xpose.msra.mxu1 %v2321_v15 }
 0x4b2   : > { %16359 = vmatprep.mubr.msk.f32.mxu0 %vm17804_vm0, %v17803_v0  ;;  %16367 = vmatprep.subr.mxu0 %v17803_v0 }
 0x4b3   : > { %16384 = vmatprep.mubr.msk.f32.mxu1 %vm17804_vm0, %v17803_v0  ;;  %16392 = vmatprep.subr.mxu1 %v17803_v0 }
 0x4b4   : > { %16360 = vmatmul.mubr.f32.vlgmr.msra.gmra.mxu0 %v1902_v21  ;;  %16385 = vmatmul.mubr.f32.vlgmr.msra.gmra.mxu1 %v2358_v33  ;;  %v3233_v33 = vand.u32 4294901760, %v865_v32 }
 0x4b5   : > { %16368 = vmatpush3.xpose.msra.mxu0 %v2321_v15  ;;  %16393 = vmatpush3.xpose.msra.mxu1 %v2321_v15 }
 0x4b6   : > { %16369 = vmatprep.mubr.msk.f32.mxu0 %vm17804_vm0, %v17803_v0  ;;  %16377 = vmatprep.subr.mxu0 %v17803_v0  ;;  %v18259_v34 = vsub.f32 %v865_v32, %v3233_v33 }
 0x4b7   : > { %16394 = vmatprep.mubr.msk.f32.mxu1 %vm17804_vm0, %v17803_v0  ;;  %16402 = vmatprep.subr.mxu1 %v17803_v0 }
 0x4b8   : > { %16370 = vmatmul.mubr.f32.vlgmr.msra.gmra.mxu0 %v2360_v35  ;;  %16395 = vmatmul.mubr.f32.vlgmr.msra.gmra.mxu1 %v2356_v25  ;;  %v3311_v35 = vand.u32 4294901760, %v18259_v34 }
 0x4b9   : > { %16378 = vmatpush3.xpose.msra.mxu0 %v2398_v17  ;;  %16379 = vmatprep.mubr.msk.f32.mxu0 %vm17804_vm0, %v17803_v0 }
 0x4ba   : > { %16387 = vmatprep.subr.mxu0 %v17803_v0  ;;  %16404 = vmatprep.mubr.msk.f32.mxu1 %vm17804_vm0, %v17803_v0 }
 0x4bc   : > { %16380 = vmatmul.mubr.f32.vlgmr.msra.gmra.mxu0 %v2357_v30 }
 0x4bd   : > { %16388 = vmatpush3.xpose.msra.mxu0 %v2399_v22  ;;  %16389 = vmatprep.mubr.msk.f32.mxu0 %vm17804_vm0, %v17803_v0 }
 0x4be   : > { %16397 = vmatprep.subr.mxu0 %v17803_v0 }
 0x4c0   : > { %16390 = vmatmul.mubr.f32.vlgmr.msra.gmra.mxu0 %v2356_v25 }
 0x4c1   : > { %16399 = vmatprep.mubr.msk.f32.mxu0 %vm17804_vm0, %v17803_v0 }
 0x564   : > { %v1984_v36 = vpop.f32.mrf.mxu1 }
 0x566   : > { %v16346_v37 = vpop.f32.mrf.mxu1 }
 0x568   : > { %v2132_v38 = vpop.f32.mrf.mxu1 }
 0x56a   : > { %v16356_v39 = vpop.f32.mrf.mxu1 }
 0x56c   : > { %v1908_v40 = vpop.f32.mrf.mxu0  ;;  %v2278_v41 = vpop.f32.mrf.mxu1 }
 0x56d   : > { %v1985_v42 = vadd.f32 %v1984_v36, %v1908_v40  ;;  %v3312_v36 = vsub.f32 %v18259_v34, %v3311_v35 }
 0x56e   : > { %v16341_v43 = vpop.f32.mrf.mxu0  ;;  %v16366_v44 = vpop.f32.mrf.mxu1 }
 0x56f   : > { %v3313_v37 = vand.u32 4294901760, %v3312_v36 }
 0x570   : > { %v2058_v47 = vpop.f32.mrf.mxu0  ;;  %v2438_v48 = vpop.f32.mrf.mxu1 }
 0x571   : > { %v2059_v49 = vadd.f32 %v2058_v47, %v1985_v42 }
 0x572   : > { %v16351_v50 = vpop.f32.mrf.mxu0  ;;  %v16376_v51 = vpop.f32.mrf.mxu1 }
 0x573   : > { %v2133_v52 = vadd.f32 %v2132_v38, %v2059_v49  ;;  %v864_v49 = vld [vmem:[%s19729_s3] sm:$0xff] }
 0x574   : > { %v2206_v53 = vpop.f32.mrf.mxu0  ;;  %v2586_v54 = vpop.f32.mrf.mxu1 }
 0x575   : > { %v2207_v55 = vadd.f32 %v2206_v53, %v2133_v52  ;;  %v3682_v53 = vand.u32 4294901760, %v864_v49 }
 0x576   : > { %v16361_v56 = vpop.f32.mrf.mxu0  ;;  %v16386_v57 = vpop.f32.mrf.mxu1 }
 0x577   : > { %v18227_v58 = vadd.f32 %v2278_v41, %v2207_v55 }
 0x578   : > { %v2362_v59 = vpop.f32.mrf.mxu0  ;;  %v2732_v60 = vpop.f32.mrf.mxu1 }
 0x579   : > { %v2439_v63 = vadd.f32 %v2438_v48, %v2362_v59  ;;  %v18268_v59 = vsub.f32 %v864_v49, %v3682_v53 }
 0x57a   : > { %v16371_v61 = vpop.f32.mrf.mxu0  ;;  %v16396_v62 = vpop.f32.mrf.mxu1 }
 0x57c   : > { %v2512_v1 = vpop.f32.mrf.mxu0 }
 0x57d   : > { %v2513_v3 = vadd.f32 %v2512_v1, %v2439_v63  ;;  %v3760_v1 = vand.u32 4294901760, %v18268_v59 }
 0x57e   : > { %v16381_v4 = vpop.f32.mrf.mxu0 }
 0x57f   : > { %v2587_v5 = vadd.f32 %v2586_v54, %v2513_v3  ;;  %v3649_v3 = vsel %vm1368_vm3, %v18227_v58, 0 }
 0x580   : > { %v2660_v6 = vpop.f32.mrf.mxu0 }
 0x581   : > { %v2661_v7 = vadd.f32 %v2660_v6, %v2587_v5  ;;  %v18277_v6 = vand.u32 4294901760, %v3649_v3 }
 0x582   : > { %v16391_v8 = vpop.f32.mrf.mxu0 }
 0x583   : > { %v2733_v9 = vadd.f32 %v2732_v60, %v2661_v7  ;;  %v3761_v8 = vsub.f32 %v18268_v59, %v3760_v1 }
 0x585   : > { %v2736_v10 = vsel %vm1368_vm3, %v2733_v9, -inf }
 0x586   : > { %2737 = vmax.xlane.f32.xlu1 %v2736_v10  ;;  %v3718_v10 = vsub.f32 %v3649_v3, %v18277_v6 }
 0x60f   : > { %v2738_v11 = vpop.xlane.xlu1 %2737 }
 0x610   : > { %v2739_v12 = vsub.f32 %v2733_v9, %v2738_v11 }
 0x612   : > { %v2740_v13 = vmul.f32 1.442695, %v2739_v12  ;;  %v3762_v12 = vand.u32 4294901760, %v3761_v8 }
 0x614   : > { %17608 = vpow2.f32 %v2740_v13 }
 0x621   : > { %v17609_v14 = vpop.eup %17608 }
 0x622   : > { %v2742_v15 = vsel %vm1368_vm3, %v17609_v14, 0.0 }
 0x623   : > { %2743 = vadd.xlane.f32.xlu0 %v2742_v15  ;;  %v3719_v15 = vand.u32 4294901760, %v3718_v10 }
 0x639   : > { %2747 = vrot.lane.b32.xlu0 %v18140_v29, %s17809_s21 }
 0x63d   : > { %4099 = vrot.lane.b32.xlu0 %v18140_v29, %s17810_s23 }
 0x641   : > { %4097 = vrot.lane.b32.xlu0 %v18140_v29, %s17811_s14 }
 0x6ac   : > { %v2744_v16 = vpop.xlane.xlu0 %2743 }
 0x6ad   : > { %17610 = vrcp.f32 %v2744_v16 }
 0x6b0   : > { %v2748_v17 = vpop.permute.xlu0 %2747 }
 0x6b1   : > { %v2784_v18 = vand.u32 4294901760, %v2748_v17 }
 0x6b3   : > { %v2861_v19 = vsub.f32 %v2748_v17, %v2784_v18  ;;  %16398 = vmatpush3.msra.mxu0 %v2784_v18 }
 0x6b4   : > { %16407 = vmatprep.subr.mxu0 %v17803_v0  ;;  %v4100_v61 = vpop.permute.xlu0 %4099 }
 0x6b5   : > { %v2862_v20 = vand.u32 4294901760, %v2861_v19  ;;  %v4103_v4 = vsel %vm1368_vm3, %v4100_v61, 0 }
 0x6b6   : > { %v18283_v9 = vand.u32 4294901760, %v4103_v4 }
 0x6b7   : > { %v2863_v21 = vsub.f32 %v2861_v19, %v2862_v20 }
 0x6b8   : > { %v18290_v13 = vsub.f32 %v4103_v4, %v18283_v9 }
 0x6b9   : > { %v2864_v22 = vand.u32 4294901760, %v2863_v21 }
 0x6ba   : > { %v17611_v23 = vpop.eup %17610  ;;  %v4214_v16 = vand.u32 4294901760, %v18290_v13 }
 0x6bb   : > { %16403 = vmatpush3.msra.mxu1 %v2864_v22  ;;  %v2746_v24 = vmul.f32 %v17611_v23, %v17609_v14  ;;  %v4098_v14 = vpop.permute.xlu0 %4097 }
 0x6bc   : > { %16412 = vmatprep.subr.mxu1 %v17803_v0  ;;  %v4101_v17 = vsel %vm1368_vm3, %v4098_v14, 0 }
 0x6bd   : > { %v2751_v25 = vsel %vm1368_vm3, %v2746_v24, 0 }
 0x6be   : > { %v2819_v26 = vand.u32 4294901760, %v2751_v25 }
 0x6c0   : > { %v2820_v27 = vsub.f32 %v2751_v25, %v2819_v26  ;;  %16405 = vmatmul.mubr.f32.vlgmr.msra.gmra.mxu1 %v2819_v26 }
 0x6c1   : > { %16413 = vmatpush3.msra.mxu1 %v2784_v18  ;;  %16414 = vmatprep.mubr.msk.f32.mxu1 %vm17804_vm0, %v17803_v0 }
 0x6c2   : > { %16422 = vmatprep.subr.mxu1 %v17803_v0  ;;  %v2821_v28 = vand.u32 4294901760, %v2820_v27 }
 0x6c4   : > { %16415 = vmatmul.mubr.f32.vlgmr.msra.gmra.mxu1 %v2821_v28  ;;  %v2822_v30 = vsub.f32 %v2820_v27, %v2821_v28 }
 0x6c5   : > { %16423 = vmatpush3.msra.mxu1 %v2784_v18  ;;  %16424 = vmatprep.mubr.msk.f32.mxu1 %vm17804_vm0, %v17803_v0  ;;  %v4171_v18 = vand.u32 4294901760, %v4101_v17 }
 0x6c6   : > { %v2823_v31 = vand.u32 4294901760, %v2822_v30  ;;  %16432 = vmatprep.subr.mxu1 %v17803_v0 }
 0x6c7   : > { %v4172_v21 = vsub.f32 %v4101_v17, %v4171_v18 }
 0x6c8   : > { %16400 = vmatmul.mubr.f32.vlgmr.msra.gmra.mxu0 %v2823_v31  ;;  %16425 = vmatmul.mubr.f32.vlgmr.msra.gmra.mxu1 %v2819_v26 }
 0x6c9   : > { %16408 = vmatpush3.msra.mxu0 %v2861_v19  ;;  %16409 = vmatprep.mubr.msk.f32.mxu0 %vm17804_vm0, %v17803_v0  ;;  %v3720_v19 = vsub.f32 %v3718_v10, %v3719_v15  ;;  %v4173_v24 = vand.u32 4294901760, %v4172_v21 }
 0x6ca   : > { %16417 = vmatprep.subr.mxu0 %v17803_v0  ;;  %16434 = vmatprep.mubr.msk.f32.mxu1 %vm17804_vm0, %v17803_v0 }
 0x6cb   : > { %16433 = vmatpush3.msra.mxu1 %v3313_v37  ;;  %v3721_v22 = vand.u32 4294901760, %v3720_v19  ;;  %v4174_v25 = vsub.f32 %v4172_v21, %v4173_v24 }
 0x6cc   : > { %16410 = vmatmul.mubr.f32.vlgmr.msra.gmra.mxu0 %v2820_v27  ;;  %16442 = vmatprep.subr.mxu1 %v17803_v0 }
 0x6cd   : > { %16418 = vmatpush3.msra.mxu0 %v2862_v20  ;;  %16419 = vmatprep.mubr.msk.f32.mxu0 %vm17804_vm0, %v17803_v0  ;;  %v4215_v20 = vsub.f32 %v18290_v13, %v4214_v16 }
 0x6ce   : > { %16427 = vmatprep.subr.mxu0 %v17803_v0 }
 0x6cf   : > { %v4216_v23 = vand.u32 4294901760, %v4215_v20 }
 0x6d0   : > { %16420 = vmatmul.mubr.f32.vlgmr.msra.gmra.mxu0 %v2819_v26  ;;  %v4175_v26 = vand.u32 4294901760, %v4174_v25 }
 0x6d1   : > { %16429 = vmatprep.mubr.msk.f32.mxu0 %vm17804_vm0, %v17803_v0  ;;  %16428 = vmatpush3.msra.mxu0 %v3233_v33 }
 0x6d2   : > { %16437 = vmatprep.subr.mxu0 %v17803_v0 }
 0x780   : > { %v2901_v38 = vpop.f32.mrf.mxu1 }
 0x782   : > { %v16406_v39 = vpop.f32.mrf.mxu1 }
 0x784   : > { %v3049_v40 = vpop.f32.mrf.mxu1 }
 0x786   : > { %v16416_v41 = vpop.f32.mrf.mxu1 }
 0x788   : > { %v2825_v42 = vpop.f32.mrf.mxu0  ;;  %v3195_v43 = vpop.f32.mrf.mxu1 }
 0x789   : > { %v2902_v48 = vadd.f32 %v2901_v38, %v2825_v42 }
 0x78a   : > { %v16401_v44 = vpop.f32.mrf.mxu0  ;;  %v16426_v47 = vpop.f32.mrf.mxu1 }
 0x78c   : > { %v2975_v50 = vpop.f32.mrf.mxu0 }
 0x78d   : > { %v2976_v51 = vadd.f32 %v2975_v50, %v2902_v48 }
 0x78e   : > { %v16411_v52 = vpop.f32.mrf.mxu0 }
 0x78f   : > { %v3050_v54 = vadd.f32 %v3049_v40, %v2976_v51 }
 0x790   : > { %v3123_v55 = vpop.f32.mrf.mxu0 }
 0x791   : > { %v3124_v56 = vadd.f32 %v3123_v55, %v3050_v54 }
 0x792   : > { %v16421_v57 = vpop.f32.mrf.mxu0 }
 0x793   : > { %v3196_v60 = vadd.f32 %v3195_v43, %v3124_v56 }
 0x795   : > { %v3200_v62 = vsel %vm1368_vm3, %v3196_v60, 0 }
 0x796   : > { %v3268_v63 = vand.u32 4294901760, %v3200_v62 }
 0x798   : > { %v3269_v5 = vsub.f32 %v3200_v62, %v3268_v63  ;;  %16435 = vmatmul.mubr.f32.vlgmr.msra.gmra.mxu1 %v3268_v63 }
 0x799   : > { %16443 = vmatpush3.msra.mxu1 %v3233_v33  ;;  %16444 = vmatprep.mubr.msk.f32.mxu1 %vm17804_vm0, %v17803_v0 }
 0x79a   : > { %v3270_v7 = vand.u32 4294901760, %v3269_v5  ;;  %16452 = vmatprep.subr.mxu1 %v17803_v0 }
 0x79c   : > { %16445 = vmatmul.mubr.f32.vlgmr.msra.gmra.mxu1 %v3270_v7  ;;  %v3271_v58 = vsub.f32 %v3269_v5, %v3270_v7 }
 0x79d   : > { %16453 = vmatpush3.msra.mxu1 %v3233_v33  ;;  %16454 = vmatprep.mubr.msk.f32.mxu1 %vm17804_vm0, %v17803_v0 }
 0x79e   : > { %v3272_v11 = vand.u32 4294901760, %v3271_v58  ;;  %16462 = vmatprep.subr.mxu1 %v17803_v0 }
 0x7a0   : > { %16430 = vmatmul.mubr.f32.vlgmr.msra.gmra.mxu0 %v3272_v11  ;;  %16455 = vmatmul.mubr.f32.vlgmr.msra.gmra.mxu1 %v3268_v63 }
 0x7a1   : > { %16438 = vmatpush3.msra.mxu0 %v18259_v34  ;;  %16439 = vmatprep.mubr.msk.f32.mxu0 %vm17804_vm0, %v17803_v0 }
 0x7a2   : > { %16463 = vmatpush3.msra.mxu1 %v3762_v12  ;;  %16464 = vmatprep.mubr.msk.f32.mxu1 %vm17804_vm0, %v17803_v0 }
 0x7a3   : > { %16447 = vmatprep.subr.mxu0 %v17803_v0  ;;  %16472 = vmatprep.subr.mxu1 %v17803_v0 }
 0x7a4   : > { %16440 = vmatmul.mubr.f32.vlgmr.msra.gmra.mxu0 %v3269_v5  ;;  %16465 = vmatmul.mubr.f32.vlgmr.msra.gmra.mxu1 %v18277_v6 }
 0x7a5   : > { %16448 = vmatpush3.msra.mxu0 %v3311_v35  ;;  %16449 = vmatprep.mubr.msk.f32.mxu0 %vm17804_vm0, %v17803_v0 }
 0x7a6   : > { %16473 = vmatpush3.msra.mxu1 %v3682_v53  ;;  %16474 = vmatprep.mubr.msk.f32.mxu1 %vm17804_vm0, %v17803_v0 }
 0x7a7   : > { %16457 = vmatprep.subr.mxu0 %v17803_v0  ;;  %16482 = vmatprep.subr.mxu1 %v17803_v0 }
 0x7a8   : > { %16450 = vmatmul.mubr.f32.vlgmr.msra.gmra.mxu0 %v3268_v63  ;;  %16475 = vmatmul.mubr.f32.vlgmr.msra.gmra.mxu1 %v3719_v15 }
 0x7a9   : > { %16458 = vmatpush3.msra.mxu0 %v3682_v53  ;;  %16483 = vmatpush3.msra.mxu1 %v3682_v53 }
 0x7aa   : > { %16459 = vmatprep.mubr.msk.f32.mxu0 %vm17804_vm0, %v17803_v0  ;;  %16484 = vmatprep.mubr.msk.f32.mxu1 %vm17804_vm0, %v17803_v0 }
 0x7ab   : > { %16492 = vmatprep.subr.mxu1 %v17803_v0  ;;  %16467 = vmatprep.subr.mxu0 %v17803_v0 }
 0x7ac   : > { %16460 = vmatmul.mubr.f32.vlgmr.msra.gmra.mxu0 %v3721_v22  ;;  %16485 = vmatmul.mubr.f32.vlgmr.msra.gmra.mxu1 %v18277_v6 }
 0x7ad   : > { %16493 = vmatpush3.xpose.msra.mxu1 %v4216_v23  ;;  %16468 = vmatpush3.msra.mxu0 %v18268_v59 }
 0x7ae   : > { %16469 = vmatprep.mubr.msk.f32.mxu0 %vm17804_vm0, %v17803_v0  ;;  %16494 = vmatprep.mubr.msk.f32.mxu1 %vm17804_vm0, %v17803_v0 }
 0x7af   : > { %16502 = vmatprep.subr.mxu1 %v17803_v0  ;;  %16477 = vmatprep.subr.mxu0 %v17803_v0 }
 0x7b0   : > { %16470 = vmatmul.mubr.f32.vlgmr.msra.gmra.mxu0 %v3718_v10  ;;  %16495 = vmatmul.mubr.f32.vlgmr.msra.gmra.mxu1 %v4171_v18 }
 0x7b1   : > { %16503 = vmatpush3.xpose.msra.mxu1 %v18283_v9  ;;  %16478 = vmatpush3.msra.mxu0 %v3760_v1 }
 0x7b2   : > { %16479 = vmatprep.mubr.msk.f32.mxu0 %vm17804_vm0, %v17803_v0  ;;  %16487 = vmatprep.subr.mxu0 %v17803_v0 }
 0x7b3   : > { %16504 = vmatprep.mubr.msk.f32.mxu1 %vm17804_vm0, %v17803_v0  ;;  %16512 = vmatprep.subr.mxu1 %v17803_v0 }
 0x7b4   : > { %16480 = vmatmul.mubr.f32.vlgmr.msra.gmra.mxu0 %v18277_v6  ;;  %16505 = vmatmul.mubr.f32.vlgmr.msra.gmra.mxu1 %v4173_v24 }
 0x7b5   : > { %16488 = vmatpush3.xpose.msra.mxu0 %v18283_v9  ;;  %16513 = vmatpush3.xpose.msra.mxu1 %v18283_v9 }
 0x7b6   : > { %16489 = vmatprep.mubr.msk.f32.mxu0 %vm17804_vm0, %v17803_v0  ;;  %16497 = vmatprep.subr.mxu0 %v17803_v0 }
 0x7b7   : > { %16514 = vmatprep.mubr.msk.f32.mxu1 %vm17804_vm0, %v17803_v0  ;;  %16522 = vmatprep.subr.mxu1 %v17803_v0 }
 0x7b8   : > { %16490 = vmatmul.mubr.f32.vlgmr.msra.gmra.mxu0 %v4175_v26  ;;  %16515 = vmatmul.mubr.f32.vlgmr.msra.gmra.mxu1 %v4171_v18 }
 0x7b9   : > { %16498 = vmatpush3.xpose.msra.mxu0 %v18290_v13  ;;  %16499 = vmatprep.mubr.msk.f32.mxu0 %vm17804_vm0, %v17803_v0 }
 0x7ba   : > { %16507 = vmatprep.subr.mxu0 %v17803_v0  ;;  %16524 = vmatprep.mubr.msk.f32.mxu1 %vm17804_vm0, %v17803_v0 }
 0x7bc   : > { %16500 = vmatmul.mubr.f32.vlgmr.msra.gmra.mxu0 %v4172_v21 }
 0x7bd   : > { %16508 = vmatpush3.xpose.msra.mxu0 %v4214_v16  ;;  %16509 = vmatprep.mubr.msk.f32.mxu0 %vm17804_vm0, %v17803_v0 }
 0x7be   : > { %16517 = vmatprep.subr.mxu0 %v17803_v0 }
 0x7c0   : > { %16510 = vmatmul.mubr.f32.vlgmr.msra.gmra.mxu0 %v4171_v18 }
 0x7c1   : > { %16519 = vmatprep.mubr.msk.f32.mxu0 %vm17804_vm0, %v17803_v0 }
 0x858   : > { %v3350_v27 = vpop.f32.mrf.mxu1 }
 0x85a   : > { %v16436_v28 = vpop.f32.mrf.mxu1 }
 0x85c   : > { %v3498_v30 = vpop.f32.mrf.mxu1 }
 0x85e   : > { %v16446_v31 = vpop.f32.mrf.mxu1 }
 0x860   : > { %v3274_v32 = vpop.f32.mrf.mxu0  ;;  %v3644_v33 = vpop.f32.mrf.mxu1 }
 0x861   : > { %v3351_v34 = vadd.f32 %v3350_v27, %v3274_v32 }
 0x862   : > { %v16431_v35 = vpop.f32.mrf.mxu0  ;;  %v16456_v36 = vpop.f32.mrf.mxu1 }
 0x864   : > { %v3424_v37 = vpop.f32.mrf.mxu0  ;;  %v3799_v38 = vpop.f32.mrf.mxu1 }
 0x865   : > { %v3425_v39 = vadd.f32 %v3424_v37, %v3351_v34 }
 0x866   : > { %v16441_v40 = vpop.f32.mrf.mxu0  ;;  %v16466_v41 = vpop.f32.mrf.mxu1 }
 0x867   : > { %v3499_v42 = vadd.f32 %v3498_v30, %v3425_v39 }
 0x868   : > { %v3572_v43 = vpop.f32.mrf.mxu0  ;;  %v3947_v44 = vpop.f32.mrf.mxu1 }
 0x869   : > { %v3573_v47 = vadd.f32 %v3572_v43, %v3499_v42  ;;  %v866_v42 = vld [vmem:[%s19729_s3 + $0x10] sm:$0xff] }
 0x86a   : > { %v16451_v48 = vpop.f32.mrf.mxu0  ;;  %v16476_v49 = vpop.f32.mrf.mxu1  ;;  %v5048_v43 = vand.u32 4294901760, %v866_v42 }
 0x86b   : > { %v3645_v50 = vadd.f32 %v3644_v33, %v3573_v47 }
 0x86c   : > { %v3723_v51 = vpop.f32.mrf.mxu0  ;;  %v4093_v52 = vpop.f32.mrf.mxu1 }
 0x86d   : > { %v3724_v53 = vadd.f32 %v3723_v51, %v3645_v50 }
 0x86e   : > { %v16461_v54 = vpop.f32.mrf.mxu0  ;;  %v16486_v55 = vpop.f32.mrf.mxu1 }
 0x86f   : > { %v3800_v56 = vadd.f32 %v3799_v38, %v3724_v53 }
 0x870   : > { %v3873_v57 = vpop.f32.mrf.mxu0  ;;  %v4253_v59 = vpop.f32.mrf.mxu1 }
 0x871   : > { %v3874_v60 = vadd.f32 %v3873_v57, %v3800_v56 }
 0x872   : > { %v16471_v61 = vpop.f32.mrf.mxu0  ;;  %v16496_v62 = vpop.f32.mrf.mxu1 }
 0x873   : > { %v3948_v63 = vadd.f32 %v3947_v44, %v3874_v60  ;;  %v5125_v44 = vsub.f32 %v866_v42, %v5048_v43 }
 0x874   : > { %v4021_v1 = vpop.f32.mrf.mxu0  ;;  %v4401_v3 = vpop.f32.mrf.mxu1 }
 0x875   : > { %v4022_v4 = vadd.f32 %v4021_v1, %v3948_v63  ;;  %v5126_v47 = vand.u32 4294901760, %v5125_v44 }
 0x876   : > { %v16481_v5 = vpop.f32.mrf.mxu0  ;;  %v16506_v6 = vpop.f32.mrf.mxu1 }
 0x877   : > { %v18352_v7 = vadd.f32 %v4093_v52, %v4022_v4  ;;  %v5127_v48 = vsub.f32 %v5125_v44, %v5126_v47 }
 0x878   : > { %v4177_v8 = vpop.f32.mrf.mxu0  ;;  %v4547_v9 = vpop.f32.mrf.mxu1 }
 0x879   : > { %v4254_v11 = vadd.f32 %v4253_v59, %v4177_v8  ;;  %v5128_v49 = vand.u32 4294901760, %v5127_v48 }
 0x87a   : > { %v16491_v58 = vpop.f32.mrf.mxu0  ;;  %v16516_v10 = vpop.f32.mrf.mxu1 }
 0x87c   : > { %v4327_v12 = vpop.f32.mrf.mxu0 }
 0x87d   : > { %v4328_v13 = vadd.f32 %v4327_v12, %v4254_v11 }
 0x87e   : > { %v16501_v14 = vpop.f32.mrf.mxu0 }
 0x87f   : > { %v4402_v15 = vadd.f32 %v4401_v3, %v4328_v13 }
 0x880   : > { %v4475_v16 = vpop.f32.mrf.mxu0 }
 0x881   : > { %v4476_v17 = vadd.f32 %v4475_v16, %v4402_v15 }
 0x882   : > { %v16511_v18 = vpop.f32.mrf.mxu0 }
 0x883   : > { %v4548_v19 = vadd.f32 %v4547_v9, %v4476_v17 }
 0x885   : > { %v4551_v20 = vsel %vm1368_vm3, %v4548_v19, -inf }
 0x886   : > { %4552 = vmax.xlane.f32.xlu1 %v4551_v20 }
 0x897   : > { %4562 = vrot.lane.b32.xlu1 %v18140_v29, %s17812_s17 }
 0x89b   : > { %5466 = vrot.lane.b32.xlu1 %v18140_v29, %s19741_s28  ;;  %s19754_s28 = smov 40  }
 0x89f   : > { %5464 = vrot.lane.b32.xlu1 %v18140_v29, %s19740_s27 }
 0x90f   : > { %v4553_v21 = vpop.xlane.xlu1 %4552 }
 0x910   : > { %v4554_v22 = vsub.f32 %v4548_v19, %v4553_v21 }
 0x912   : > { %v4555_v23 = vmul.f32 1.442695, %v4554_v22 }
 0x913   : > { %v4563_v24 = vpop.permute.xlu1 %4562 }
 0x914   : > { %17612 = vpow2.f32 %v4555_v23  ;;  %v4599_v25 = vand.u32 4294901760, %v4563_v24 }
 0x916   : > { %v4676_v26 = vsub.f32 %v4563_v24, %v4599_v25  ;;  %16518 = vmatpush3.msra.mxu0 %v4599_v25 }
 0x917   : > { %16527 = vmatprep.subr.mxu0 %v17803_v0  ;;  %v5467_v56 = vpop.permute.xlu1 %5466 }
 0x918   : > { %v4677_v27 = vand.u32 4294901760, %v4676_v26  ;;  %v5470_v61 = vsel %vm1368_vm3, %v5467_v56, 0 }
 0x919   : > { %v5503_v3 = vand.u32 4294901760, %v5470_v61 }
 0x91a   : > { %v4678_v28 = vsub.f32 %v4676_v26, %v4677_v27 }
 0x91b   : > { %v5580_v9 = vsub.f32 %v5470_v61, %v5503_v3  ;;  %v5465_v10 = vpop.permute.xlu1 %5464 }
 0x91c   : > { %v4679_v30 = vand.u32 4294901760, %v4678_v28  ;;  %v5468_v14 = vsel %vm1368_vm3, %v5465_v10, 0 }
 0x91d   : > { %v5581_v13 = vand.u32 4294901760, %v5580_v9  ;;  %v5538_v16 = vand.u32 4294901760, %v5468_v14 }
 0x91e   : > { %16523 = vmatpush3.msra.mxu1 %v4679_v30 }
 0x91f   : > { %16532 = vmatprep.subr.mxu1 %v17803_v0  ;;  %v5582_v18 = vsub.f32 %v5580_v9, %v5581_v13  ;;  %v5539_v20 = vsub.f32 %v5468_v14, %v5538_v16 }
 0x921   : > { %v17613_v31 = vpop.eup %17612  ;;  %v5583_v22 = vand.u32 4294901760, %v5582_v18  ;;  %v5540_v23 = vand.u32 4294901760, %v5539_v20 }
 0x922   : > { %v4557_v32 = vsel %vm1368_vm3, %v17613_v31, 0.0 }
 0x923   : > { %4558 = vadd.xlane.f32.xlu0 %v4557_v32  ;;  %v5541_v24 = vsub.f32 %v5539_v20, %v5540_v23 }
 0x9ac   : > { %v4559_v33 = vpop.xlane.xlu0 %4558 }
 0x9ad   : > { %17614 = vrcp.f32 %v4559_v33 }
 0x9ba   : > { %v17615_v34 = vpop.eup %17614 }
 0x9bb   : > { %v4561_v35 = vmul.f32 %v17615_v34, %v17613_v31 }
 0x9bd   : > { %v4566_v36 = vsel %vm1368_vm3, %v4561_v35, 0 }
 0x9be   : > { %v4634_v37 = vand.u32 4294901760, %v4566_v36 }
 0x9c0   : > { %v4635_v38 = vsub.f32 %v4566_v36, %v4634_v37  ;;  %16525 = vmatmul.mubr.f32.vlgmr.msra.gmra.mxu1 %v4634_v37 }
 0x9c1   : > { %16533 = vmatpush3.msra.mxu1 %v4599_v25  ;;  %16534 = vmatprep.mubr.msk.f32.mxu1 %vm17804_vm0, %v17803_v0 }
 0x9c2   : > { %16542 = vmatprep.subr.mxu1 %v17803_v0  ;;  %v4636_v39 = vand.u32 4294901760, %v4635_v38 }
 0x9c4   : > { %16535 = vmatmul.mubr.f32.vlgmr.msra.gmra.mxu1 %v4636_v39  ;;  %v4637_v40 = vsub.f32 %v4635_v38, %v4636_v39 }
 0x9c5   : > { %16543 = vmatpush3.msra.mxu1 %v4599_v25  ;;  %16544 = vmatprep.mubr.msk.f32.mxu1 %vm17804_vm0, %v17803_v0  ;;  %v5542_v25 = vand.u32 4294901760, %v5541_v24 }
 0x9c6   : > { %v4638_v41 = vand.u32 4294901760, %v4637_v40  ;;  %16552 = vmatprep.subr.mxu1 %v17803_v0 }
 0x9c8   : > { %16520 = vmatmul.mubr.f32.vlgmr.msra.gmra.mxu0 %v4638_v41  ;;  %16545 = vmatmul.mubr.f32.vlgmr.msra.gmra.mxu1 %v4634_v37 }
 0x9c9   : > { %16528 = vmatpush3.msra.mxu0 %v4676_v26  ;;  %16529 = vmatprep.mubr.msk.f32.mxu0 %vm17804_vm0, %v17803_v0 }
 0x9ca   : > { %16537 = vmatprep.subr.mxu0 %v17803_v0  ;;  %16554 = vmatprep.mubr.msk.f32.mxu1 %vm17804_vm0, %v17803_v0 }
 0x9cb   : > { %16553 = vmatpush3.msra.mxu1 %v5128_v49 }
 0x9cc   : > { %16530 = vmatmul.mubr.f32.vlgmr.msra.gmra.mxu0 %v4635_v38  ;;  %16562 = vmatprep.subr.mxu1 %v17803_v0 }
 0x9cd   : > { %16538 = vmatpush3.msra.mxu0 %v4677_v27  ;;  %16539 = vmatprep.mubr.msk.f32.mxu0 %vm17804_vm0, %v17803_v0 }
 0x9ce   : > { %16547 = vmatprep.subr.mxu0 %v17803_v0 }
 0x9d0   : > { %16540 = vmatmul.mubr.f32.vlgmr.msra.gmra.mxu0 %v4634_v37 }
 0x9d1   : > { %16549 = vmatprep.mubr.msk.f32.mxu0 %vm17804_vm0, %v17803_v0  ;;  %16548 = vmatpush3.msra.mxu0 %v5048_v43 }
 0x9d2   : > { %16557 = vmatprep.subr.mxu0 %v17803_v0 }
 0xa80   : > { %v4716_v50 = vpop.f32.mrf.mxu1 }
 0xa82   : > { %v16526_v51 = vpop.f32.mrf.mxu1 }
 0xa84   : > { %v4864_v52 = vpop.f32.mrf.mxu1 }
 0xa86   : > { %v16536_v53 = vpop.f32.mrf.mxu1 }
 0xa88   : > { %v4640_v54 = vpop.f32.mrf.mxu0  ;;  %v5010_v55 = vpop.f32.mrf.mxu1 }
 0xa89   : > { %v4717_v60 = vadd.f32 %v4716_v50, %v4640_v54 }
 0xa8a   : > { %v16521_v57 = vpop.f32.mrf.mxu0  ;;  %v16546_v59 = vpop.f32.mrf.mxu1 }
 0xa8c   : > { %v4790_v62 = vpop.f32.mrf.mxu0 }
 0xa8d   : > { %v4791_v63 = vadd.f32 %v4790_v62, %v4717_v60 }
 0xa8e   : > { %v16531_v1 = vpop.f32.mrf.mxu0 }
 0xa8f   : > { %v4865_v4 = vadd.f32 %v4864_v52, %v4791_v63 }
 0xa90   : > { %v4938_v5 = vpop.f32.mrf.mxu0 }
 0xa91   : > { %v4939_v6 = vadd.f32 %v4938_v5, %v4865_v4 }
 0xa92   : > { %v16541_v8 = vpop.f32.mrf.mxu0 }
 0xa93   : > { %v5011_v58 = vadd.f32 %v5010_v55, %v4939_v6 }
 0xa95   : > { %v5015_v11 = vsel %vm1368_vm3, %v5011_v58, 0 }
 0xa96   : > { %v5083_v12 = vand.u32 4294901760, %v5015_v11 }
 0xa98   : > { %v5084_v15 = vsub.f32 %v5015_v11, %v5083_v12  ;;  %16555 = vmatmul.mubr.f32.vlgmr.msra.gmra.mxu1 %v5083_v12 }
 0xa99   : > { %16563 = vmatpush3.msra.mxu1 %v5048_v43  ;;  %16564 = vmatprep.mubr.msk.f32.mxu1 %vm17804_vm0, %v17803_v0 }
 0xa9a   : > { %v5085_v17 = vand.u32 4294901760, %v5084_v15  ;;  %16572 = vmatprep.subr.mxu1 %v17803_v0 }
 0xa9c   : > { %16565 = vmatmul.mubr.f32.vlgmr.msra.gmra.mxu1 %v5085_v17  ;;  %v5086_v19 = vsub.f32 %v5084_v15, %v5085_v17 }
 0xa9d   : > { %16573 = vmatpush3.msra.mxu1 %v5048_v43  ;;  %16574 = vmatprep.mubr.msk.f32.mxu1 %vm17804_vm0, %v17803_v0 }
 0xa9e   : > { %16582 = vmatprep.subr.mxu1 %v17803_v0  ;;  %v5087_v21 = vand.u32 4294901760, %v5086_v19 }
 0xaa0   : > { %16550 = vmatmul.mubr.f32.vlgmr.msra.gmra.mxu0 %v5087_v21  ;;  %16575 = vmatmul.mubr.f32.vlgmr.msra.gmra.mxu1 %v5083_v12 }
 0xaa1   : > { %16583 = vmatpush3.xpose.msra.mxu1 %v5583_v22  ;;  %16558 = vmatpush3.msra.mxu0 %v5125_v44  ;;  %v867_v22 = vld [vmem:[%s19729_s3 + $0x18] sm:$0xff] }
 0xaa2   : > { %16559 = vmatprep.mubr.msk.f32.mxu0 %vm17804_vm0, %v17803_v0  ;;  %16584 = vmatprep.mubr.msk.f32.mxu1 %vm17804_vm0, %v17803_v0 }
 0xaa3   : > { %16592 = vmatprep.subr.mxu1 %v17803_v0  ;;  %16567 = vmatprep.subr.mxu0 %v17803_v0 }
 0xaa4   : > { %16560 = vmatmul.mubr.f32.vlgmr.msra.gmra.mxu0 %v5084_v15  ;;  %16585 = vmatmul.mubr.f32.vlgmr.msra.gmra.mxu1 %v5538_v16 }
 0xaa5   : > { %16593 = vmatpush3.xpose.msra.mxu1 %v5503_v3  ;;  %16568 = vmatpush3.msra.mxu0 %v5126_v47 }
 0xaa6   : > { %16569 = vmatprep.mubr.msk.f32.mxu0 %vm17804_vm0, %v17803_v0  ;;  %16577 = vmatprep.subr.mxu0 %v17803_v0 }
 0xaa7   : > { %16594 = vmatprep.mubr.msk.f32.mxu1 %vm17804_vm0, %v17803_v0  ;;  %16602 = vmatprep.subr.mxu1 %v17803_v0 }
 0xaa8   : > { %16570 = vmatmul.mubr.f32.vlgmr.msra.gmra.mxu0 %v5083_v12  ;;  %16595 = vmatmul.mubr.f32.vlgmr.msra.gmra.mxu1 %v5540_v23  ;;  %v6415_v23 = vand.u32 4294901760, %v867_v22 }
 0xaa9   : > { %16578 = vmatpush3.xpose.msra.mxu0 %v5503_v3  ;;  %16603 = vmatpush3.xpose.msra.mxu1 %v5503_v3 }
 0xaaa   : > { %16579 = vmatprep.mubr.msk.f32.mxu0 %vm17804_vm0, %v17803_v0  ;;  %16587 = vmatprep.subr.mxu0 %v17803_v0  ;;  %v6492_v24 = vsub.f32 %v867_v22, %v6415_v23 }
 0xaab   : > { %16604 = vmatprep.mubr.msk.f32.mxu1 %vm17804_vm0, %v17803_v0  ;;  %16612 = vmatprep.subr.mxu1 %v17803_v0 }
 0xaac   : > { %16580 = vmatmul.mubr.f32.vlgmr.msra.gmra.mxu0 %v5542_v25  ;;  %16605 = vmatmul.mubr.f32.vlgmr.msra.gmra.mxu1 %v5538_v16  ;;  %v6493_v25 = vand.u32 4294901760, %v6492_v24 }
 0xaad   : > { %16588 = vmatpush3.xpose.msra.mxu0 %v5580_v9  ;;  %16589 = vmatprep.mubr.msk.f32.mxu0 %vm17804_vm0, %v17803_v0 }
 0xaae   : > { %16597 = vmatprep.subr.mxu0 %v17803_v0  ;;  %16614 = vmatprep.mubr.msk.f32.mxu1 %vm17804_vm0, %v17803_v0 }
 0xab0   : > { %16590 = vmatmul.mubr.f32.vlgmr.msra.gmra.mxu0 %v5539_v20 }
 0xab1   : > { %16598 = vmatpush3.xpose.msra.mxu0 %v5581_v13  ;;  %16599 = vmatprep.mubr.msk.f32.mxu0 %vm17804_vm0, %v17803_v0 }
 0xab2   : > { %16607 = vmatprep.subr.mxu0 %v17803_v0 }
 0xab4   : > { %16600 = vmatmul.mubr.f32.vlgmr.msra.gmra.mxu0 %v5538_v16 }
 0xab5   : > { %16609 = vmatprep.mubr.msk.f32.mxu0 %vm17804_vm0, %v17803_v0 }
 0xb58   : > { %v5165_v26 = vpop.f32.mrf.mxu1 }
 0xb5a   : > { %v16556_v27 = vpop.f32.mrf.mxu1 }
 0xb5c   : > { %v5313_v28 = vpop.f32.mrf.mxu1 }
 0xb5e   : > { %v16566_v30 = vpop.f32.mrf.mxu1 }
 0xb60   : > { %v5089_v31 = vpop.f32.mrf.mxu0  ;;  %v5459_v32 = vpop.f32.mrf.mxu1 }
 0xb61   : > { %v5166_v33 = vadd.f32 %v5165_v26, %v5089_v31  ;;  %v6494_v26 = vsub.f32 %v6492_v24, %v6493_v25 }
 0xb62   : > { %v16551_v34 = vpop.f32.mrf.mxu0  ;;  %v16576_v35 = vpop.f32.mrf.mxu1 }
 0xb63   : > { %v6495_v27 = vand.u32 4294901760, %v6494_v26 }
 0xb64   : > { %v5239_v36 = vpop.f32.mrf.mxu0  ;;  %v5620_v37 = vpop.f32.mrf.mxu1 }
 0xb65   : > { %v5240_v38 = vadd.f32 %v5239_v36, %v5166_v33 }
 0xb66   : > { %v16561_v39 = vpop.f32.mrf.mxu0  ;;  %v16586_v40 = vpop.f32.mrf.mxu1 }
 0xb67   : > { %v5314_v41 = vadd.f32 %v5313_v28, %v5240_v38 }
 0xb68   : > { %v5387_v42 = vpop.f32.mrf.mxu0  ;;  %v5768_v43 = vpop.f32.mrf.mxu1 }
 0xb69   : > { %v5388_v44 = vadd.f32 %v5387_v42, %v5314_v41 }
 0xb6a   : > { %v16571_v47 = vpop.f32.mrf.mxu0  ;;  %v16596_v48 = vpop.f32.mrf.mxu1 }
 0xb6b   : > { %v5460_v49 = vadd.f32 %v5459_v32, %v5388_v44 }
 0xb6c   : > { %v5544_v50 = vpop.f32.mrf.mxu0  ;;  %v5914_v51 = vpop.f32.mrf.mxu1 }
 0xb6d   : > { %v18424_v52 = vadd.f32 %v5460_v49, %v18352_v7  ;;  %v5621_v55 = vadd.f32 %v5620_v37, %v5544_v50 }
 0xb6e   : > { %v16581_v53 = vpop.f32.mrf.mxu0  ;;  %v16606_v54 = vpop.f32.mrf.mxu1 }
 0xb70   : > { %v5694_v56 = vpop.f32.mrf.mxu0 }
 0xb71   : > { %v5695_v57 = vadd.f32 %v5694_v56, %v5621_v55 }
 0xb72   : > { %v16591_v59 = vpop.f32.mrf.mxu0 }
 0xb73   : > { %v5769_v60 = vadd.f32 %v5768_v43, %v5695_v57 }
 0xb74   : > { %v5842_v61 = vpop.f32.mrf.mxu0 }
 0xb75   : > { %v5843_v62 = vadd.f32 %v5842_v61, %v5769_v60 }
 0xb76   : > { %v16601_v63 = vpop.f32.mrf.mxu0 }
 0xb77   : > { %v5915_v1 = vadd.f32 %v5914_v51, %v5843_v62 }
 0xb79   : > { %v5918_v3 = vsel %vm1368_vm3, %v5915_v1, -inf }
 0xb7a   : > { %5919 = vmax.xlane.f32.xlu1 %v5918_v3 }
 0xc03   : > { %v5920_v4 = vpop.xlane.xlu1 %5919 }
 0xc04   : > { %v5921_v5 = vsub.f32 %v5915_v1, %v5920_v4 }
 0xc06   : > { %v5922_v6 = vmul.f32 1.442695, %v5921_v5 }
 0xc08   : > { %17616 = vpow2.f32 %v5922_v6 }
 0xc15   : > { %v17617_v7 = vpop.eup %17616 }
 0xc16   : > { %v5924_v8 = vsel %vm1368_vm3, %v17617_v7, 0.0 }
 0xc17   : > { %5925 = vadd.xlane.f32.xlu0 %v5924_v8 }
 0xc2d   : > { %5929 = vrot.lane.b32.xlu0 %v18140_v29, %s19739_s15 }
 0xca0   : > { %v5926_v9 = vpop.xlane.xlu0 %5925 }
 0xca1   : > { %17618 = vrcp.f32 %v5926_v9 }
 0xca4   : > { %v5930_v58 = vpop.permute.xlu0 %5929 }
 0xca5   : > { %v5966_v10 = vand.u32 4294901760, %v5930_v58 }
 0xca7   : > { %v6043_v11 = vsub.f32 %v5930_v58, %v5966_v10  ;;  %16608 = vmatpush3.msra.mxu0 %v5966_v10 }
 0xca8   : > { %16617 = vmatprep.subr.mxu0 %v17803_v0 }
 0xca9   : > { %v6044_v12 = vand.u32 4294901760, %v6043_v11 }
 0xcab   : > { %v6045_v13 = vsub.f32 %v6043_v11, %v6044_v12 }
 0xcad   : > { %v6046_v14 = vand.u32 4294901760, %v6045_v13 }
 0xcae   : > { %v17619_v15 = vpop.eup %17618 }
 0xcaf   : > { %16613 = vmatpush3.msra.mxu1 %v6046_v14  ;;  %v5928_v16 = vmul.f32 %v17619_v15, %v17617_v7  ;;  %v18472_v7 = vsub.s32 1, %v18078_v45 }
 0xcb0   : > { %16622 = vmatprep.subr.mxu1 %v17803_v0 }
 0xcb1   : > { %v5933_v17 = vsel %vm1368_vm3, %v5928_v16, 0 }
 0xcb2   : > { %v6001_v18 = vand.u32 4294901760, %v5933_v17 }
 0xcb4   : > { %v6002_v29 = vsub.f32 %v5933_v17, %v6001_v18  ;;  %16615 = vmatmul.mubr.f32.vlgmr.msra.gmra.mxu1 %v6001_v18 }
 0xcb5   : > { %16623 = vmatpush3.msra.mxu1 %v5966_v10  ;;  %16624 = vmatprep.mubr.msk.f32.mxu1 %vm17804_vm0, %v17803_v0 }
 0xcb6   : > { %16632 = vmatprep.subr.mxu1 %v17803_v0  ;;  %v6003_v19 = vand.u32 4294901760, %v6002_v29 }
 0xcb8   : > { %16625 = vmatmul.mubr.f32.vlgmr.msra.gmra.mxu1 %v6003_v19  ;;  %v6004_v20 = vsub.f32 %v6002_v29, %v6003_v19 }
 0xcb9   : > { %16633 = vmatpush3.msra.mxu1 %v5966_v10  ;;  %16634 = vmatprep.mubr.msk.f32.mxu1 %vm17804_vm0, %v17803_v0 }
 0xcba   : > { %v6005_v21 = vand.u32 4294901760, %v6004_v20  ;;  %16642 = vmatprep.subr.mxu1 %v17803_v0 }
 0xcbc   : > { %16610 = vmatmul.mubr.f32.vlgmr.msra.gmra.mxu0 %v6005_v21  ;;  %16635 = vmatmul.mubr.f32.vlgmr.msra.gmra.mxu1 %v6001_v18  ;;  %v6864_v21 = vld [vmem:[%s19730_s4 + $0x18] sm:$0xff] }
 0xcbd   : > { %16618 = vmatpush3.msra.mxu0 %v6043_v11  ;;  %16619 = vmatprep.mubr.msk.f32.mxu0 %vm17804_vm0, %v17803_v0  ;;  %v18474_v11 = vld [vmem:[#allocation6] sm:$0xff]  ;;  %v18491_v22 = vand.u32 4294901760, %v6864_v21 }
 0xcbe   : > { %16627 = vmatprep.subr.mxu0 %v17803_v0  ;;  %16644 = vmatprep.mubr.msk.f32.mxu1 %vm17804_vm0, %v17803_v0 }
 0xcbf   : > { %16643 = vmatpush3.msra.mxu1 %v6495_v27  ;;  %v18503_v27 = vsub.f32 %v6864_v21, %v18491_v22 }
 0xcc0   : > { %16620 = vmatmul.mubr.f32.vlgmr.msra.gmra.mxu0 %v6002_v29  ;;  %16652 = vmatprep.subr.mxu1 %v17803_v0 }
 0xcc1   : > { %16628 = vmatpush3.msra.mxu0 %v6044_v12  ;;  %16629 = vmatprep.mubr.msk.f32.mxu0 %vm17804_vm0, %v17803_v0  ;;  %v6834_v12 = vrot.slane %v18474_v11, %v18472_v7 }
 0xcc2   : > { %16637 = vmatprep.subr.mxu0 %v17803_v0 }
 0xcc4   : > { %16630 = vmatmul.mubr.f32.vlgmr.msra.gmra.mxu0 %v6001_v18 }
 0xcc5   : > { %16639 = vmatprep.mubr.msk.f32.mxu0 %vm17804_vm0, %v17803_v0  ;;  %16638 = vmatpush3.msra.mxu0 %v6415_v23 }
 0xcc6   : > { %16647 = vmatprep.subr.mxu0 %v17803_v0 }
 0xd74   : > { %v6083_v28 = vpop.f32.mrf.mxu1 }
 0xd76   : > { %v16616_v30 = vpop.f32.mrf.mxu1 }
 0xd78   : > { %v6231_v31 = vpop.f32.mrf.mxu1 }
 0xd7a   : > { %v16626_v32 = vpop.f32.mrf.mxu1 }
 0xd7b   : > { %v6978_v32 = vand.u32 4294901760, %v18503_v27 }
 0xd7c   : > { %v6007_v33 = vpop.f32.mrf.mxu0  ;;  %v6377_v34 = vpop.f32.mrf.mxu1 }
 0xd7d   : > { %v6084_v37 = vadd.f32 %v6083_v28, %v6007_v33 }
 0xd7e   : > { %v16611_v35 = vpop.f32.mrf.mxu0  ;;  %v16636_v36 = vpop.f32.mrf.mxu1 }
 0xd7f   : > { %v6979_v36 = vsub.f32 %v18503_v27, %v6978_v32 }
 0xd80   : > { %v6157_v38 = vpop.f32.mrf.mxu0 }
 0xd81   : > { %v6158_v39 = vadd.f32 %v6157_v38, %v6084_v37 }
 0xd82   : > { %v16621_v40 = vpop.f32.mrf.mxu0 }
 0xd83   : > { %v6232_v41 = vadd.f32 %v6231_v31, %v6158_v39  ;;  %v6980_v39 = vand.u32 4294901760, %v6979_v36 }
 0xd84   : > { %v6305_v42 = vpop.f32.mrf.mxu0 }
 0xd85   : > { %v6306_v43 = vadd.f32 %v6305_v42, %v6232_v41 }
 0xd86   : > { %v16631_v44 = vpop.f32.mrf.mxu0 }
 0xd87   : > { %v6378_v47 = vadd.f32 %v6377_v34, %v6306_v43 }
 0xd89   : > { %v6382_v48 = vsel %vm1368_vm3, %v6378_v47, 0 }
 0xd8a   : > { %v6450_v49 = vand.u32 4294901760, %v6382_v48 }
 0xd8c   : > { %v6451_v50 = vsub.f32 %v6382_v48, %v6450_v49  ;;  %16645 = vmatmul.mubr.f32.vlgmr.msra.gmra.mxu1 %v6450_v49 }
 0xd8d   : > { %16653 = vmatpush3.msra.mxu1 %v6415_v23  ;;  %16654 = vmatprep.mubr.msk.f32.mxu1 %vm17804_vm0, %v17803_v0 }
 0xd8e   : > { %v6452_v51 = vand.u32 4294901760, %v6451_v50  ;;  %16662 = vmatprep.subr.mxu1 %v17803_v0 }
 0xd90   : > { %16655 = vmatmul.mubr.f32.vlgmr.msra.gmra.mxu1 %v6452_v51  ;;  %v6453_v53 = vsub.f32 %v6451_v50, %v6452_v51 }
 0xd91   : > { %16663 = vmatpush3.msra.mxu1 %v6415_v23  ;;  %16664 = vmatprep.mubr.msk.f32.mxu1 %vm17804_vm0, %v17803_v0 }
 0xd92   : > { %v6454_v54 = vand.u32 4294901760, %v6453_v53  ;;  %16678 = vmatprep.subr.mxu1 %v17803_v0 }
 0xd94   : > { %16640 = vmatmul.mubr.f32.vlgmr.msra.gmra.mxu0 %v6454_v54  ;;  %16665 = vmatmul.mubr.f32.vlgmr.msra.gmra.mxu1 %v6450_v49 }
 0xd95   : > { %16648 = vmatpush3.msra.mxu0 %v6492_v24  ;;  %16649 = vmatprep.mubr.msk.f32.mxu0 %vm17804_vm0, %v17803_v0 }
 0xd96   : > { %16657 = vmatprep.subr.mxu0 %v17803_v0  ;;  %16686 = vmatprep.mubr.msk.f32.mxu1 %vm17804_vm0, %v17803_v0 }
 0xd97   : > { %16679 = vmatpush3.msra.mxu1 %v6980_v39 }
 0xd98   : > { %16650 = vmatmul.mubr.f32.vlgmr.msra.gmra.mxu0 %v6451_v50  ;;  %16680 = vmatprep.subr.mxu1 %v17803_v0  ;;  %v6858_v50 = vsub.s32 3, %v18078_v45 }
 0xd99   : > { %16658 = vmatpush3.msra.mxu0 %v6493_v25  ;;  %16659 = vmatprep.mubr.msk.f32.mxu0 %vm17804_vm0, %v17803_v0  ;;  %v6861_v25 = vld [vmem:[%s19730_s4] sm:$0xff] }
 0xd9a   : > { %16667 = vmatprep.subr.mxu0 %v17803_v0  ;;  %v18500_v26 = vand.u32 4294901760, %v6861_v25 }
 0xd9c   : > { %16660 = vmatmul.mubr.f32.vlgmr.msra.gmra.mxu0 %v6450_v49  ;;  %v18513_v31 = vsub.f32 %v6861_v25, %v18500_v26  ;;  %v6853_v49 = vsub.s32 2, %v18078_v45 }
 0xd9d   : > { %16675 = vmatprep.mubr.msk.f32.mxu0 %vm17804_vm0, %v17803_v0  ;;  %16668 = vmatpush3.msra.mxu0 %v18491_v22 }
 0xd9e   : > { %16669 = vmatprep.subr.mxu0 %v17803_v0  ;;  %v6999_v35 = vand.u32 4294901760, %v18513_v31  ;;  %v6854_v51 = vrot.slane %v18474_v11, %v6853_v49 }
 0xda0   : > { %v7000_v41 = vsub.f32 %v18513_v31, %v6999_v35 }
 0xda2   : > { %v7001_v43 = vand.u32 4294901760, %v7000_v41 }
 0xe4c   : > { %v6532_v55 = vpop.f32.mrf.mxu1 }
 0xe4e   : > { %v16646_v56 = vpop.f32.mrf.mxu1 }
 0xe50   : > { %v6680_v57 = vpop.f32.mrf.mxu1 }
 0xe52   : > { %v16656_v59 = vpop.f32.mrf.mxu1 }
 0xe54   : > { %v6456_v60 = vpop.f32.mrf.mxu0  ;;  %v6826_v61 = vpop.f32.mrf.mxu1 }
 0xe55   : > { %v6533_v1 = vadd.f32 %v6532_v55, %v6456_v60  ;;  %v6859_v55 = vrot.slane %v18474_v11, %v6858_v50 }
 0xe56   : > { %v16641_v62 = vpop.f32.mrf.mxu0  ;;  %v16666_v63 = vpop.f32.mrf.mxu1 }
 0xe58   : > { %v6606_v3 = vpop.f32.mrf.mxu0 }
 0xe59   : > { %v6607_v4 = vadd.f32 %v6606_v3, %v6533_v1  ;;  %v7365_v3 = vld [vmem:[%s19731_s5 + $0x38] sm:$0xff] }
 0xe5a   : > { %v16651_v5 = vpop.f32.mrf.mxu0 }
 0xe5b   : > { %v6681_v6 = vadd.f32 %v6680_v57, %v6607_v4  ;;  %v18605_v4 = vand.u32 4294901760, %v7365_v3  ;;  %v7364_v5 = vld [vmem:[%s19731_s5 + $0x30] sm:$0xff] }
 0xe5c   : > { %v6754_v8 = vpop.f32.mrf.mxu0 }
 0xe5d   : > { %v6755_v9 = vadd.f32 %v6754_v8, %v6681_v6  ;;  %v18611_v6 = vsub.f32 %v7365_v3, %v18605_v4  ;;  %v18613_v8 = vand.u32 4294901760, %v7364_v5 }
 0xe5e   : > { %v16661_v58 = vpop.f32.mrf.mxu0 }
 0xe5f   : > { %v6827_v10 = vadd.f32 %v6826_v61, %v6755_v9  ;;  %v7363_v9 = vld [vmem:[%s19731_s5 + $0x28] sm:$0xff]  ;;  %v7476_v58 = vand.u32 4294901760, %v18611_v6 }
 0xe61   : > { %v6830_v13 = vadd.f32 %v6827_v10, %v18424_v52  ;;  %v6863_v52 = vld [vmem:[%s19730_s4 + $0x10] sm:$0xff]  ;;  %v18622_v10 = vsub.f32 %v7364_v5, %v18613_v8 }
 0xe62   : > { %v18493_v23 = vand.u32 4294901760, %v6863_v52 }
 0xe63   : > { %v6835_v14 = vadd.f32 %v6834_v12, %v6830_v13  ;;  %v18624_v12 = vand.u32 4294901760, %v7363_v9  ;;  %v7362_v13 = vld [vmem:[%s19731_s5 + $0x20] sm:$0xff] }
 0xe64   : > { %v18506_v28 = vsub.f32 %v6863_v52, %v18493_v23  ;;  %16670 = vmatpush3.msra.mxu0 %v18493_v23 }
 0xe65   : > { %v6836_v15 = vadd.f32 %v6835_v14, %v18087_v2  ;;  %v6862_v2 = vld [vmem:[%s19730_s4 + $0x8] sm:$0xff]  ;;  %16671 = vmatprep.subr.mxu0 %v17803_v0  ;;  %v7477_v14 = vsub.f32 %v18611_v6, %v7476_v58 }
 0xe66   : > { %v18495_v24 = vand.u32 4294901760, %v6862_v2  ;;  %v6985_v33 = vand.u32 4294901760, %v18506_v28 }
 0xe67   : > { %v6837_v16 = vsel %vm876_vm2, %v6836_v15, 0.0 }
 0xe68   : > { %6838 = vadd.xlane.f32.xlu0 %v6837_v16  ;;  %v18509_v30 = vsub.f32 %v6862_v2, %v18495_v24  ;;  %v6986_v37 = vsub.f32 %v18506_v28, %v6985_v33  ;;  %16672 = vmatpush3.msra.mxu0 %v18495_v24  ;;  %v18636_v16 = vsub.f32 %v7363_v9, %v18624_v12  ;;  %v7360_v2 = vld [vmem:[%s19731_s5 + $0x10] sm:$0xff] }
 0xe69   : > { %16673 = vmatprep.subr.mxu0 %v17803_v0  ;;  %v18663_v25 = vand.u32 4294901760, %v7360_v2 }
 0xe6a   : > { %v6992_v34 = vand.u32 4294901760, %v18509_v30  ;;  %v6987_v40 = vand.u32 4294901760, %v6986_v37  ;;  %16674 = vmatpush3.msra.mxu0 %v18500_v26 }
 0xe6b   : > { %16689 = vmatprep.subr.mxu0 %v17803_v0 }
 0xe6c   : > { %v6993_v38 = vsub.f32 %v18509_v30, %v6992_v34  ;;  %16681 = vmatpush3.msra.mxu1 %v6987_v40 }
 0xe6d   : > { %16682 = vmatprep.subr.mxu1 %v17803_v0 }
 0xe6e   : > { %v6994_v42 = vand.u32 4294901760, %v6993_v38 }
 0xe70   : > { %16683 = vmatpush3.msra.mxu1 %v6994_v42 }
 0xe71   : > { %16684 = vmatprep.subr.mxu1 %v17803_v0 }
 0xe72   : > { %16685 = vmatpush3.msra.mxu1 %v7001_v43 }
 0xe73   : > { %16700 = vmatprep.subr.mxu1 %v17803_v0 }
 0xef1   : > { %v6839_v17 = vpop.xlane.xlu0 %6838 }
 0xef2   : > { %v6841_v18 = vmul.f32 0.03125, %v6839_v17  ;;  %v18638_v17 = vand.u32 4294901760, %v7362_v13 }
 0xef4   : > { %v6842_v29 = vsub.f32 %v6836_v15, %v6841_v18  ;;  %v7483_v15 = vand.u32 4294901760, %v18622_v10  ;;  %v7361_v18 = vld [vmem:[%s19731_s5 + $0x18] sm:$0xff]  ;;  %v18650_v21 = vsub.f32 %v7362_v13, %v18638_v17 }
 0xef5   : > { %v18653_v52 = vand.u32 4294901760, %v7361_v18 }
 0xef6   : > { %v6843_v19 = vmul.f32 %v6842_v29, %v6842_v29 }
 0xef8   : > { %v6844_v20 = vsel %vm876_vm2, %v6843_v19, 0.0  ;;  %v7484_v19 = vsub.f32 %v18622_v10, %v7483_v15 }
 0xef9   : > { %6845 = vadd.xlane.f32.xlu1 %v6844_v20  ;;  %v7490_v20 = vand.u32 4294901760, %v18636_v16 }
 0xf82   : > { %v6846_v44 = vpop.xlane.xlu1 %6845 }
 0xf83   : > { %v6847_v47 = vmul.f32 0.03125, %v6846_v44 }
 0xf85   : > { %v6848_v48 = vadd.f32 1e-05, %v6847_v47 }
 0xf87   : > { %17620 = vrsqrt.f32 %v6848_v48 }
 0xf94   : > { %v17621_v53 = vpop.eup %17620 }
 0xf95   : > { %v6850_v54 = vmul.f32 %v17621_v53, %v6842_v29  ;;  %v7478_v29 = vand.u32 4294901760, %v7477_v14 }
 0xf97   : > { %v6855_v56 = vmul.f32 %v6854_v51, %v6850_v54 }
 0xf99   : > { %v18550_v57 = vadd.f32 %v6859_v55, %v6855_v56 }
 0xf9b   : > { %v6870_v59 = vsel %vm876_vm2, %v18550_v57, 0 }
 0xf9c   : > { %v6941_v60 = vand.u32 4294901760, %v6870_v59 }
 0xf9e   : > { %v6942_v61 = vsub.f32 %v6870_v59, %v6941_v60  ;;  %16687 = vmatmul.mubr.f32.vlgmr.msra.gmra.mxu1 %v6941_v60  ;;  %v6867_v59 = vsub.s32 4, %v18078_v45 }
 0xf9f   : > { %16701 = vmatpush3.msra.mxu1 %v18491_v22  ;;  %16708 = vmatprep.mubr.msk.f32.mxu1 %vm17804_vm0, %v17803_v0 }
 0xfa0   : > { %16702 = vmatprep.subr.mxu1 %v17803_v0  ;;  %v6943_v62 = vand.u32 4294901760, %v6942_v61 }
 0xfa1   : > { %16703 = vmatpush3.msra.mxu1 %v18493_v23 }
 0xfa2   : > { %16704 = vmatprep.subr.mxu1 %v17803_v0  ;;  %v6944_v63 = vsub.f32 %v6942_v61, %v6943_v62 }
 0xfa3   : > { %16705 = vmatpush3.msra.mxu1 %v18495_v24 }
 0xfa4   : > { %16706 = vmatprep.subr.mxu1 %v17803_v0  ;;  %v6945_v1 = vand.u32 4294901760, %v6944_v63  ;;  %v6868_v63 = vrot.slane %v18474_v11, %v6867_v59 }
 0xfa5   : > { %16707 = vmatpush3.msra.mxu1 %v18500_v26 }
 0xfa6   : > { %16709 = vmatmul.mubr.f32.vlgmr.msra.gmra.mxu1 %v6943_v62  ;;  %16722 = vmatprep.subr.mxu1 %v17803_v0 }
 0xfa7   : > { %16676 = vmatmul.mubr.f32.vlgmr.msra.gmra.mxu0 %v6945_v1  ;;  %16723 = vmatpush3.msra.mxu1 %v18491_v22  ;;  %v7485_v22 = vand.u32 4294901760, %v7484_v19 }
 0xfa8   : > { %16690 = vmatpush3.msra.mxu0 %v18503_v27  ;;  %16724 = vmatprep.subr.mxu1 %v17803_v0  ;;  %v7359_v27 = vld [vmem:[%s19731_s5 + $0x8] sm:$0xff] }
 0xfa9   : > { %16691 = vmatprep.subr.mxu0 %v17803_v0  ;;  %16725 = vmatpush3.msra.mxu1 %v18493_v23  ;;  %v7491_v23 = vsub.f32 %v18636_v16, %v7490_v20 }
 0xfaa   : > { %16692 = vmatpush3.msra.mxu0 %v18506_v28  ;;  %16726 = vmatprep.subr.mxu1 %v17803_v0 }
 0xfab   : > { %16693 = vmatprep.subr.mxu0 %v17803_v0  ;;  %16727 = vmatpush3.msra.mxu1 %v18495_v24  ;;  %v7497_v24 = vand.u32 4294901760, %v18650_v21  ;;  %v7492_v28 = vand.u32 4294901760, %v7491_v23 }
 0xfac   : > { %16694 = vmatpush3.msra.mxu0 %v18509_v30  ;;  %16728 = vmatprep.subr.mxu1 %v17803_v0 }
 0xfad   : > { %16695 = vmatprep.subr.mxu0 %v17803_v0  ;;  %16697 = vmatprep.mubr.msk.f32.mxu0 %vm17804_vm0, %v17803_v0  ;;  %v7498_v30 = vsub.f32 %v18650_v21, %v7497_v24 }
 0xfae   : > { %16696 = vmatpush3.msra.mxu0 %v18513_v31  ;;  %16729 = vmatpush3.msra.mxu1 %v18500_v26  ;;  %v18667_v26 = vsub.f32 %v7361_v18, %v18653_v52  ;;  %v18677_v31 = vsub.f32 %v7360_v2, %v18663_v25 }
 0xfaf   : > { %16730 = vmatprep.mubr.msk.f32.mxu1 %vm17804_vm0, %v17803_v0  ;;  %16698 = vmatmul.mubr.f32.vlgmr.msra.gmra.mxu0 %v6942_v61 }
 0xfb0   : > { %16711 = vmatprep.subr.mxu0 %v17803_v0  ;;  %16731 = vmatmul.mubr.f32.vlgmr.msra.gmra.mxu1 %v6941_v60  ;;  %v7511_v36 = vand.u32 4294901760, %v18677_v31 }
 0xfb1   : > { %16712 = vmatpush3.msra.mxu0 %v6978_v32  ;;  %16719 = vmatprep.mubr.msk.f32.mxu0 %vm17804_vm0, %v17803_v0  ;;  %v18679_v32 = vand.u32 4294901760, %v7359_v27 }
 0xfb2   : > { %16713 = vmatprep.subr.mxu0 %v17803_v0  ;;  %16752 = vmatprep.subr.mxu1 %v17803_v0  ;;  %v7512_v40 = vsub.f32 %v18677_v31, %v7511_v36 }
 0xfb3   : > { %16714 = vmatpush3.msra.mxu0 %v6985_v33  ;;  %16768 = vmatprep.mubr.msk.f32.mxu1 %vm17804_vm0, %v17803_v0  ;;  %v7504_v33 = vand.u32 4294901760, %v18667_v26  ;;  %v18690_v37 = vsub.f32 %v7359_v27, %v18679_v32 }
 0xfb4   : > { %16715 = vmatprep.subr.mxu0 %v17803_v0  ;;  %16753 = vmatpush3.msra.mxu1 %v7478_v29  ;;  %v7513_v44 = vand.u32 4294901760, %v7512_v40 }
 0xfb5   : > { %16716 = vmatpush3.msra.mxu0 %v6992_v34  ;;  %16754 = vmatprep.subr.mxu1 %v17803_v0  ;;  %v7358_v34 = vld [vmem:[%s19731_s5] sm:$0xff]  ;;  %v7505_v39 = vsub.f32 %v18667_v26, %v7504_v33  ;;  %v7518_v41 = vand.u32 4294901760, %v18690_v37 }
 0xfb6   : > { %16717 = vmatprep.subr.mxu0 %v17803_v0  ;;  %16755 = vmatpush3.msra.mxu1 %v7485_v22  ;;  %v18692_v38 = vand.u32 4294901760, %v7358_v34 }
 0xfb7   : > { %16718 = vmatpush3.msra.mxu0 %v6999_v35  ;;  %16756 = vmatprep.subr.mxu1 %v17803_v0  ;;  %v7499_v35 = vand.u32 4294901760, %v7498_v30  ;;  %v7506_v43 = vand.u32 4294901760, %v7505_v39  ;;  %v7519_v47 = vsub.f32 %v18690_v37, %v7518_v41 }
 0xfb8   : > { %16720 = vmatmul.mubr.f32.vlgmr.msra.gmra.mxu0 %v6941_v60  ;;  %16733 = vmatprep.subr.mxu0 %v17803_v0  ;;  %v18705_v42 = vsub.f32 %v7358_v34, %v18692_v38 }
 0xfb9   : > { %16749 = vmatprep.mubr.msk.f32.mxu0 %vm17804_vm0, %v17803_v0  ;;  %16734 = vmatpush3.msra.mxu0 %v18605_v4  ;;  %v7520_v51 = vand.u32 4294901760, %v7519_v47 }
 0xfba   : > { %16735 = vmatprep.subr.mxu0 %v17803_v0  ;;  %16757 = vmatpush3.msra.mxu1 %v7492_v28  ;;  %v7525_v48 = vand.u32 4294901760, %v18705_v42 }
 0xfbb   : > { %16736 = vmatpush3.msra.mxu0 %v18613_v8  ;;  %16758 = vmatprep.subr.mxu1 %v17803_v0 }
 0xfbc   : > { %16737 = vmatprep.subr.mxu0 %v17803_v0  ;;  %16759 = vmatpush3.msra.mxu1 %v7499_v35  ;;  %v7526_v53 = vsub.f32 %v18705_v42, %v7525_v48 }
 0xfbd   : > { %16738 = vmatpush3.msra.mxu0 %v18624_v12  ;;  %16760 = vmatprep.subr.mxu1 %v17803_v0 }
 0xfbe   : > { %16739 = vmatprep.subr.mxu0 %v17803_v0  ;;  %16761 = vmatpush3.msra.mxu1 %v7506_v43  ;;  %v7527_v54 = vand.u32 4294901760, %v7526_v53  ;;  %v15620_v53 = vld [vmem:[%s19728_s2 + $0x38] sm:$0xff] }
 0xfbf   : > { %16740 = vmatpush3.msra.mxu0 %v18638_v17  ;;  %16762 = vmatprep.subr.mxu1 %v17803_v0 }
 0xfc0   : > { %16741 = vmatprep.subr.mxu0 %v17803_v0  ;;  %16763 = vmatpush3.msra.mxu1 %v7513_v44 }
 0xfc1   : > { %16742 = vmatpush3.msra.mxu0 %v18653_v52  ;;  %16764 = vmatprep.subr.mxu1 %v17803_v0 }
 0xfc2   : > { %16743 = vmatprep.subr.mxu0 %v17803_v0  ;;  %16765 = vmatpush3.msra.mxu1 %v7520_v51 }
 0xfc3   : > { %16744 = vmatpush3.msra.mxu0 %v18663_v25  ;;  %16766 = vmatprep.subr.mxu1 %v17803_v0 }
 0xfc4   : > { %16745 = vmatprep.subr.mxu0 %v17803_v0  ;;  %16767 = vmatpush3.msra.mxu1 %v7527_v54  ;;  %v15619_v54 = vld [vmem:[%s19728_s2 + $0x30] sm:$0xff] }
 0xfc5   : > { %16746 = vmatpush3.msra.mxu0 %v18679_v32  ;;  %16790 = vmatprep.subr.mxu1 %v17803_v0 }
 0xfc6   : > { %16747 = vmatprep.subr.mxu0 %v17803_v0 }
 0xfc7   : > { %16748 = vmatpush3.msra.mxu0 %v18692_v38 }
 0xfc8   : > { %16771 = vmatprep.subr.mxu0 %v17803_v0 }
0x105e   : > { %v7038_v55 = vpop.f32.mrf.mxu1 }
0x1060   : > { %v16688_v56 = vpop.f32.mrf.mxu1 }
0x1061   : > { %v18835_v56 = vand.u32 4294901760, %v15619_v54 }
0x1066   : > { %v7195_v60 = vpop.f32.mrf.mxu1 }
0x1067   : > { %v6947_v61 = vpop.f32.mrf.mxu0 }
0x1068   : > { %v16710_v62 = vpop.f32.mrf.mxu1  ;;  %v6948_v3 = vadd.f32 %v6947_v61, %v6868_v63  ;;  %v15617_v61 = vld [vmem:[%s19728_s2 + $0x20] sm:$0xff] }
0x1069   : > { %v16677_v1 = vpop.f32.mrf.mxu0  ;;  %v18842_v62 = vand.u32 4294901760, %v15617_v61 }
0x106a   : > { %v7039_v13 = vadd.f32 %v7038_v55, %v6948_v3  ;;  %v18833_v55 = vand.u32 4294901760, %v15620_v53  ;;  %v18848_v1 = vsub.f32 %v15619_v54, %v18835_v56 }
0x106c   : > { %v18845_v63 = vsub.f32 %v15620_v53, %v18833_v55 }
0x106f   : > { %v7118_v5 = vpop.f32.mrf.mxu0 }
0x1070   : > { %v7353_v9 = vpop.f32.mrf.mxu1  ;;  %v7119_v29 = vadd.f32 %v7118_v5, %v7039_v13  ;;  %v18855_v5 = vsub.f32 %v15617_v61, %v18842_v62  ;;  %v8067_v13 = vand.u32 4294901760, %v18848_v1 }
0x1071   : > { %v16699_v14 = vpop.f32.mrf.mxu0 }
0x1072   : > { %v16732_v18 = vpop.f32.mrf.mxu1  ;;  %v7196_v19 = vadd.f32 %v7195_v60, %v7119_v29 }
0x1073   : > { %v8081_v18 = vand.u32 4294901760, %v18855_v5 }
0x1078   : > { %v7278_v2 = vpop.f32.mrf.mxu0 }
0x1079   : > { %v7279_v22 = vadd.f32 %v7278_v2, %v7196_v19  ;;  %v8068_v19 = vsub.f32 %v18848_v1, %v8067_v13 }
0x107a   : > { %v16721_v23 = vpop.f32.mrf.mxu0 }
0x107b   : > { %v7354_v27 = vadd.f32 %v7353_v9, %v7279_v22  ;;  %v8060_v9 = vand.u32 4294901760, %v18845_v63  ;;  %v8069_v23 = vand.u32 4294901760, %v8068_v19 }
0x107d   : > { %v7357_v28 = vmax.f32 %v7354_v27, 0.0  ;;  %v8061_v29 = vsub.f32 %v18845_v63, %v8060_v9  ;;  %v8082_v27 = vsub.f32 %v18855_v5, %v8081_v18 }
0x107f   : > { %v7372_v30 = vsel %vm7370_vm4, %v7357_v28, 0  ;;  %v8062_v22 = vand.u32 4294901760, %v8061_v29 }
0x1080   : > { %v18727_v34 = vand.u32 4294901760, %v7372_v30 }
0x1082   : > { %v7448_v35 = vsub.f32 %v7372_v30, %v18727_v34  ;;  %16769 = vmatmul.mubr.f32.vlgmr.msra.gmra.mxu1 %v18727_v34  ;;  %v8083_v30 = vand.u32 4294901760, %v8082_v27 }
0x1083   : > { %16791 = vmatpush3.msra.mxu1 %v18605_v4  ;;  %16806 = vmatprep.mubr.msk.f32.mxu1 %vm17804_vm0, %v17803_v0 }
0x1084   : > { %16792 = vmatprep.subr.mxu1 %v17803_v0  ;;  %v7449_v39 = vand.u32 4294901760, %v7448_v35 }
0x1085   : > { %16793 = vmatpush3.msra.mxu1 %v18613_v8 }
0x1086   : > { %16794 = vmatprep.subr.mxu1 %v17803_v0  ;;  %v7450_v40 = vsub.f32 %v7448_v35, %v7449_v39 }
0x1087   : > { %16795 = vmatpush3.msra.mxu1 %v18624_v12 }
0x1088   : > { %16796 = vmatprep.subr.mxu1 %v17803_v0  ;;  %v7451_v43 = vand.u32 4294901760, %v7450_v40  ;;  %v7927_v40 = vsub.s32 6, %v18078_v45 }
0x1089   : > { %16797 = vmatpush3.msra.mxu1 %v18638_v17 }
0x108a   : > { %16798 = vmatprep.subr.mxu1 %v17803_v0  ;;  %16750 = vmatmul.mubr.f32.vlgmr.msra.gmra.mxu0 %v7451_v43  ;;  %v7932_v43 = vsub.s32 7, %v18078_v45 }
0x108b   : > { %16772 = vmatpush3.msra.mxu0 %v18611_v6  ;;  %16799 = vmatpush3.msra.mxu1 %v18653_v52 }
0x108c   : > { %16773 = vmatprep.subr.mxu0 %v17803_v0  ;;  %16800 = vmatprep.subr.mxu1 %v17803_v0 }
0x108d   : > { %16774 = vmatpush3.msra.mxu0 %v18622_v10  ;;  %16801 = vmatpush3.msra.mxu1 %v18663_v25 }
0x108e   : > { %16775 = vmatprep.subr.mxu0 %v17803_v0  ;;  %16802 = vmatprep.subr.mxu1 %v17803_v0 }
0x108f   : > { %16776 = vmatpush3.msra.mxu0 %v18636_v16  ;;  %16803 = vmatpush3.msra.mxu1 %v18679_v32 }
0x1090   : > { %16777 = vmatprep.subr.mxu0 %v17803_v0  ;;  %16804 = vmatprep.subr.mxu1 %v17803_v0 }
0x1091   : > { %16778 = vmatpush3.msra.mxu0 %v18650_v21  ;;  %16805 = vmatpush3.msra.mxu1 %v18692_v38 }
0x1092   : > { %16779 = vmatprep.subr.mxu0 %v17803_v0  ;;  %16807 = vmatmul.mubr.f32.vlgmr.msra.gmra.mxu1 %v7449_v39 }
0x1093   : > { %16828 = vmatprep.subr.mxu1 %v17803_v0  ;;  %16780 = vmatpush3.msra.mxu0 %v18667_v26 }
0x1094   : > { %16829 = vmatpush3.msra.mxu1 %v18605_v4  ;;  %16781 = vmatprep.subr.mxu0 %v17803_v0 }
0x1095   : > { %16830 = vmatprep.subr.mxu1 %v17803_v0  ;;  %16782 = vmatpush3.msra.mxu0 %v18677_v31 }
0x1096   : > { %16831 = vmatpush3.msra.mxu1 %v18613_v8  ;;  %16783 = vmatprep.subr.mxu0 %v17803_v0 }
0x1097   : > { %16832 = vmatprep.subr.mxu1 %v17803_v0  ;;  %16784 = vmatpush3.msra.mxu0 %v18690_v37 }
0x1098   : > { %16833 = vmatpush3.msra.mxu1 %v18624_v12  ;;  %16785 = vmatprep.subr.mxu0 %v17803_v0 }
0x1099   : > { %16834 = vmatprep.subr.mxu1 %v17803_v0  ;;  %16786 = vmatpush3.msra.mxu0 %v18705_v42 }
0x109a   : > { %16787 = vmatprep.mubr.msk.f32.mxu0 %vm17804_vm0, %v17803_v0  ;;  %16835 = vmatpush3.msra.mxu1 %v18638_v17 }
0x109b   : > { %16788 = vmatmul.mubr.f32.vlgmr.msra.gmra.mxu0 %v7448_v35  ;;  %16809 = vmatprep.subr.mxu0 %v17803_v0 }
0x109c   : > { %16836 = vmatprep.subr.mxu1 %v17803_v0  ;;  %16810 = vmatpush3.msra.mxu0 %v7476_v58 }
0x109d   : > { %16837 = vmatpush3.msra.mxu1 %v18653_v52  ;;  %16811 = vmatprep.subr.mxu0 %v17803_v0 }
0x109e   : > { %16838 = vmatprep.subr.mxu1 %v17803_v0  ;;  %16812 = vmatpush3.msra.mxu0 %v7483_v15  ;;  %v7368_v15 = vsub.s32 5, %v18078_v45 }
0x109f   : > { %16839 = vmatpush3.msra.mxu1 %v18663_v25  ;;  %16813 = vmatprep.subr.mxu0 %v17803_v0 }
0x10a0   : > { %16840 = vmatprep.subr.mxu1 %v17803_v0  ;;  %16814 = vmatpush3.msra.mxu0 %v7490_v20  ;;  %v7369_v17 = vrot.slane %v18474_v11, %v7368_v15 }
0x10a1   : > { %16841 = vmatpush3.msra.mxu1 %v18679_v32  ;;  %16815 = vmatprep.subr.mxu0 %v17803_v0 }
0x10a2   : > { %16842 = vmatprep.subr.mxu1 %v17803_v0  ;;  %16816 = vmatpush3.msra.mxu0 %v7497_v24 }
0x10a3   : > { %16843 = vmatpush3.msra.mxu1 %v18692_v38  ;;  %16844 = vmatprep.mubr.msk.f32.mxu1 %vm17804_vm0, %v17803_v0 }
0x10a4   : > { %16817 = vmatprep.subr.mxu0 %v17803_v0  ;;  %16845 = vmatmul.mubr.f32.vlgmr.msra.gmra.mxu1 %v18727_v34 }
0x10a5   : > { %16818 = vmatpush3.msra.mxu0 %v7504_v33  ;;  %16825 = vmatprep.mubr.msk.f32.mxu0 %vm17804_vm0, %v17803_v0 }
0x10a6   : > { %16819 = vmatprep.subr.mxu0 %v17803_v0  ;;  %16858 = vmatprep.subr.mxu1 %v17803_v0 }
0x10a7   : > { %16820 = vmatpush3.msra.mxu0 %v7511_v36  ;;  %16866 = vmatprep.mubr.msk.f32.mxu1 %vm17804_vm0, %v17803_v0 }
0x10a8   : > { %16821 = vmatprep.subr.mxu0 %v17803_v0  ;;  %16859 = vmatpush3.msra.mxu1 %v8062_v22 }
0x10a9   : > { %16822 = vmatpush3.msra.mxu0 %v7518_v41  ;;  %16860 = vmatprep.subr.mxu1 %v17803_v0 }
0x10aa   : > { %16823 = vmatprep.subr.mxu0 %v17803_v0  ;;  %16861 = vmatpush3.msra.mxu1 %v8069_v23 }
0x10ab   : > { %16824 = vmatpush3.msra.mxu0 %v7525_v48  ;;  %16862 = vmatprep.subr.mxu1 %v17803_v0 }
0x10ac   : > { %16826 = vmatmul.mubr.f32.vlgmr.msra.gmra.mxu0 %v18727_v34  ;;  %16847 = vmatprep.subr.mxu0 %v17803_v0 }
0x10ad   : > { %16855 = vmatprep.mubr.msk.f32.mxu0 %vm17804_vm0, %v17803_v0  ;;  %16848 = vmatpush3.msra.mxu0 %v18833_v55 }
0x10ae   : > { %16849 = vmatprep.subr.mxu0 %v17803_v0 }
0x10af   : > { %16850 = vmatpush3.msra.mxu0 %v18835_v56 }
0x10b0   : > { %16851 = vmatprep.subr.mxu0 %v17803_v0 }
0x1142   : > { %v7564_v4 = vpop.f32.mrf.mxu1 }
0x1144   : > { %v16770_v6 = vpop.f32.mrf.mxu1 }
0x114a   : > { %v7453_v8 = vpop.f32.mrf.mxu0 }
0x114b   : > { %v7454_v21 = vadd.f32 %v7453_v8, %v7369_v17 }
0x114c   : > { %v16751_v58 = vpop.f32.mrf.mxu0 }
0x114d   : > { %v7565_v24 = vadd.f32 %v7564_v4, %v7454_v21  ;;  %v7928_v4 = vrot.slane %v18474_v11, %v7927_v40  ;;  %v7933_v58 = vrot.slane %v18474_v11, %v7932_v43 }
0x1152   : > { %v7733_v10 = vpop.f32.mrf.mxu1 }
0x1154   : > { %v16808_v12 = vpop.f32.mrf.mxu1 }
0x115b   : > { %v7652_v16 = vpop.f32.mrf.mxu0 }
0x115c   : > { %v7653_v26 = vadd.f32 %v7652_v16, %v7565_v24 }
0x115d   : > { %v16789_v20 = vpop.f32.mrf.mxu0 }
0x115e   : > { %v7734_v31 = vadd.f32 %v7733_v10, %v7653_v26  ;;  %v7936_v26 = vld [vmem:[#allocation6 + $0x8] sm:$0xff] }
0x1164   : > { %v7907_v52 = vpop.f32.mrf.mxu1 }
0x1166   : > { %v16846_v25 = vpop.f32.mrf.mxu1 }
0x116c   : > { %v7828_v32 = vpop.f32.mrf.mxu0 }
0x116d   : > { %v7829_v33 = vadd.f32 %v7828_v32, %v7734_v31 }
0x116e   : > { %v16827_v36 = vpop.f32.mrf.mxu0 }
0x116f   : > { %v7908_v37 = vadd.f32 %v7907_v52, %v7829_v33  ;;  %v7950_v36 = vrot.slane %v7936_v26, %v18081_v46 }
0x1171   : > { %v7911_v38 = vadd.f32 %v7908_v37, %v18550_v57  ;;  %v15618_v57 = vld [vmem:[%s19728_s2 + $0x28] sm:$0xff] }
0x1172   : > { %v18837_v60 = vand.u32 4294901760, %v15618_v57 }
0x1173   : > { %v7912_v41 = vsel %vm876_vm2, %v7911_v38, 0.0 }
0x1174   : > { %7913 = vadd.xlane.f32.xlu1 %v7912_v41  ;;  %v18851_v3 = vsub.f32 %v15618_v57, %v18837_v60  ;;  %16852 = vmatpush3.msra.mxu0 %v18837_v60 }
0x1175   : > { %16853 = vmatprep.subr.mxu0 %v17803_v0 }
0x1176   : > { %v8074_v14 = vand.u32 4294901760, %v18851_v3  ;;  %16854 = vmatpush3.msra.mxu0 %v18842_v62 }
0x1177   : > { %16869 = vmatprep.subr.mxu0 %v17803_v0 }
0x1178   : > { %v8075_v2 = vsub.f32 %v18851_v3, %v8074_v14 }
0x117a   : > { %v8076_v28 = vand.u32 4294901760, %v8075_v2 }
0x117c   : > { %16863 = vmatpush3.msra.mxu1 %v8076_v28 }
0x117d   : > { %16864 = vmatprep.subr.mxu1 %v17803_v0 }
0x117e   : > { %16865 = vmatpush3.msra.mxu1 %v8083_v30 }
0x117f   : > { %16880 = vmatprep.subr.mxu1 %v17803_v0 }
0x11fd   : > { %v7914_v42 = vpop.xlane.xlu1 %7913 }
0x11fe   : > { %v7915_v44 = vmul.f32 0.03125, %v7914_v42 }
0x1200   : > { %v7916_v47 = vsub.f32 %v7911_v38, %v7915_v44 }
0x1202   : > { %v7917_v48 = vmul.f32 %v7916_v47, %v7916_v47 }
0x1204   : > { %v7918_v51 = vsel %vm876_vm2, %v7917_v48, 0.0 }
0x1205   : > { %7919 = vadd.xlane.f32.xlu1 %v7918_v51 }
0x128e   : > { %v7920_v34 = vpop.xlane.xlu1 %7919 }
0x128f   : > { %v7921_v35 = vmul.f32 0.03125, %v7920_v34 }
0x1291   : > { %v7922_v39 = vadd.f32 1e-05, %v7921_v35 }
0x1293   : > { %17622 = vrsqrt.f32 %v7922_v39 }
0x12a0   : > { %v17623_v6 = vpop.eup %17622 }
0x12a1   : > { %v7924_v8 = vmul.f32 %v17623_v6, %v7916_v47 }
0x12a3   : > { %v7929_v10 = vmul.f32 %v7928_v4, %v7924_v8 }
0x12a5   : > { %v18892_v12 = vadd.f32 %v7933_v58, %v7929_v10 }
0x12a7   : > { %v7952_v16 = vsel %vm876_vm2, %v18892_v12, 0 }
0x12a8   : > { %v8023_v17 = vand.u32 4294901760, %v7952_v16 }
0x12aa   : > { %v8024_v20 = vsub.f32 %v7952_v16, %v8023_v17  ;;  %16867 = vmatmul.mubr.f32.vlgmr.msra.gmra.mxu1 %v8023_v17 }
0x12ab   : > { %16881 = vmatpush3.msra.mxu1 %v18833_v55  ;;  %16888 = vmatprep.mubr.msk.f32.mxu1 %vm17804_vm0, %v17803_v0 }
0x12ac   : > { %16882 = vmatprep.subr.mxu1 %v17803_v0  ;;  %v8025_v21 = vand.u32 4294901760, %v8024_v20 }
0x12ad   : > { %16883 = vmatpush3.msra.mxu1 %v18835_v56 }
0x12ae   : > { %16884 = vmatprep.subr.mxu1 %v17803_v0  ;;  %v8026_v11 = vsub.f32 %v8024_v20, %v8025_v21 }
0x12af   : > { %16885 = vmatpush3.msra.mxu1 %v18837_v60 }
0x12b0   : > { %16886 = vmatprep.subr.mxu1 %v17803_v0  ;;  %v8027_v52 = vand.u32 4294901760, %v8026_v11 }
0x12b1   : > { %16887 = vmatpush3.msra.mxu1 %v18842_v62 }
0x12b2   : > { %16889 = vmatmul.mubr.f32.vlgmr.msra.gmra.mxu1 %v8025_v21  ;;  %16902 = vmatprep.subr.mxu1 %v17803_v0 }
0x12b3   : > { %16856 = vmatmul.mubr.f32.vlgmr.msra.gmra.mxu0 %v8027_v52  ;;  %16903 = vmatpush3.msra.mxu1 %v18833_v55 }
0x12b4   : > { %16870 = vmatpush3.msra.mxu0 %v18845_v63  ;;  %16904 = vmatprep.subr.mxu1 %v17803_v0 }
0x12b5   : > { %16871 = vmatprep.subr.mxu0 %v17803_v0  ;;  %16905 = vmatpush3.msra.mxu1 %v18835_v56 }
0x12b6   : > { %16872 = vmatpush3.msra.mxu0 %v18848_v1  ;;  %16906 = vmatprep.subr.mxu1 %v17803_v0 }
0x12b7   : > { %16873 = vmatprep.subr.mxu0 %v17803_v0  ;;  %16907 = vmatpush3.msra.mxu1 %v18837_v60 }
0x12b8   : > { %16874 = vmatpush3.msra.mxu0 %v18851_v3  ;;  %16908 = vmatprep.subr.mxu1 %v17803_v0 }
0x12b9   : > { %16875 = vmatprep.subr.mxu0 %v17803_v0  ;;  %16877 = vmatprep.mubr.msk.f32.mxu0 %vm17804_vm0, %v17803_v0 }
0x12ba   : > { %16876 = vmatpush3.msra.mxu0 %v18855_v5  ;;  %16909 = vmatpush3.msra.mxu1 %v18842_v62 }
0x12bb   : > { %16910 = vmatprep.mubr.msk.f32.mxu1 %vm17804_vm0, %v17803_v0  ;;  %16878 = vmatmul.mubr.f32.vlgmr.msra.gmra.mxu0 %v8024_v20 }
0x12bc   : > { %16891 = vmatprep.subr.mxu0 %v17803_v0  ;;  %16911 = vmatmul.mubr.f32.vlgmr.msra.gmra.mxu1 %v8023_v17 }
0x12bd   : > { %16892 = vmatpush3.msra.mxu0 %v8060_v9  ;;  %16899 = vmatprep.mubr.msk.f32.mxu0 %vm17804_vm0, %v17803_v0 }
0x12be   : > { %16893 = vmatprep.subr.mxu0 %v17803_v0  ;;  %16918 = vmatprep.subr.mxu1 %v17803_v0 }
0x12bf   : > { %16894 = vmatpush3.msra.mxu0 %v8067_v13  ;;  %16920 = vmatprep.mubr.msk.f32.mxu1 %vm17804_vm0, %v17803_v0 }
0x12c0   : > { %16895 = vmatprep.subr.mxu0 %v17803_v0 }
0x12c1   : > { %16896 = vmatpush3.msra.mxu0 %v8074_v14 }
0x12c2   : > { %16897 = vmatprep.subr.mxu0 %v17803_v0 }
0x12c3   : > { %16898 = vmatpush3.msra.mxu0 %v8081_v18 }
0x12c4   : > { %16900 = vmatmul.mubr.f32.vlgmr.msra.gmra.mxu0 %v8023_v17  ;;  %16913 = vmatprep.subr.mxu0 %v17803_v0 }
0x12c5   : > { %16915 = vmatprep.mubr.msk.f32.mxu0 %vm17804_vm0, %v17803_v0 }
0x136a   : > { %v8120_v24 = vpop.f32.mrf.mxu1 }
0x136c   : > { %v16868_v25 = vpop.f32.mrf.mxu1 }
0x1372   : > { %v8277_v31 = vpop.f32.mrf.mxu1 }
0x1373   : > { %v8029_v32 = vpop.f32.mrf.mxu0 }
0x1374   : > { %v16890_v33 = vpop.f32.mrf.mxu1  ;;  %v8030_v38 = vadd.f32 %v8029_v32, %v7950_v36 }
0x1375   : > { %v16857_v37 = vpop.f32.mrf.mxu0 }
0x1376   : > { %v8121_v44 = vadd.f32 %v8120_v24, %v8030_v38 }
0x137b   : > { %v8200_v41 = vpop.f32.mrf.mxu0 }
0x137c   : > { %v8435_v42 = vpop.f32.mrf.mxu1  ;;  %v8201_v51 = vadd.f32 %v8200_v41, %v8121_v44 }
0x137d   : > { %v16879_v47 = vpop.f32.mrf.mxu0 }
0x137e   : > { %v16912_v48 = vpop.f32.mrf.mxu1  ;;  %v8278_v53 = vadd.f32 %v8277_v31, %v8201_v51 }
0x1384   : > { %v8360_v54 = vpop.f32.mrf.mxu0 }
0x1385   : > { %v8361_v57 = vadd.f32 %v8360_v54, %v8278_v53 }
0x1386   : > { %v16901_v55 = vpop.f32.mrf.mxu0 }
0x1387   : > { %v18945_v56 = vadd.f32 %v8435_v42, %v8361_v57 }
0x1389   : > { %8440 = vrot.lane.b32.xlu1 %v18945_v56, %s17806_s22  ;;  %v8442_v46 = vsel %vm1368_vm3, %v18945_v56, 0 }
0x138a   : > { %v8512_v60 = vand.u32 4294901760, %v8442_v46 }
0x138c   : > { %v8513_v61 = vsub.f32 %v8442_v46, %v8512_v60 }
0x138e   : > { %v8514_v62 = vand.u32 4294901760, %v8513_v61 }
0x1390   : > { %v8515_v3 = vsub.f32 %v8513_v61, %v8514_v62 }
0x1392   : > { %v8516_v13 = vand.u32 4294901760, %v8515_v3 }
0x13fb   : > { %v8441_v63 = vpop.permute.xlu1 %8440 }
0x13fc   : > { %v8444_v1 = vsel %vm1368_vm3, %v8441_v63, 0 }
0x13fd   : > { %v8477_v5 = vand.u32 4294901760, %v8444_v1 }
0x13ff   : > { %v8554_v9 = vsub.f32 %v8444_v1, %v8477_v5  ;;  %16914 = vmatpush3.xpose.msra.mxu0 %v8477_v5 }
0x1400   : > { %16923 = vmatprep.subr.mxu0 %v17803_v0 }
0x1401   : > { %v8555_v14 = vand.u32 4294901760, %v8554_v9 }
0x1402   : > { %16916 = vmatmul.mubr.f32.vlgmr.msra.gmra.mxu0 %v8516_v13 }
0x1403   : > { %v8556_v18 = vsub.f32 %v8554_v9, %v8555_v14  ;;  %16924 = vmatpush3.xpose.msra.mxu0 %v8554_v9  ;;  %16925 = vmatprep.mubr.msk.f32.mxu0 %vm17804_vm0, %v17803_v0 }
0x1404   : > { %16933 = vmatprep.subr.mxu0 %v17803_v0 }
0x1405   : > { %v8557_v29 = vand.u32 4294901760, %v8556_v18 }
0x1406   : > { %16926 = vmatmul.mubr.f32.vlgmr.msra.gmra.mxu0 %v8513_v61 }
0x1407   : > { %16919 = vmatpush3.xpose.msra.mxu1 %v8557_v29  ;;  %16934 = vmatpush3.xpose.msra.mxu0 %v8555_v14 }
0x1408   : > { %16935 = vmatprep.mubr.msk.f32.mxu0 %vm17804_vm0, %v17803_v0  ;;  %16928 = vmatprep.subr.mxu1 %v17803_v0 }
0x1409   : > { %16943 = vmatprep.subr.mxu0 %v17803_v0 }
0x140a   : > { %16921 = vmatmul.mubr.f32.vlgmr.msra.gmra.mxu1 %v8512_v60  ;;  %16936 = vmatmul.mubr.f32.vlgmr.msra.gmra.mxu0 %v8512_v60 }
0x140b   : > { %16929 = vmatpush3.xpose.msra.mxu1 %v8477_v5  ;;  %16930 = vmatprep.mubr.msk.f32.mxu1 %vm17804_vm0, %v17803_v0 }
0x140c   : > { %16938 = vmatprep.subr.mxu1 %v17803_v0  ;;  %16945 = vmatprep.mubr.msk.f32.mxu0 %vm17804_vm0, %v17803_v0 }
0x140e   : > { %16931 = vmatmul.mubr.f32.vlgmr.msra.gmra.mxu1 %v8514_v62 }
0x140f   : > { %16939 = vmatpush3.xpose.msra.mxu1 %v8477_v5  ;;  %16940 = vmatprep.mubr.msk.f32.mxu1 %vm17804_vm0, %v17803_v0 }
0x1410   : > { %16948 = vmatprep.subr.mxu1 %v17803_v0 }
0x1412   : > { %16941 = vmatmul.mubr.f32.vlgmr.msra.gmra.mxu1 %v8512_v60 }
0x1413   : > { %16950 = vmatprep.mubr.msk.f32.mxu1 %vm17804_vm0, %v17803_v0 }
0x14c2   : > { %v8518_v19 = vpop.f32.mrf.mxu0 }
0x14c4   : > { %v16917_v2 = vpop.f32.mrf.mxu0 }
0x14c6   : > { %v8668_v22 = vpop.f32.mrf.mxu0 }
0x14c8   : > { %v16927_v23 = vpop.f32.mrf.mxu0 }
0x14ca   : > { %v8594_v27 = vpop.f32.mrf.mxu1  ;;  %v8816_v28 = vpop.f32.mrf.mxu0 }
0x14cb   : > { %v8595_v30 = vadd.f32 %v8594_v27, %v8518_v19 }
0x14cc   : > { %v16922_v34 = vpop.f32.mrf.mxu1  ;;  %v16937_v35 = vpop.f32.mrf.mxu0 }
0x14cd   : > { %v8669_v39 = vadd.f32 %v8668_v22, %v8595_v30 }
0x14ce   : > { %v8742_v4 = vpop.f32.mrf.mxu1 }
0x14cf   : > { %v8743_v6 = vadd.f32 %v8742_v4, %v8669_v39 }
0x14d0   : > { %v16932_v8 = vpop.f32.mrf.mxu1 }
0x14d1   : > { %v8817_v58 = vadd.f32 %v8816_v28, %v8743_v6 }
0x14d2   : > { %v8888_v10 = vpop.f32.mrf.mxu1 }
0x14d3   : > { %v8889_v16 = vadd.f32 %v8888_v10, %v8817_v58 }
0x14d4   : > { %v16942_v17 = vpop.f32.mrf.mxu1 }
0x14d5   : > { %v8892_v20 = vsel %vm1368_vm3, %v8889_v16, -inf }
0x14d6   : > { %8893 = vmax.xlane.f32.xlu0 %v8892_v20 }
0x14ec   : > { %8903 = vrot.lane.b32.xlu0 %v18945_v56, %s17805_s30 }
0x14f0   : > { %9357 = vrot.lane.b32.xlu0 %v18945_v56, %s17807_s19 }
0x14f4   : > { %9355 = vrot.lane.b32.xlu0 %v18945_v56, %s17808_s12 }
0x155f   : > { %v8894_v21 = vpop.xlane.xlu0 %8893 }
0x1560   : > { %v8895_v11 = vsub.f32 %v8889_v16, %v8894_v21 }
0x1562   : > { %v8896_v52 = vmul.f32 1.442695, %v8895_v11 }
0x1563   : > { %v8904_v24 = vpop.permute.xlu0 %8903 }
0x1564   : > { %17624 = vpow2.f32 %v8896_v52  ;;  %v8940_v25 = vand.u32 4294901760, %v8904_v24 }
0x1566   : > { %v9017_v26 = vsub.f32 %v8904_v24, %v8940_v25  ;;  %16944 = vmatpush3.msra.mxu0 %v8940_v25 }
0x1567   : > { %16953 = vmatprep.subr.mxu0 %v17803_v0  ;;  %v9358_v41 = vpop.permute.xlu0 %9357 }
0x1568   : > { %v9018_v31 = vand.u32 4294901760, %v9017_v26  ;;  %v9361_v42 = vsel %vm1368_vm3, %v9358_v41, 0 }
0x1569   : > { %v9394_v44 = vand.u32 4294901760, %v9361_v42 }
0x156a   : > { %v9019_v32 = vsub.f32 %v9017_v26, %v9018_v31 }
0x156b   : > { %v9471_v48 = vsub.f32 %v9361_v42, %v9394_v44  ;;  %v9356_v53 = vpop.permute.xlu0 %9355 }
0x156c   : > { %v9020_v33 = vand.u32 4294901760, %v9019_v32  ;;  %v9359_v46 = vsel %vm1368_vm3, %v9356_v53, 0 }
0x156d   : > { %v9472_v55 = vand.u32 4294901760, %v9471_v48  ;;  %v9429_v61 = vand.u32 4294901760, %v9359_v46 }
0x156e   : > { %16949 = vmatpush3.msra.mxu1 %v9020_v33 }
0x156f   : > { %16958 = vmatprep.subr.mxu1 %v17803_v0  ;;  %v9473_v63 = vsub.f32 %v9471_v48, %v9472_v55  ;;  %v9430_v3 = vsub.f32 %v9359_v46, %v9429_v61 }
0x1571   : > { %v17625_v36 = vpop.eup %17624  ;;  %v9474_v9 = vand.u32 4294901760, %v9473_v63  ;;  %v9431_v13 = vand.u32 4294901760, %v9430_v3 }
0x1572   : > { %v8898_v37 = vsel %vm1368_vm3, %v17625_v36, 0.0 }
0x1573   : > { %8899 = vadd.xlane.f32.xlu1 %v8898_v37  ;;  %v9432_v14 = vsub.f32 %v9430_v3, %v9431_v13 }
0x1575   : > { %v9433_v18 = vand.u32 4294901760, %v9432_v14 }
0x15fc   : > { %v8900_v38 = vpop.xlane.xlu1 %8899 }
0x15fd   : > { %17626 = vrcp.f32 %v8900_v38 }
0x160a   : > { %v17627_v47 = vpop.eup %17626 }
0x160b   : > { %v8902_v51 = vmul.f32 %v17627_v47, %v17625_v36 }
0x160d   : > { %v8907_v54 = vsel %vm1368_vm3, %v8902_v51, 0 }
0x160e   : > { %v8975_v57 = vand.u32 4294901760, %v8907_v54 }
0x1610   : > { %v8976_v60 = vsub.f32 %v8907_v54, %v8975_v57  ;;  %16951 = vmatmul.mubr.f32.vlgmr.msra.gmra.mxu1 %v8975_v57 }
0x1611   : > { %16959 = vmatpush3.msra.mxu1 %v8940_v25  ;;  %16960 = vmatprep.mubr.msk.f32.mxu1 %vm17804_vm0, %v17803_v0 }
0x1612   : > { %16968 = vmatprep.subr.mxu1 %v17803_v0  ;;  %v8977_v62 = vand.u32 4294901760, %v8976_v60 }
0x1614   : > { %16961 = vmatmul.mubr.f32.vlgmr.msra.gmra.mxu1 %v8977_v62  ;;  %v8978_v1 = vsub.f32 %v8976_v60, %v8977_v62 }
0x1615   : > { %16969 = vmatpush3.msra.mxu1 %v8940_v25  ;;  %16970 = vmatprep.mubr.msk.f32.mxu1 %vm17804_vm0, %v17803_v0 }
0x1616   : > { %16978 = vmatprep.subr.mxu1 %v17803_v0  ;;  %v8979_v5 = vand.u32 4294901760, %v8978_v1 }
0x1618   : > { %16946 = vmatmul.mubr.f32.vlgmr.msra.gmra.mxu0 %v8979_v5  ;;  %16971 = vmatmul.mubr.f32.vlgmr.msra.gmra.mxu1 %v8975_v57 }
0x1619   : > { %16954 = vmatpush3.msra.mxu0 %v9017_v26  ;;  %16979 = vmatpush3.xpose.msra.mxu1 %v9474_v9 }
0x161a   : > { %16955 = vmatprep.mubr.msk.f32.mxu0 %vm17804_vm0, %v17803_v0  ;;  %16963 = vmatprep.subr.mxu0 %v17803_v0 }
0x161b   : > { %16980 = vmatprep.mubr.msk.f32.mxu1 %vm17804_vm0, %v17803_v0  ;;  %16988 = vmatprep.subr.mxu1 %v17803_v0 }
0x161c   : > { %16956 = vmatmul.mubr.f32.vlgmr.msra.gmra.mxu0 %v8976_v60  ;;  %16981 = vmatmul.mubr.f32.vlgmr.msra.gmra.mxu1 %v9429_v61 }
0x161d   : > { %16964 = vmatpush3.msra.mxu0 %v9018_v31  ;;  %16989 = vmatpush3.xpose.msra.mxu1 %v9394_v44 }
0x161e   : > { %16965 = vmatprep.mubr.msk.f32.mxu0 %vm17804_vm0, %v17803_v0  ;;  %16973 = vmatprep.subr.mxu0 %v17803_v0 }
0x161f   : > { %16990 = vmatprep.mubr.msk.f32.mxu1 %vm17804_vm0, %v17803_v0  ;;  %16998 = vmatprep.subr.mxu1 %v17803_v0 }
0x1620   : > { %16966 = vmatmul.mubr.f32.vlgmr.msra.gmra.mxu0 %v8975_v57  ;;  %16991 = vmatmul.mubr.f32.vlgmr.msra.gmra.mxu1 %v9431_v13 }
0x1621   : > { %16974 = vmatpush3.xpose.msra.mxu0 %v9394_v44  ;;  %16999 = vmatpush3.xpose.msra.mxu1 %v9394_v44 }
0x1622   : > { %16975 = vmatprep.mubr.msk.f32.mxu0 %vm17804_vm0, %v17803_v0  ;;  %16983 = vmatprep.subr.mxu0 %v17803_v0 }
0x1623   : > { %17000 = vmatprep.mubr.msk.f32.mxu1 %vm17804_vm0, %v17803_v0  ;;  %17008 = vmatprep.subr.mxu1 %v17803_v0 }
0x1624   : > { %16976 = vmatmul.mubr.f32.vlgmr.msra.gmra.mxu0 %v9433_v18  ;;  %17001 = vmatmul.mubr.f32.vlgmr.msra.gmra.mxu1 %v9429_v61 }
0x1625   : > { %16984 = vmatpush3.xpose.msra.mxu0 %v9471_v48  ;;  %16985 = vmatprep.mubr.msk.f32.mxu0 %vm17804_vm0, %v17803_v0 }
0x1626   : > { %16993 = vmatprep.subr.mxu0 %v17803_v0  ;;  %17010 = vmatprep.mubr.msk.f32.mxu1 %vm17804_vm0, %v17803_v0 }
0x1628   : > { %16986 = vmatmul.mubr.f32.vlgmr.msra.gmra.mxu0 %v9430_v3 }
0x1629   : > { %16994 = vmatpush3.xpose.msra.mxu0 %v9472_v55  ;;  %16995 = vmatprep.mubr.msk.f32.mxu0 %vm17804_vm0, %v17803_v0 }
0x162a   : > { %17003 = vmatprep.subr.mxu0 %v17803_v0 }
0x162c   : > { %16996 = vmatmul.mubr.f32.vlgmr.msra.gmra.mxu0 %v9429_v61 }
0x162d   : > { %17005 = vmatprep.mubr.msk.f32.mxu0 %vm17804_vm0, %v17803_v0 }
0x16d0   : > { %v9057_v29 = vpop.f32.mrf.mxu1 }
0x16d2   : > { %v16952_v19 = vpop.f32.mrf.mxu1 }
0x16d4   : > { %v9205_v2 = vpop.f32.mrf.mxu1 }
0x16d6   : > { %v16962_v22 = vpop.f32.mrf.mxu1 }
0x16d8   : > { %v8981_v23 = vpop.f32.mrf.mxu0  ;;  %v9351_v27 = vpop.f32.mrf.mxu1 }
0x16d9   : > { %v9058_v28 = vadd.f32 %v9057_v29, %v8981_v23 }
0x16da   : > { %v16947_v30 = vpop.f32.mrf.mxu0  ;;  %v16972_v34 = vpop.f32.mrf.mxu1 }
0x16dc   : > { %v9131_v35 = vpop.f32.mrf.mxu0  ;;  %v9511_v39 = vpop.f32.mrf.mxu1 }
0x16dd   : > { %v9132_v4 = vadd.f32 %v9131_v35, %v9058_v28 }
0x16de   : > { %v16957_v6 = vpop.f32.mrf.mxu0  ;;  %v16982_v8 = vpop.f32.mrf.mxu1 }
0x16df   : > { %v9206_v58 = vadd.f32 %v9205_v2, %v9132_v4  ;;  %v15614_v2 = vld [vmem:[%s19729_s3 + $0x28] sm:$0xff] }
0x16e0   : > { %v9279_v10 = vpop.f32.mrf.mxu0  ;;  %v9659_v16 = vpop.f32.mrf.mxu1  ;;  %v10306_v22 = vand.u32 4294901760, %v15614_v2 }
0x16e1   : > { %v9280_v17 = vadd.f32 %v9279_v10, %v9206_v58 }
0x16e2   : > { %v16967_v20 = vpop.f32.mrf.mxu0  ;;  %v16992_v21 = vpop.f32.mrf.mxu1  ;;  %v19049_v23 = vsub.f32 %v15614_v2, %v10306_v22 }
0x16e3   : > { %v19017_v11 = vadd.f32 %v9351_v27, %v9280_v17  ;;  %v15613_v17 = vld [vmem:[%s19729_s3 + $0x20] sm:$0xff] }
0x16e4   : > { %v9435_v52 = vpop.f32.mrf.mxu0  ;;  %v9805_v24 = vpop.f32.mrf.mxu1  ;;  %v10384_v27 = vand.u32 4294901760, %v19049_v23 }
0x16e5   : > { %v9512_v31 = vadd.f32 %v9511_v39, %v9435_v52 }
0x16e6   : > { %v16977_v25 = vpop.f32.mrf.mxu0  ;;  %v17002_v26 = vpop.f32.mrf.mxu1  ;;  %v10385_v28 = vsub.f32 %v19049_v23, %v10384_v27 }
0x16e8   : > { %v9585_v32 = vpop.f32.mrf.mxu0  ;;  %v10386_v30 = vand.u32 4294901760, %v10385_v28 }
0x16e9   : > { %v9586_v33 = vadd.f32 %v9585_v32, %v9512_v31 }
0x16ea   : > { %v16987_v36 = vpop.f32.mrf.mxu0 }
0x16eb   : > { %v9660_v37 = vadd.f32 %v9659_v16, %v9586_v33 }
0x16ec   : > { %v9733_v38 = vpop.f32.mrf.mxu0 }
0x16ed   : > { %v9734_v41 = vadd.f32 %v9733_v38, %v9660_v37 }
0x16ee   : > { %v16997_v42 = vpop.f32.mrf.mxu0 }
0x16ef   : > { %v9806_v44 = vadd.f32 %v9805_v24, %v9734_v41  ;;  %v10755_v24 = vand.u32 4294901760, %v15613_v17 }
0x16f1   : > { %v9809_v47 = vsel %vm1368_vm3, %v9806_v44, -inf  ;;  %v19058_v33 = vsub.f32 %v15613_v17, %v10755_v24 }
0x16f2   : > { %9810 = vmax.xlane.f32.xlu0 %v9809_v47 }
0x16f3   : > { %v10833_v42 = vand.u32 4294901760, %v19058_v33 }
0x177b   : > { %v9811_v48 = vpop.xlane.xlu0 %9810 }
0x177c   : > { %v9812_v51 = vsub.f32 %v9806_v44, %v9811_v48  ;;  %v10722_v44 = vsel %vm1368_vm3, %v19017_v11, 0 }
0x177e   : > { %v9813_v53 = vmul.f32 1.442695, %v9812_v51  ;;  %v19067_v51 = vand.u32 4294901760, %v10722_v44 }
0x1780   : > { %17628 = vpow2.f32 %v9813_v53 }
0x178d   : > { %v17629_v54 = vpop.eup %17628 }
0x178e   : > { %v9815_v57 = vsel %vm1368_vm3, %v17629_v54, 0.0 }
0x178f   : > { %9816 = vadd.xlane.f32.xlu1 %v9815_v57 }
0x17a0   : > { %9820 = vrot.lane.b32.xlu1 %v18945_v56, %s17809_s21  ;;  %s19752_s21 = smov 72  }
0x17a4   : > { %11172 = vrot.lane.b32.xlu1 %v18945_v56, %s17810_s23  ;;  %s19753_s23 = smov 104  }
0x17a8   : > { %11170 = vrot.lane.b32.xlu1 %v18945_v56, %s17811_s14 }
0x1818   : > { %v9817_v55 = vpop.xlane.xlu1 %9816 }
0x1819   : > { %17630 = vrcp.f32 %v9817_v55  ;;  %v10791_v55 = vsub.f32 %v10722_v44, %v19067_v51 }
0x181c   : > { %v9821_v46 = vpop.permute.xlu1 %9820 }
0x181d   : > { %v9857_v60 = vand.u32 4294901760, %v9821_v46 }
0x181f   : > { %v9934_v61 = vsub.f32 %v9821_v46, %v9857_v60  ;;  %17004 = vmatpush3.msra.mxu0 %v9857_v60 }
0x1820   : > { %17013 = vmatprep.subr.mxu0 %v17803_v0  ;;  %v11173_v37 = vpop.permute.xlu1 %11172 }
0x1821   : > { %v9935_v62 = vand.u32 4294901760, %v9934_v61  ;;  %v11176_v47 = vsel %vm1368_vm3, %v11173_v37, 0 }
0x1822   : > { %v19073_v57 = vand.u32 4294901760, %v11176_v47 }
0x1823   : > { %v9936_v63 = vsub.f32 %v9934_v61, %v9935_v62 }
0x1825   : > { %v9937_v1 = vand.u32 4294901760, %v9936_v63  ;;  %v10792_v63 = vand.u32 4294901760, %v10791_v55 }
0x1826   : > { %v17631_v3 = vpop.eup %17630 }
0x1827   : > { %v9819_v5 = vmul.f32 %v17631_v3, %v17629_v54  ;;  %17009 = vmatpush3.msra.mxu1 %v9937_v1  ;;  %v10834_v54 = vsub.f32 %v19058_v33, %v10833_v42 }
0x1828   : > { %17018 = vmatprep.subr.mxu1 %v17803_v0 }
0x1829   : > { %v9824_v9 = vsel %vm1368_vm3, %v9819_v5, 0  ;;  %v10793_v5 = vsub.f32 %v10791_v55, %v10792_v63 }
0x182a   : > { %v9892_v13 = vand.u32 4294901760, %v9824_v9 }
0x182c   : > { %v9893_v14 = vsub.f32 %v9824_v9, %v9892_v13  ;;  %17011 = vmatmul.mubr.f32.vlgmr.msra.gmra.mxu1 %v9892_v13 }
0x182d   : > { %17019 = vmatpush3.msra.mxu1 %v9857_v60  ;;  %17020 = vmatprep.mubr.msk.f32.mxu1 %vm17804_vm0, %v17803_v0 }
0x182e   : > { %17028 = vmatprep.subr.mxu1 %v17803_v0  ;;  %v9894_v18 = vand.u32 4294901760, %v9893_v14 }
0x1830   : > { %17021 = vmatmul.mubr.f32.vlgmr.msra.gmra.mxu1 %v9894_v18  ;;  %v9895_v29 = vsub.f32 %v9893_v14, %v9894_v18 }
0x1831   : > { %17029 = vmatpush3.msra.mxu1 %v9857_v60  ;;  %17030 = vmatprep.mubr.msk.f32.mxu1 %vm17804_vm0, %v17803_v0  ;;  %v10835_v60 = vand.u32 4294901760, %v10834_v54 }
0x1832   : > { %v9896_v19 = vand.u32 4294901760, %v9895_v29  ;;  %17038 = vmatprep.subr.mxu1 %v17803_v0 }
0x1834   : > { %17006 = vmatmul.mubr.f32.vlgmr.msra.gmra.mxu0 %v9896_v19  ;;  %17031 = vmatmul.mubr.f32.vlgmr.msra.gmra.mxu1 %v9892_v13 }
0x1835   : > { %17014 = vmatpush3.msra.mxu0 %v9934_v61  ;;  %17015 = vmatprep.mubr.msk.f32.mxu0 %vm17804_vm0, %v17803_v0  ;;  %v19080_v61 = vsub.f32 %v11176_v47, %v19073_v57 }
0x1836   : > { %17023 = vmatprep.subr.mxu0 %v17803_v0  ;;  %17040 = vmatprep.mubr.msk.f32.mxu1 %vm17804_vm0, %v17803_v0 }
0x1837   : > { %17039 = vmatpush3.msra.mxu1 %v10386_v30  ;;  %v11287_v1 = vand.u32 4294901760, %v19080_v61 }
0x1838   : > { %17016 = vmatmul.mubr.f32.vlgmr.msra.gmra.mxu0 %v9893_v14  ;;  %17048 = vmatprep.subr.mxu1 %v17803_v0  ;;  %v10794_v14 = vand.u32 4294901760, %v10793_v5 }
0x1839   : > { %17024 = vmatpush3.msra.mxu0 %v9935_v62  ;;  %17025 = vmatprep.mubr.msk.f32.mxu0 %vm17804_vm0, %v17803_v0  ;;  %v11171_v62 = vpop.permute.xlu1 %11170 }
0x183a   : > { %17033 = vmatprep.subr.mxu0 %v17803_v0  ;;  %v11174_v3 = vsel %vm1368_vm3, %v11171_v62, 0 }
0x183b   : > { %v11244_v9 = vand.u32 4294901760, %v11174_v3 }
0x183c   : > { %17026 = vmatmul.mubr.f32.vlgmr.msra.gmra.mxu0 %v9892_v13  ;;  %v11288_v13 = vsub.f32 %v19080_v61, %v11287_v1 }
0x183d   : > { %17035 = vmatprep.mubr.msk.f32.mxu0 %vm17804_vm0, %v17803_v0  ;;  %17034 = vmatpush3.msra.mxu0 %v10306_v22  ;;  %v11245_v18 = vsub.f32 %v11174_v3, %v11244_v9 }
0x183e   : > { %17043 = vmatprep.subr.mxu0 %v17803_v0  ;;  %v11289_v29 = vand.u32 4294901760, %v11288_v13 }
0x183f   : > { %v11246_v19 = vand.u32 4294901760, %v11245_v18 }
0x1841   : > { %v11247_v2 = vsub.f32 %v11245_v18, %v11246_v19 }
0x18ec   : > { %v9974_v34 = vpop.f32.mrf.mxu1 }
0x18ee   : > { %v17012_v35 = vpop.f32.mrf.mxu1 }
0x18f0   : > { %v10122_v39 = vpop.f32.mrf.mxu1 }
0x18f2   : > { %v17022_v4 = vpop.f32.mrf.mxu1 }
0x18f4   : > { %v9898_v6 = vpop.f32.mrf.mxu0  ;;  %v10268_v8 = vpop.f32.mrf.mxu1 }
0x18f5   : > { %v9975_v16 = vadd.f32 %v9974_v34, %v9898_v6 }
0x18f6   : > { %v17007_v58 = vpop.f32.mrf.mxu0  ;;  %v17032_v10 = vpop.f32.mrf.mxu1 }
0x18f8   : > { %v10048_v20 = vpop.f32.mrf.mxu0 }
0x18f9   : > { %v10049_v21 = vadd.f32 %v10048_v20, %v9975_v16 }
0x18fa   : > { %v17017_v52 = vpop.f32.mrf.mxu0 }
0x18fb   : > { %v10123_v25 = vadd.f32 %v10122_v39, %v10049_v21 }
0x18fc   : > { %v10196_v26 = vpop.f32.mrf.mxu0 }
0x18fd   : > { %v10197_v31 = vadd.f32 %v10196_v26, %v10123_v25 }
0x18fe   : > { %v17027_v32 = vpop.f32.mrf.mxu0 }
0x18ff   : > { %v10269_v36 = vadd.f32 %v10268_v8, %v10197_v31 }
0x1901   : > { %v10273_v38 = vsel %vm1368_vm3, %v10269_v36, 0 }
0x1902   : > { %v10341_v41 = vand.u32 4294901760, %v10273_v38 }
0x1904   : > { %v10342_v48 = vsub.f32 %v10273_v38, %v10341_v41  ;;  %17041 = vmatmul.mubr.f32.vlgmr.msra.gmra.mxu1 %v10341_v41 }
0x1905   : > { %17049 = vmatpush3.msra.mxu1 %v10306_v22  ;;  %17050 = vmatprep.mubr.msk.f32.mxu1 %vm17804_vm0, %v17803_v0 }
0x1906   : > { %v10343_v53 = vand.u32 4294901760, %v10342_v48  ;;  %17058 = vmatprep.subr.mxu1 %v17803_v0 }
0x1908   : > { %v10344_v11 = vsub.f32 %v10342_v48, %v10343_v53  ;;  %17051 = vmatmul.mubr.f32.vlgmr.msra.gmra.mxu1 %v10343_v53 }
0x1909   : > { %17059 = vmatpush3.msra.mxu1 %v10306_v22  ;;  %17060 = vmatprep.mubr.msk.f32.mxu1 %vm17804_vm0, %v17803_v0  ;;  %v11248_v22 = vand.u32 4294901760, %v11247_v2 }
0x190a   : > { %v10345_v46 = vand.u32 4294901760, %v10344_v11  ;;  %17068 = vmatprep.subr.mxu1 %v17803_v0 }
0x190c   : > { %17036 = vmatmul.mubr.f32.vlgmr.msra.gmra.mxu0 %v10345_v46  ;;  %17061 = vmatmul.mubr.f32.vlgmr.msra.gmra.mxu1 %v10341_v41 }
0x190d   : > { %17044 = vmatpush3.msra.mxu0 %v19049_v23  ;;  %17045 = vmatprep.mubr.msk.f32.mxu0 %vm17804_vm0, %v17803_v0 }
0x190e   : > { %17069 = vmatpush3.msra.mxu1 %v10835_v60  ;;  %17070 = vmatprep.mubr.msk.f32.mxu1 %vm17804_vm0, %v17803_v0 }
0x190f   : > { %17053 = vmatprep.subr.mxu0 %v17803_v0  ;;  %17078 = vmatprep.subr.mxu1 %v17803_v0 }
0x1910   : > { %17046 = vmatmul.mubr.f32.vlgmr.msra.gmra.mxu0 %v10342_v48  ;;  %17071 = vmatmul.mubr.f32.vlgmr.msra.gmra.mxu1 %v19067_v51 }
0x1911   : > { %17054 = vmatpush3.msra.mxu0 %v10384_v27  ;;  %17055 = vmatprep.mubr.msk.f32.mxu0 %vm17804_vm0, %v17803_v0 }
0x1912   : > { %17079 = vmatpush3.msra.mxu1 %v10755_v24  ;;  %17080 = vmatprep.mubr.msk.f32.mxu1 %vm17804_vm0, %v17803_v0 }
0x1913   : > { %17063 = vmatprep.subr.mxu0 %v17803_v0  ;;  %17088 = vmatprep.subr.mxu1 %v17803_v0 }
0x1914   : > { %17056 = vmatmul.mubr.f32.vlgmr.msra.gmra.mxu0 %v10341_v41  ;;  %17081 = vmatmul.mubr.f32.vlgmr.msra.gmra.mxu1 %v10792_v63 }
0x1915   : > { %17064 = vmatpush3.msra.mxu0 %v10755_v24  ;;  %17089 = vmatpush3.msra.mxu1 %v10755_v24 }
0x1916   : > { %17065 = vmatprep.mubr.msk.f32.mxu0 %vm17804_vm0, %v17803_v0  ;;  %17090 = vmatprep.mubr.msk.f32.mxu1 %vm17804_vm0, %v17803_v0 }
0x1917   : > { %17098 = vmatprep.subr.mxu1 %v17803_v0  ;;  %17073 = vmatprep.subr.mxu0 %v17803_v0 }
0x1918   : > { %17066 = vmatmul.mubr.f32.vlgmr.msra.gmra.mxu0 %v10794_v14  ;;  %17091 = vmatmul.mubr.f32.vlgmr.msra.gmra.mxu1 %v19067_v51 }
0x1919   : > { %17099 = vmatpush3.xpose.msra.mxu1 %v11289_v29  ;;  %17074 = vmatpush3.msra.mxu0 %v19058_v33 }
0x191a   : > { %17075 = vmatprep.mubr.msk.f32.mxu0 %vm17804_vm0, %v17803_v0  ;;  %17100 = vmatprep.mubr.msk.f32.mxu1 %vm17804_vm0, %v17803_v0 }
0x191b   : > { %17108 = vmatprep.subr.mxu1 %v17803_v0  ;;  %17083 = vmatprep.subr.mxu0 %v17803_v0 }
0x191c   : > { %17076 = vmatmul.mubr.f32.vlgmr.msra.gmra.mxu0 %v10791_v55  ;;  %17101 = vmatmul.mubr.f32.vlgmr.msra.gmra.mxu1 %v11244_v9 }
0x191d   : > { %17109 = vmatpush3.xpose.msra.mxu1 %v19073_v57  ;;  %17084 = vmatpush3.msra.mxu0 %v10833_v42 }
0x191e   : > { %17085 = vmatprep.mubr.msk.f32.mxu0 %vm17804_vm0, %v17803_v0  ;;  %17093 = vmatprep.subr.mxu0 %v17803_v0 }
0x191f   : > { %17110 = vmatprep.mubr.msk.f32.mxu1 %vm17804_vm0, %v17803_v0  ;;  %17118 = vmatprep.subr.mxu1 %v17803_v0 }
0x1920   : > { %17086 = vmatmul.mubr.f32.vlgmr.msra.gmra.mxu0 %v19067_v51  ;;  %17111 = vmatmul.mubr.f32.vlgmr.msra.gmra.mxu1 %v11246_v19 }
0x1921   : > { %17094 = vmatpush3.xpose.msra.mxu0 %v19073_v57  ;;  %17119 = vmatpush3.xpose.msra.mxu1 %v19073_v57 }
0x1922   : > { %17095 = vmatprep.mubr.msk.f32.mxu0 %vm17804_vm0, %v17803_v0  ;;  %17103 = vmatprep.subr.mxu0 %v17803_v0 }
0x1923   : > { %17120 = vmatprep.mubr.msk.f32.mxu1 %vm17804_vm0, %v17803_v0  ;;  %17128 = vmatprep.subr.mxu1 %v17803_v0 }
0x1924   : > { %17096 = vmatmul.mubr.f32.vlgmr.msra.gmra.mxu0 %v11248_v22  ;;  %17121 = vmatmul.mubr.f32.vlgmr.msra.gmra.mxu1 %v11244_v9 }
0x1925   : > { %17104 = vmatpush3.xpose.msra.mxu0 %v19080_v61  ;;  %17105 = vmatprep.mubr.msk.f32.mxu0 %vm17804_vm0, %v17803_v0 }
0x1926   : > { %17113 = vmatprep.subr.mxu0 %v17803_v0  ;;  %17130 = vmatprep.mubr.msk.f32.mxu1 %vm17804_vm0, %v17803_v0 }
0x1928   : > { %17106 = vmatmul.mubr.f32.vlgmr.msra.gmra.mxu0 %v11245_v18 }
0x1929   : > { %17114 = vmatpush3.xpose.msra.mxu0 %v11287_v1  ;;  %17115 = vmatprep.mubr.msk.f32.mxu0 %vm17804_vm0, %v17803_v0 }
0x192a   : > { %17123 = vmatprep.subr.mxu0 %v17803_v0 }
0x192c   : > { %17116 = vmatmul.mubr.f32.vlgmr.msra.gmra.mxu0 %v11244_v9 }
0x192d   : > { %17125 = vmatprep.mubr.msk.f32.mxu0 %vm17804_vm0, %v17803_v0 }
0x19c4   : > { %v10423_v23 = vpop.f32.mrf.mxu1 }
0x19c6   : > { %v17042_v27 = vpop.f32.mrf.mxu1 }
0x19c8   : > { %v10571_v28 = vpop.f32.mrf.mxu1 }
0x19ca   : > { %v17052_v30 = vpop.f32.mrf.mxu1 }
0x19cc   : > { %v10347_v34 = vpop.f32.mrf.mxu0  ;;  %v10717_v35 = vpop.f32.mrf.mxu1 }
0x19cd   : > { %v10424_v39 = vadd.f32 %v10423_v23, %v10347_v34 }
0x19ce   : > { %v17037_v4 = vpop.f32.mrf.mxu0  ;;  %v17062_v6 = vpop.f32.mrf.mxu1 }
0x19d0   : > { %v10497_v8 = vpop.f32.mrf.mxu0  ;;  %v10872_v58 = vpop.f32.mrf.mxu1 }
0x19d1   : > { %v10498_v10 = vadd.f32 %v10497_v8, %v10424_v39 }
0x19d2   : > { %v17047_v16 = vpop.f32.mrf.mxu0  ;;  %v17072_v17 = vpop.f32.mrf.mxu1 }
0x19d3   : > { %v10572_v20 = vadd.f32 %v10571_v28, %v10498_v10 }
0x19d4   : > { %v10645_v21 = vpop.f32.mrf.mxu0  ;;  %v11020_v52 = vpop.f32.mrf.mxu1 }
0x19d5   : > { %v10646_v24 = vadd.f32 %v10645_v21, %v10572_v20 }
0x19d6   : > { %v17057_v25 = vpop.f32.mrf.mxu0  ;;  %v17082_v26 = vpop.f32.mrf.mxu1 }
0x19d7   : > { %v10718_v31 = vadd.f32 %v10717_v35, %v10646_v24 }
0x19d8   : > { %v10796_v32 = vpop.f32.mrf.mxu0  ;;  %v11166_v33 = vpop.f32.mrf.mxu1 }
0x19d9   : > { %v10797_v36 = vadd.f32 %v10796_v32, %v10718_v31  ;;  %v15615_v31 = vld [vmem:[%s19729_s3 + $0x30] sm:$0xff] }
0x19da   : > { %v17067_v37 = vpop.f32.mrf.mxu0  ;;  %v17092_v38 = vpop.f32.mrf.mxu1  ;;  %v12121_v32 = vand.u32 4294901760, %v15615_v31 }
0x19db   : > { %v10873_v41 = vadd.f32 %v10872_v58, %v10797_v36 }
0x19dc   : > { %v10946_v42 = vpop.f32.mrf.mxu0  ;;  %v11326_v44 = vpop.f32.mrf.mxu1 }
0x19dd   : > { %v10947_v47 = vadd.f32 %v10946_v42, %v10873_v41 }
0x19de   : > { %v17077_v48 = vpop.f32.mrf.mxu0  ;;  %v17102_v51 = vpop.f32.mrf.mxu1 }
0x19df   : > { %v11021_v53 = vadd.f32 %v11020_v52, %v10947_v47 }
0x19e0   : > { %v11094_v54 = vpop.f32.mrf.mxu0  ;;  %v11474_v57 = vpop.f32.mrf.mxu1 }
0x19e1   : > { %v11095_v11 = vadd.f32 %v11094_v54, %v11021_v53 }
0x19e2   : > { %v17087_v55 = vpop.f32.mrf.mxu0  ;;  %v17112_v46 = vpop.f32.mrf.mxu1 }
0x19e3   : > { %v19142_v60 = vadd.f32 %v11166_v33, %v11095_v11  ;;  %v12198_v33 = vsub.f32 %v15615_v31, %v12121_v32 }
0x19e4   : > { %v11250_v61 = vpop.f32.mrf.mxu0  ;;  %v11620_v62 = vpop.f32.mrf.mxu1 }
0x19e5   : > { %v11327_v3 = vadd.f32 %v11326_v44, %v11250_v61  ;;  %v12199_v36 = vand.u32 4294901760, %v12198_v33 }
0x19e6   : > { %v17097_v63 = vpop.f32.mrf.mxu0  ;;  %v17122_v1 = vpop.f32.mrf.mxu1 }
0x19e7   : > { %v12200_v37 = vsub.f32 %v12198_v33, %v12199_v36 }
0x19e8   : > { %v11400_v5 = vpop.f32.mrf.mxu0 }
0x19e9   : > { %v11401_v9 = vadd.f32 %v11400_v5, %v11327_v3  ;;  %v12201_v38 = vand.u32 4294901760, %v12200_v37 }
0x19ea   : > { %v17107_v13 = vpop.f32.mrf.mxu0 }
0x19eb   : > { %v11475_v14 = vadd.f32 %v11474_v57, %v11401_v9 }
0x19ec   : > { %v11548_v18 = vpop.f32.mrf.mxu0 }
0x19ed   : > { %v11549_v29 = vadd.f32 %v11548_v18, %v11475_v14 }
0x19ee   : > { %v17117_v19 = vpop.f32.mrf.mxu0 }
0x19ef   : > { %v11621_v2 = vadd.f32 %v11620_v62, %v11549_v29 }
0x19f1   : > { %v11624_v22 = vsel %vm1368_vm3, %v11621_v2, -inf }
0x19f2   : > { %11625 = vmax.xlane.f32.xlu0 %v11624_v22 }
0x1a08   : > { %11635 = vrot.lane.b32.xlu0 %v18945_v56, %s17812_s17 }
0x1a0c   : > { %12539 = vrot.lane.b32.xlu0 %v18945_v56, %s19752_s21 }
0x1a10   : > { %12537 = vrot.lane.b32.xlu0 %v18945_v56, %s19753_s23  ;;  %s15612_s23 = sshll.u32 %s19760_s13, 3 }
0x1a7b   : > { %v11626_v23 = vpop.xlane.xlu0 %11625 }
0x1a7c   : > { %v11627_v27 = vsub.f32 %v11621_v2, %v11626_v23 }
0x1a7e   : > { %v11628_v28 = vmul.f32 1.442695, %v11627_v27 }
0x1a7f   : > { %v11636_v30 = vpop.permute.xlu0 %11635 }
0x1a80   : > { %17632 = vpow2.f32 %v11628_v28  ;;  %v11672_v34 = vand.u32 4294901760, %v11636_v30 }
0x1a82   : > { %v11749_v35 = vsub.f32 %v11636_v30, %v11672_v34  ;;  %17124 = vmatpush3.msra.mxu0 %v11672_v34 }
0x1a83   : > { %17133 = vmatprep.subr.mxu0 %v17803_v0  ;;  %v12540_v53 = vpop.permute.xlu0 %12539 }
0x1a84   : > { %v11750_v39 = vand.u32 4294901760, %v11749_v35  ;;  %v12543_v55 = vsel %vm1368_vm3, %v12540_v53, 0 }
0x1a85   : > { %v12576_v63 = vand.u32 4294901760, %v12543_v55 }
0x1a86   : > { %v11751_v4 = vsub.f32 %v11749_v35, %v11750_v39 }
0x1a87   : > { %v12653_v13 = vsub.f32 %v12543_v55, %v12576_v63  ;;  %v12538_v18 = vpop.permute.xlu0 %12537 }
0x1a88   : > { %v11752_v6 = vand.u32 4294901760, %v11751_v4  ;;  %v12541_v22 = vsel %vm1368_vm3, %v12538_v18, 0 }
0x1a89   : > { %v12654_v2 = vand.u32 4294901760, %v12653_v13  ;;  %v12611_v27 = vand.u32 4294901760, %v12541_v22 }
0x1a8a   : > { %17129 = vmatpush3.msra.mxu1 %v11752_v6 }
0x1a8b   : > { %17138 = vmatprep.subr.mxu1 %v17803_v0  ;;  %v12655_v30 = vsub.f32 %v12653_v13, %v12654_v2 }
0x1a8d   : > { %v17633_v8 = vpop.eup %17632  ;;  %v12656_v4 = vand.u32 4294901760, %v12655_v30 }
0x1a8e   : > { %v11630_v58 = vsel %vm1368_vm3, %v17633_v8, 0.0 }
0x1a8f   : > { %11631 = vadd.xlane.f32.xlu1 %v11630_v58 }
0x1b18   : > { %v11632_v10 = vpop.xlane.xlu1 %11631 }
0x1b19   : > { %17634 = vrcp.f32 %v11632_v10 }
0x1b26   : > { %v17635_v16 = vpop.eup %17634 }
0x1b27   : > { %v11634_v17 = vmul.f32 %v17635_v16, %v17633_v8 }
0x1b29   : > { %v11639_v20 = vsel %vm1368_vm3, %v11634_v17, 0 }
0x1b2a   : > { %v11707_v21 = vand.u32 4294901760, %v11639_v20 }
0x1b2c   : > { %v11708_v52 = vsub.f32 %v11639_v20, %v11707_v21  ;;  %17131 = vmatmul.mubr.f32.vlgmr.msra.gmra.mxu1 %v11707_v21 }
0x1b2d   : > { %17139 = vmatpush3.msra.mxu1 %v11672_v34  ;;  %17140 = vmatprep.mubr.msk.f32.mxu1 %vm17804_vm0, %v17803_v0 }
0x1b2e   : > { %17148 = vmatprep.subr.mxu1 %v17803_v0  ;;  %v11709_v24 = vand.u32 4294901760, %v11708_v52 }
0x1b30   : > { %17141 = vmatmul.mubr.f32.vlgmr.msra.gmra.mxu1 %v11709_v24  ;;  %v11710_v25 = vsub.f32 %v11708_v52, %v11709_v24 }
0x1b31   : > { %17149 = vmatpush3.msra.mxu1 %v11672_v34  ;;  %17150 = vmatprep.mubr.msk.f32.mxu1 %vm17804_vm0, %v17803_v0 }
0x1b32   : > { %v11711_v26 = vand.u32 4294901760, %v11710_v25  ;;  %17158 = vmatprep.subr.mxu1 %v17803_v0 }
0x1b34   : > { %17126 = vmatmul.mubr.f32.vlgmr.msra.gmra.mxu0 %v11711_v26  ;;  %17151 = vmatmul.mubr.f32.vlgmr.msra.gmra.mxu1 %v11707_v21 }
0x1b35   : > { %17134 = vmatpush3.msra.mxu0 %v11749_v35  ;;  %17135 = vmatprep.mubr.msk.f32.mxu0 %vm17804_vm0, %v17803_v0  ;;  %v12612_v35 = vsub.f32 %v12541_v22, %v12611_v27 }
0x1b36   : > { %17143 = vmatprep.subr.mxu0 %v17803_v0  ;;  %17160 = vmatprep.mubr.msk.f32.mxu1 %vm17804_vm0, %v17803_v0 }
0x1b37   : > { %17159 = vmatpush3.msra.mxu1 %v12201_v38  ;;  %v12613_v6 = vand.u32 4294901760, %v12612_v35 }
0x1b38   : > { %17136 = vmatmul.mubr.f32.vlgmr.msra.gmra.mxu0 %v11708_v52  ;;  %17168 = vmatprep.subr.mxu1 %v17803_v0 }
0x1b39   : > { %17144 = vmatpush3.msra.mxu0 %v11750_v39  ;;  %17145 = vmatprep.mubr.msk.f32.mxu0 %vm17804_vm0, %v17803_v0  ;;  %v12614_v8 = vsub.f32 %v12612_v35, %v12613_v6 }
0x1b3a   : > { %17153 = vmatprep.subr.mxu0 %v17803_v0 }
0x1b3b   : > { %v12615_v58 = vand.u32 4294901760, %v12614_v8 }
0x1b3c   : > { %17146 = vmatmul.mubr.f32.vlgmr.msra.gmra.mxu0 %v11707_v21 }
0x1b3d   : > { %17155 = vmatprep.mubr.msk.f32.mxu0 %vm17804_vm0, %v17803_v0  ;;  %17154 = vmatpush3.msra.mxu0 %v12121_v32 }
0x1b3e   : > { %17163 = vmatprep.subr.mxu0 %v17803_v0 }
0x1bec   : > { %v11789_v41 = vpop.f32.mrf.mxu1 }
0x1bee   : > { %v17132_v42 = vpop.f32.mrf.mxu1 }
0x1bf0   : > { %v11937_v44 = vpop.f32.mrf.mxu1 }
0x1bf2   : > { %v17142_v47 = vpop.f32.mrf.mxu1 }
0x1bf4   : > { %v11713_v48 = vpop.f32.mrf.mxu0  ;;  %v12083_v51 = vpop.f32.mrf.mxu1 }
0x1bf5   : > { %v11790_v11 = vadd.f32 %v11789_v41, %v11713_v48 }
0x1bf6   : > { %v17127_v54 = vpop.f32.mrf.mxu0  ;;  %v17152_v57 = vpop.f32.mrf.mxu1 }
0x1bf8   : > { %v11863_v46 = vpop.f32.mrf.mxu0 }
0x1bf9   : > { %v11864_v61 = vadd.f32 %v11863_v46, %v11790_v11 }
0x1bfa   : > { %v17137_v62 = vpop.f32.mrf.mxu0 }
0x1bfb   : > { %v11938_v1 = vadd.f32 %v11937_v44, %v11864_v61 }
0x1bfc   : > { %v12011_v3 = vpop.f32.mrf.mxu0 }
0x1bfd   : > { %v12012_v5 = vadd.f32 %v12011_v3, %v11938_v1 }
0x1bfe   : > { %v17147_v9 = vpop.f32.mrf.mxu0 }
0x1bff   : > { %v12084_v14 = vadd.f32 %v12083_v51, %v12012_v5 }
0x1c01   : > { %v12088_v29 = vsel %vm1368_vm3, %v12084_v14, 0 }
0x1c02   : > { %v12156_v19 = vand.u32 4294901760, %v12088_v29 }
0x1c04   : > { %v12157_v23 = vsub.f32 %v12088_v29, %v12156_v19  ;;  %17161 = vmatmul.mubr.f32.vlgmr.msra.gmra.mxu1 %v12156_v19 }
0x1c05   : > { %17169 = vmatpush3.msra.mxu1 %v12121_v32  ;;  %17170 = vmatprep.mubr.msk.f32.mxu1 %vm17804_vm0, %v17803_v0 }
0x1c06   : > { %v12158_v28 = vand.u32 4294901760, %v12157_v23  ;;  %17178 = vmatprep.subr.mxu1 %v17803_v0 }
0x1c08   : > { %v12159_v34 = vsub.f32 %v12157_v23, %v12158_v28  ;;  %17171 = vmatmul.mubr.f32.vlgmr.msra.gmra.mxu1 %v12158_v28 }
0x1c09   : > { %17179 = vmatpush3.msra.mxu1 %v12121_v32  ;;  %17180 = vmatprep.mubr.msk.f32.mxu1 %vm17804_vm0, %v17803_v0 }
0x1c0a   : > { %v12160_v39 = vand.u32 4294901760, %v12159_v34  ;;  %17188 = vmatprep.subr.mxu1 %v17803_v0 }
0x1c0c   : > { %17156 = vmatmul.mubr.f32.vlgmr.msra.gmra.mxu0 %v12160_v39  ;;  %17181 = vmatmul.mubr.f32.vlgmr.msra.gmra.mxu1 %v12156_v19 }
0x1c0d   : > { %17189 = vmatpush3.xpose.msra.mxu1 %v12656_v4  ;;  %17164 = vmatpush3.msra.mxu0 %v12198_v33 }
0x1c0e   : > { %17165 = vmatprep.mubr.msk.f32.mxu0 %vm17804_vm0, %v17803_v0  ;;  %17190 = vmatprep.mubr.msk.f32.mxu1 %vm17804_vm0, %v17803_v0 }
0x1c0f   : > { %17198 = vmatprep.subr.mxu1 %v17803_v0  ;;  %17173 = vmatprep.subr.mxu0 %v17803_v0 }
0x1c10   : > { %17166 = vmatmul.mubr.f32.vlgmr.msra.gmra.mxu0 %v12157_v23  ;;  %17191 = vmatmul.mubr.f32.vlgmr.msra.gmra.mxu1 %v12611_v27 }
0x1c11   : > { %17199 = vmatpush3.xpose.msra.mxu1 %v12576_v63  ;;  %17174 = vmatpush3.msra.mxu0 %v12199_v36 }
0x1c12   : > { %17175 = vmatprep.mubr.msk.f32.mxu0 %vm17804_vm0, %v17803_v0  ;;  %17183 = vmatprep.subr.mxu0 %v17803_v0 }
0x1c13   : > { %17200 = vmatprep.mubr.msk.f32.mxu1 %vm17804_vm0, %v17803_v0  ;;  %17208 = vmatprep.subr.mxu1 %v17803_v0 }
0x1c14   : > { %17176 = vmatmul.mubr.f32.vlgmr.msra.gmra.mxu0 %v12156_v19  ;;  %17201 = vmatmul.mubr.f32.vlgmr.msra.gmra.mxu1 %v12613_v6 }
0x1c15   : > { %17184 = vmatpush3.xpose.msra.mxu0 %v12576_v63  ;;  %17209 = vmatpush3.xpose.msra.mxu1 %v12576_v63 }
0x1c16   : > { %17185 = vmatprep.mubr.msk.f32.mxu0 %vm17804_vm0, %v17803_v0  ;;  %17193 = vmatprep.subr.mxu0 %v17803_v0 }
0x1c17   : > { %17210 = vmatprep.mubr.msk.f32.mxu1 %vm17804_vm0, %v17803_v0  ;;  %17218 = vmatprep.subr.mxu1 %v17803_v0 }
0x1c18   : > { %17186 = vmatmul.mubr.f32.vlgmr.msra.gmra.mxu0 %v12615_v58  ;;  %17211 = vmatmul.mubr.f32.vlgmr.msra.gmra.mxu1 %v12611_v27 }
0x1c19   : > { %17194 = vmatpush3.xpose.msra.mxu0 %v12653_v13  ;;  %17195 = vmatprep.mubr.msk.f32.mxu0 %vm17804_vm0, %v17803_v0 }
0x1c1a   : > { %17203 = vmatprep.subr.mxu0 %v17803_v0  ;;  %17220 = vmatprep.mubr.msk.f32.mxu1 %vm17804_vm0, %v17803_v0 }
0x1c1c   : > { %17196 = vmatmul.mubr.f32.vlgmr.msra.gmra.mxu0 %v12612_v35 }
0x1c1d   : > { %17204 = vmatpush3.xpose.msra.mxu0 %v12654_v2  ;;  %17205 = vmatprep.mubr.msk.f32.mxu0 %vm17804_vm0, %v17803_v0 }
0x1c1e   : > { %17213 = vmatprep.subr.mxu0 %v17803_v0 }
0x1c20   : > { %17206 = vmatmul.mubr.f32.vlgmr.msra.gmra.mxu0 %v12611_v27 }
0x1c21   : > { %17215 = vmatprep.mubr.msk.f32.mxu0 %vm17804_vm0, %v17803_v0 }
0x1cc4   : > { %v12238_v10 = vpop.f32.mrf.mxu1 }
0x1cc6   : > { %v17162_v16 = vpop.f32.mrf.mxu1 }
0x1cc8   : > { %v12386_v17 = vpop.f32.mrf.mxu1 }
0x1cca   : > { %v17172_v20 = vpop.f32.mrf.mxu1 }
0x1ccc   : > { %v12162_v21 = vpop.f32.mrf.mxu0  ;;  %v12532_v52 = vpop.f32.mrf.mxu1 }
0x1ccd   : > { %v12239_v24 = vadd.f32 %v12238_v10, %v12162_v21 }
0x1cce   : > { %v17157_v25 = vpop.f32.mrf.mxu0  ;;  %v17182_v26 = vpop.f32.mrf.mxu1 }
0x1cd0   : > { %v12312_v31 = vpop.f32.mrf.mxu0  ;;  %v12693_v32 = vpop.f32.mrf.mxu1 }
0x1cd1   : > { %v12313_v33 = vadd.f32 %v12312_v31, %v12239_v24 }
0x1cd2   : > { %v17167_v36 = vpop.f32.mrf.mxu0  ;;  %v17192_v37 = vpop.f32.mrf.mxu1 }
0x1cd3   : > { %v12387_v38 = vadd.f32 %v12386_v17, %v12313_v33  ;;  %v15616_v17 = vld [vmem:[%s19729_s3 + $0x38] sm:$0xff] }
0x1cd4   : > { %v12460_v41 = vpop.f32.mrf.mxu0  ;;  %v12841_v42 = vpop.f32.mrf.mxu1  ;;  %v13488_v20 = vand.u32 4294901760, %v15616_v17 }
0x1cd5   : > { %v12461_v44 = vadd.f32 %v12460_v41, %v12387_v38 }
0x1cd6   : > { %v17177_v47 = vpop.f32.mrf.mxu0  ;;  %v17202_v48 = vpop.f32.mrf.mxu1  ;;  %v13565_v21 = vsub.f32 %v15616_v17, %v13488_v20 }
0x1cd7   : > { %v12533_v51 = vadd.f32 %v12532_v52, %v12461_v44 }
0x1cd8   : > { %v12617_v53 = vpop.f32.mrf.mxu0  ;;  %v12987_v54 = vpop.f32.mrf.mxu1  ;;  %v13566_v52 = vand.u32 4294901760, %v13565_v21 }
0x1cd9   : > { %v19214_v57 = vadd.f32 %v12533_v51, %v19142_v60  ;;  %v12694_v46 = vadd.f32 %v12693_v32, %v12617_v53 }
0x1cda   : > { %v17187_v11 = vpop.f32.mrf.mxu0  ;;  %v17212_v55 = vpop.f32.mrf.mxu1  ;;  %v13567_v24 = vsub.f32 %v13565_v21, %v13566_v52 }
0x1cdc   : > { %v12767_v61 = vpop.f32.mrf.mxu0  ;;  %v13568_v25 = vand.u32 4294901760, %v13567_v24  ;;  %v15624_v24 = vld [vmem:[%s19730_s4 + $0x38] sm:$0xff] }
0x1cdd   : > { %v12768_v62 = vadd.f32 %v12767_v61, %v12694_v46 }
0x1cde   : > { %v17197_v63 = vpop.f32.mrf.mxu0 }
0x1cdf   : > { %v12842_v1 = vadd.f32 %v12841_v42, %v12768_v62 }
0x1ce0   : > { %v12915_v3 = vpop.f32.mrf.mxu0 }
0x1ce1   : > { %v12916_v5 = vadd.f32 %v12915_v3, %v12842_v1 }
0x1ce2   : > { %v17207_v9 = vpop.f32.mrf.mxu0 }
0x1ce3   : > { %v12988_v13 = vadd.f32 %v12987_v54, %v12916_v5 }
0x1ce5   : > { %v12991_v14 = vsel %vm1368_vm3, %v12988_v13, -inf }
0x1ce6   : > { %12992 = vmax.xlane.f32.xlu0 %v12991_v14 }
0x1d6f   : > { %v12993_v18 = vpop.xlane.xlu0 %12992 }
0x1d70   : > { %v12994_v29 = vsub.f32 %v12988_v13, %v12993_v18 }
0x1d72   : > { %v12995_v19 = vmul.f32 1.442695, %v12994_v29 }
0x1d74   : > { %17636 = vpow2.f32 %v12995_v19 }
0x1d81   : > { %v17637_v60 = vpop.eup %17636 }
0x1d82   : > { %v12997_v2 = vsel %vm1368_vm3, %v17637_v60, 0.0 }
0x1d83   : > { %12998 = vadd.xlane.f32.xlu1 %v12997_v2 }
0x1d94   : > { %13002 = vrot.lane.b32.xlu1 %v18945_v56, %s19754_s28  ;;  %s391_s28 = scalar_lea.vmem %s19735_s9, %s15612_s23 }
0x1e0c   : > { %v12999_v22 = vpop.xlane.xlu1 %12998 }
0x1e0d   : > { %17638 = vrcp.f32 %v12999_v22 }
0x1e10   : > { %v13003_v23 = vpop.permute.xlu1 %13002 }
0x1e11   : > { %v13039_v27 = vand.u32 4294901760, %v13003_v23 }
0x1e13   : > { %v13116_v28 = vsub.f32 %v13003_v23, %v13039_v27  ;;  %17214 = vmatpush3.msra.mxu0 %v13039_v27 }
0x1e14   : > { %17223 = vmatprep.subr.mxu0 %v17803_v0 }
0x1e15   : > { %v13117_v30 = vand.u32 4294901760, %v13116_v28 }
0x1e17   : > { %v13118_v34 = vsub.f32 %v13116_v28, %v13117_v30 }
0x1e19   : > { %v13119_v35 = vand.u32 4294901760, %v13118_v34 }
0x1e1a   : > { %v17639_v39 = vpop.eup %17638 }
0x1e1b   : > { %v13001_v4 = vmul.f32 %v17639_v39, %v17637_v60  ;;  %17219 = vmatpush3.msra.mxu1 %v13119_v35 }
0x1e1c   : > { %17228 = vmatprep.subr.mxu1 %v17803_v0 }
0x1e1d   : > { %v13006_v6 = vsel %vm1368_vm3, %v13001_v4, 0  ;;  %v19261_v4 = vld [vmem:[#allocation6 + $0x8] sm:$0xff] }
0x1e1e   : > { %v13074_v8 = vand.u32 4294901760, %v13006_v6 }
0x1e20   : > { %v13075_v56 = vsub.f32 %v13006_v6, %v13074_v8  ;;  %17221 = vmatmul.mubr.f32.vlgmr.msra.gmra.mxu1 %v13074_v8  ;;  %v13907_v6 = vrot.slane %v19261_v4, %v18472_v7 }
0x1e21   : > { %17229 = vmatpush3.msra.mxu1 %v13039_v27  ;;  %17230 = vmatprep.mubr.msk.f32.mxu1 %vm17804_vm0, %v17803_v0 }
0x1e22   : > { %17238 = vmatprep.subr.mxu1 %v17803_v0  ;;  %v13076_v58 = vand.u32 4294901760, %v13075_v56 }
0x1e24   : > { %17231 = vmatmul.mubr.f32.vlgmr.msra.gmra.mxu1 %v13076_v58  ;;  %v13077_v10 = vsub.f32 %v13075_v56, %v13076_v58 }
0x1e25   : > { %17239 = vmatpush3.msra.mxu1 %v13039_v27  ;;  %17240 = vmatprep.mubr.msk.f32.mxu1 %vm17804_vm0, %v17803_v0 }
0x1e26   : > { %v13078_v16 = vand.u32 4294901760, %v13077_v10  ;;  %17248 = vmatprep.subr.mxu1 %v17803_v0 }
0x1e28   : > { %17216 = vmatmul.mubr.f32.vlgmr.msra.gmra.mxu0 %v13078_v16  ;;  %17241 = vmatmul.mubr.f32.vlgmr.msra.gmra.mxu1 %v13074_v8 }
0x1e29   : > { %17224 = vmatpush3.msra.mxu0 %v13116_v28  ;;  %17225 = vmatprep.mubr.msk.f32.mxu0 %vm17804_vm0, %v17803_v0 }
0x1e2a   : > { %17233 = vmatprep.subr.mxu0 %v17803_v0  ;;  %17250 = vmatprep.mubr.msk.f32.mxu1 %vm17804_vm0, %v17803_v0 }
0x1e2b   : > { %17249 = vmatpush3.msra.mxu1 %v13568_v25  ;;  %v19272_v25 = vand.u32 4294901760, %v15624_v24 }
0x1e2c   : > { %17226 = vmatmul.mubr.f32.vlgmr.msra.gmra.mxu0 %v13075_v56  ;;  %17258 = vmatprep.subr.mxu1 %v17803_v0 }
0x1e2d   : > { %17234 = vmatpush3.msra.mxu0 %v13117_v30  ;;  %17235 = vmatprep.mubr.msk.f32.mxu0 %vm17804_vm0, %v17803_v0 }
0x1e2e   : > { %17243 = vmatprep.subr.mxu0 %v17803_v0 }
0x1e30   : > { %17236 = vmatmul.mubr.f32.vlgmr.msra.gmra.mxu0 %v13074_v8 }
0x1e31   : > { %17245 = vmatprep.mubr.msk.f32.mxu0 %vm17804_vm0, %v17803_v0  ;;  %17244 = vmatpush3.msra.mxu0 %v13488_v20 }
0x1e32   : > { %17253 = vmatprep.subr.mxu0 %v17803_v0 }
0x1ee0   : > { %v13156_v26 = vpop.f32.mrf.mxu1 }
0x1ee2   : > { %v17222_v31 = vpop.f32.mrf.mxu1 }
0x1ee3   : > { %v15622_v31 = vld [vmem:[%s19730_s4 + $0x28] sm:$0xff] }
0x1ee4   : > { %v13304_v32 = vpop.f32.mrf.mxu1 }
0x1ee6   : > { %v17232_v33 = vpop.f32.mrf.mxu1 }
0x1ee8   : > { %v13080_v36 = vpop.f32.mrf.mxu0  ;;  %v13450_v37 = vpop.f32.mrf.mxu1 }
0x1ee9   : > { %v13157_v42 = vadd.f32 %v13156_v26, %v13080_v36  ;;  %v19291_v36 = vand.u32 4294901760, %v15622_v31 }
0x1eea   : > { %v17217_v38 = vpop.f32.mrf.mxu0  ;;  %v17242_v41 = vpop.f32.mrf.mxu1 }
0x1eec   : > { %v13230_v44 = vpop.f32.mrf.mxu0 }
0x1eed   : > { %v13231_v47 = vadd.f32 %v13230_v44, %v13157_v42  ;;  %v19303_v42 = vsub.f32 %v15622_v31, %v19291_v36 }
0x1eee   : > { %v17227_v48 = vpop.f32.mrf.mxu0 }
0x1eef   : > { %v13305_v51 = vadd.f32 %v13304_v32, %v13231_v47 }
0x1ef0   : > { %v13378_v53 = vpop.f32.mrf.mxu0 }
0x1ef1   : > { %v13379_v54 = vadd.f32 %v13378_v53, %v13305_v51  ;;  %v14065_v51 = vand.u32 4294901760, %v19303_v42 }
0x1ef2   : > { %v17237_v11 = vpop.f32.mrf.mxu0 }
0x1ef3   : > { %v13451_v55 = vadd.f32 %v13450_v37, %v13379_v54  ;;  %v15621_v37 = vld [vmem:[%s19730_s4 + $0x20] sm:$0xff]  ;;  %v14066_v11 = vsub.f32 %v19303_v42, %v14065_v51 }
0x1ef4   : > { %v19305_v44 = vand.u32 4294901760, %v15621_v37 }
0x1ef5   : > { %v13455_v46 = vsel %vm1368_vm3, %v13451_v55, 0 }
0x1ef6   : > { %v13523_v61 = vand.u32 4294901760, %v13455_v46  ;;  %v19314_v53 = vsub.f32 %v15621_v37, %v19305_v44  ;;  %v15626_v37 = vld [vmem:[%s19731_s5 + $0x48] sm:$0xff] }
0x1ef8   : > { %v13524_v62 = vsub.f32 %v13455_v46, %v13523_v61  ;;  %17251 = vmatmul.mubr.f32.vlgmr.msra.gmra.mxu1 %v13523_v61  ;;  %v14072_v55 = vand.u32 4294901760, %v19314_v53  ;;  %v14067_v46 = vand.u32 4294901760, %v14066_v11 }
0x1ef9   : > { %17259 = vmatpush3.msra.mxu1 %v13488_v20  ;;  %17260 = vmatprep.mubr.msk.f32.mxu1 %vm17804_vm0, %v17803_v0 }
0x1efa   : > { %v13525_v63 = vand.u32 4294901760, %v13524_v62  ;;  %17268 = vmatprep.subr.mxu1 %v17803_v0 }
0x1efc   : > { %v13526_v1 = vsub.f32 %v13524_v62, %v13525_v63  ;;  %17261 = vmatmul.mubr.f32.vlgmr.msra.gmra.mxu1 %v13525_v63 }
0x1efd   : > { %17269 = vmatpush3.msra.mxu1 %v13488_v20  ;;  %17270 = vmatprep.mubr.msk.f32.mxu1 %vm17804_vm0, %v17803_v0 }
0x1efe   : > { %v13527_v3 = vand.u32 4294901760, %v13526_v1  ;;  %17284 = vmatprep.subr.mxu1 %v17803_v0 }
0x1f00   : > { %17246 = vmatmul.mubr.f32.vlgmr.msra.gmra.mxu0 %v13527_v3  ;;  %17271 = vmatmul.mubr.f32.vlgmr.msra.gmra.mxu1 %v13523_v61 }
0x1f01   : > { %17254 = vmatpush3.msra.mxu0 %v13565_v21  ;;  %17255 = vmatprep.mubr.msk.f32.mxu0 %vm17804_vm0, %v17803_v0 }
0x1f02   : > { %17263 = vmatprep.subr.mxu0 %v17803_v0  ;;  %17292 = vmatprep.mubr.msk.f32.mxu1 %vm17804_vm0, %v17803_v0 }
0x1f04   : > { %17256 = vmatmul.mubr.f32.vlgmr.msra.gmra.mxu0 %v13524_v62 }
0x1f05   : > { %17264 = vmatpush3.msra.mxu0 %v13566_v52  ;;  %17265 = vmatprep.mubr.msk.f32.mxu0 %vm17804_vm0, %v17803_v0 }
0x1f06   : > { %17273 = vmatprep.subr.mxu0 %v17803_v0 }
0x1f08   : > { %17266 = vmatmul.mubr.f32.vlgmr.msra.gmra.mxu0 %v13523_v61  ;;  %v14073_v61 = vsub.f32 %v19314_v53, %v14072_v55 }
0x1f09   : > { %17281 = vmatprep.mubr.msk.f32.mxu0 %vm17804_vm0, %v17803_v0  ;;  %17274 = vmatpush3.msra.mxu0 %v19272_v25 }
0x1f0a   : > { %17275 = vmatprep.subr.mxu0 %v17803_v0  ;;  %v14074_v62 = vand.u32 4294901760, %v14073_v61 }
0x1fb8   : > { %v13605_v5 = vpop.f32.mrf.mxu1 }
0x1fba   : > { %v17252_v9 = vpop.f32.mrf.mxu1 }
0x1fbc   : > { %v13753_v13 = vpop.f32.mrf.mxu1 }
0x1fbe   : > { %v17262_v14 = vpop.f32.mrf.mxu1 }
0x1fc0   : > { %v13529_v18 = vpop.f32.mrf.mxu0  ;;  %v13899_v29 = vpop.f32.mrf.mxu1 }
0x1fc1   : > { %v13606_v2 = vadd.f32 %v13605_v5, %v13529_v18  ;;  %v13926_v5 = vrot.slane %v19261_v4, %v6853_v49 }
0x1fc2   : > { %v17247_v19 = vpop.f32.mrf.mxu0  ;;  %v17272_v60 = vpop.f32.mrf.mxu1 }
0x1fc4   : > { %v13679_v22 = vpop.f32.mrf.mxu0 }
0x1fc5   : > { %v13680_v23 = vadd.f32 %v13679_v22, %v13606_v2 }
0x1fc6   : > { %v17257_v27 = vpop.f32.mrf.mxu0 }
0x1fc7   : > { %v13754_v28 = vadd.f32 %v13753_v13, %v13680_v23  ;;  %v13931_v13 = vrot.slane %v19261_v4, %v6858_v50  ;;  %v15632_v23 = vld [vmem:[%s19731_s5 + $0x78] sm:$0xff] }
0x1fc8   : > { %v13827_v30 = vpop.f32.mrf.mxu0  ;;  %v19390_v27 = vand.u32 4294901760, %v15632_v23 }
0x1fc9   : > { %v13828_v34 = vadd.f32 %v13827_v30, %v13754_v28  ;;  %v15631_v28 = vld [vmem:[%s19731_s5 + $0x70] sm:$0xff] }
0x1fca   : > { %v17267_v35 = vpop.f32.mrf.mxu0  ;;  %v19396_v30 = vsub.f32 %v15632_v23, %v19390_v27 }
0x1fcb   : > { %v13900_v39 = vadd.f32 %v13899_v29, %v13828_v34  ;;  %v19398_v34 = vand.u32 4294901760, %v15631_v28  ;;  %v15630_v35 = vld [vmem:[%s19731_s5 + $0x68] sm:$0xff] }
0x1fcd   : > { %v13903_v8 = vadd.f32 %v13900_v39, %v19214_v57  ;;  %v19278_v57 = vsub.f32 %v15624_v24, %v19272_v25  ;;  %v14549_v39 = vand.u32 4294901760, %v19396_v30 }
0x1fcf   : > { %v13908_v56 = vadd.f32 %v13907_v6, %v13903_v8  ;;  %v14051_v32 = vand.u32 4294901760, %v19278_v57  ;;  %v19407_v6 = vsub.f32 %v15631_v28, %v19398_v34  ;;  %v19409_v8 = vand.u32 4294901760, %v15630_v35 }
0x1fd1   : > { %v13909_v58 = vadd.f32 %v13908_v56, %v18892_v12  ;;  %v15623_v12 = vld [vmem:[%s19730_s4 + $0x30] sm:$0xff]  ;;  %v14052_v38 = vsub.f32 %v19278_v57, %v14051_v32  ;;  %v15629_v56 = vld [vmem:[%s19731_s5 + $0x60] sm:$0xff] }
0x1fd2   : > { %v19280_v26 = vand.u32 4294901760, %v15623_v12 }
0x1fd3   : > { %v13910_v10 = vsel %vm876_vm2, %v13909_v58, 0.0  ;;  %v14053_v47 = vand.u32 4294901760, %v14052_v38 }
0x1fd4   : > { %13911 = vadd.xlane.f32.xlu1 %v13910_v10  ;;  %v19289_v33 = vsub.f32 %v15623_v12, %v19280_v26  ;;  %17276 = vmatpush3.msra.mxu0 %v19280_v26  ;;  %v14556_v10 = vand.u32 4294901760, %v19407_v6 }
0x1fd5   : > { %17277 = vmatprep.subr.mxu0 %v17803_v0  ;;  %17285 = vmatpush3.msra.mxu1 %v14053_v47 }
0x1fd6   : > { %v14058_v41 = vand.u32 4294901760, %v19289_v33  ;;  %17278 = vmatpush3.msra.mxu0 %v19291_v36  ;;  %17286 = vmatprep.subr.mxu1 %v17803_v0 }
0x1fd7   : > { %17279 = vmatprep.subr.mxu0 %v17803_v0 }
0x1fd8   : > { %v14059_v48 = vsub.f32 %v19289_v33, %v14058_v41  ;;  %17280 = vmatpush3.msra.mxu0 %v19305_v44 }
0x1fd9   : > { %17295 = vmatprep.subr.mxu0 %v17803_v0 }
0x1fda   : > { %v14060_v54 = vand.u32 4294901760, %v14059_v48  ;;  %v15625_v48 = vld [vmem:[%s19731_s5 + $0x40] sm:$0xff] }
0x1fdb   : > { %v19477_v11 = vand.u32 4294901760, %v15625_v48 }
0x1fdc   : > { %17287 = vmatpush3.msra.mxu1 %v14060_v54 }
0x1fdd   : > { %17288 = vmatprep.subr.mxu1 %v17803_v0 }
0x1fde   : > { %17289 = vmatpush3.msra.mxu1 %v14067_v46 }
0x1fdf   : > { %17290 = vmatprep.subr.mxu1 %v17803_v0 }
0x1fe0   : > { %17291 = vmatpush3.msra.mxu1 %v14074_v62  ;;  %v19490_v62 = vsub.f32 %v15625_v48, %v19477_v11 }
0x1fe1   : > { %17306 = vmatprep.subr.mxu1 %v17803_v0 }
0x205d   : > { %v13912_v16 = vpop.xlane.xlu1 %13911 }
0x205e   : > { %v13913_v17 = vmul.f32 0.03125, %v13912_v16  ;;  %v19421_v16 = vsub.f32 %v15630_v35, %v19409_v8 }
0x2060   : > { %v13914_v20 = vsub.f32 %v13909_v58, %v13913_v17  ;;  %v14550_v58 = vsub.f32 %v19396_v30, %v14549_v39  ;;  %v19423_v17 = vand.u32 4294901760, %v15629_v56  ;;  %v14563_v24 = vand.u32 4294901760, %v19421_v16 }
0x2062   : > { %v13915_v21 = vmul.f32 %v13914_v20, %v13914_v20  ;;  %v14564_v31 = vsub.f32 %v19421_v16, %v14563_v24 }
0x2064   : > { %v13916_v52 = vsel %vm876_vm2, %v13915_v21, 0.0  ;;  %v14551_v21 = vand.u32 4294901760, %v14550_v58  ;;  %v14565_v38 = vand.u32 4294901760, %v14564_v31 }
0x2065   : > { %13917 = vadd.xlane.f32.xlu0 %v13916_v52  ;;  %v14557_v52 = vsub.f32 %v19407_v6, %v14556_v10 }
0x20ee   : > { %v13918_v63 = vpop.xlane.xlu0 %13917 }
0x20ef   : > { %v13919_v1 = vmul.f32 0.03125, %v13918_v63 }
0x20f1   : > { %v13920_v3 = vadd.f32 1e-05, %v13919_v1 }
0x20f3   : > { %17640 = vrsqrt.f32 %v13920_v3 }
0x2100   : > { %v17641_v9 = vpop.eup %17640 }
0x2101   : > { %v13922_v14 = vmul.f32 %v17641_v9, %v13914_v20  ;;  %v15628_v20 = vld [vmem:[%s19731_s5 + $0x58] sm:$0xff] }
0x2102   : > { %v19438_v12 = vand.u32 4294901760, %v15628_v20 }
0x2103   : > { %v13927_v18 = vmul.f32 %v13926_v5, %v13922_v14  ;;  %v14598_v5 = vand.u32 4294901760, %v19490_v62 }
0x2105   : > { %v19335_v29 = vadd.f32 %v13931_v13, %v13927_v18  ;;  %v14599_v13 = vsub.f32 %v19490_v62, %v14598_v5 }
0x2107   : > { %v13943_v19 = vsel %vm876_vm2, %v19335_v29, 0  ;;  %v14600_v14 = vand.u32 4294901760, %v14599_v13 }
0x2108   : > { %v14014_v60 = vand.u32 4294901760, %v13943_v19 }
0x210a   : > { %v14015_v2 = vsub.f32 %v13943_v19, %v14014_v60  ;;  %17293 = vmatmul.mubr.f32.vlgmr.msra.gmra.mxu1 %v14014_v60 }
0x210b   : > { %17307 = vmatpush3.msra.mxu1 %v19272_v25  ;;  %17314 = vmatprep.mubr.msk.f32.mxu1 %vm17804_vm0, %v17803_v0 }
0x210c   : > { %17308 = vmatprep.subr.mxu1 %v17803_v0  ;;  %v14016_v49 = vand.u32 4294901760, %v14015_v2 }
0x210d   : > { %17309 = vmatpush3.msra.mxu1 %v19280_v26 }
0x210e   : > { %17310 = vmatprep.subr.mxu1 %v17803_v0  ;;  %v14017_v50 = vsub.f32 %v14015_v2, %v14016_v49 }
0x210f   : > { %17311 = vmatpush3.msra.mxu1 %v19291_v36 }
0x2110   : > { %17312 = vmatprep.subr.mxu1 %v17803_v0  ;;  %v14018_v22 = vand.u32 4294901760, %v14017_v50  ;;  %v13941_v50 = vrot.slane %v19261_v4, %v6867_v59 }
0x2111   : > { %17313 = vmatpush3.msra.mxu1 %v19305_v44 }
0x2112   : > { %17315 = vmatmul.mubr.f32.vlgmr.msra.gmra.mxu1 %v14016_v49  ;;  %17328 = vmatprep.subr.mxu1 %v17803_v0 }
0x2113   : > { %17282 = vmatmul.mubr.f32.vlgmr.msra.gmra.mxu0 %v14018_v22  ;;  %17329 = vmatpush3.msra.mxu1 %v19272_v25  ;;  %v19435_v25 = vsub.f32 %v15629_v56, %v19423_v17 }
0x2114   : > { %17296 = vmatpush3.msra.mxu0 %v19278_v57  ;;  %17330 = vmatprep.subr.mxu1 %v17803_v0  ;;  %v15627_v57 = vld [vmem:[%s19731_s5 + $0x50] sm:$0xff] }
0x2115   : > { %17297 = vmatprep.subr.mxu0 %v17803_v0  ;;  %17331 = vmatpush3.msra.mxu1 %v19280_v26  ;;  %v14558_v26 = vand.u32 4294901760, %v14557_v52 }
0x2116   : > { %17298 = vmatpush3.msra.mxu0 %v19289_v33  ;;  %17332 = vmatprep.subr.mxu1 %v17803_v0  ;;  %v19448_v33 = vand.u32 4294901760, %v15627_v57 }
0x2117   : > { %17299 = vmatprep.subr.mxu0 %v17803_v0  ;;  %17333 = vmatpush3.msra.mxu1 %v19291_v36  ;;  %v19452_v36 = vsub.f32 %v15628_v20, %v19438_v12 }
0x2118   : > { %17300 = vmatpush3.msra.mxu0 %v19303_v42  ;;  %17334 = vmatprep.subr.mxu1 %v17803_v0  ;;  %v19462_v42 = vsub.f32 %v15627_v57, %v19448_v33 }
0x2119   : > { %17301 = vmatprep.subr.mxu0 %v17803_v0  ;;  %17303 = vmatprep.mubr.msk.f32.mxu0 %vm17804_vm0, %v17803_v0  ;;  %v14577_v47 = vand.u32 4294901760, %v19452_v36 }
0x211a   : > { %17302 = vmatpush3.msra.mxu0 %v19314_v53  ;;  %17335 = vmatpush3.msra.mxu1 %v19305_v44  ;;  %v19464_v44 = vand.u32 4294901760, %v15626_v37  ;;  %v14584_v53 = vand.u32 4294901760, %v19462_v42 }
0x211b   : > { %17336 = vmatprep.mubr.msk.f32.mxu1 %vm17804_vm0, %v17803_v0  ;;  %17304 = vmatmul.mubr.f32.vlgmr.msra.gmra.mxu0 %v14015_v2 }
0x211c   : > { %17317 = vmatprep.subr.mxu0 %v17803_v0  ;;  %17337 = vmatmul.mubr.f32.vlgmr.msra.gmra.mxu1 %v14014_v60  ;;  %v19475_v54 = vsub.f32 %v15626_v37, %v19464_v44  ;;  %v14585_v46 = vsub.f32 %v19462_v42, %v14584_v53 }
0x211d   : > { %17318 = vmatpush3.msra.mxu0 %v14051_v32  ;;  %17325 = vmatprep.mubr.msk.f32.mxu0 %vm17804_vm0, %v17803_v0  ;;  %v14570_v32 = vand.u32 4294901760, %v19435_v25 }
0x211e   : > { %17319 = vmatprep.subr.mxu0 %v17803_v0  ;;  %17358 = vmatprep.subr.mxu1 %v17803_v0  ;;  %v14591_v61 = vand.u32 4294901760, %v19475_v54  ;;  %v14586_v1 = vand.u32 4294901760, %v14585_v46 }
0x211f   : > { %17320 = vmatpush3.msra.mxu0 %v14058_v41  ;;  %17374 = vmatprep.mubr.msk.f32.mxu1 %vm17804_vm0, %v17803_v0  ;;  %v14571_v41 = vsub.f32 %v19435_v25, %v14570_v32 }
0x2120   : > { %17321 = vmatprep.subr.mxu0 %v17803_v0  ;;  %17359 = vmatpush3.msra.mxu1 %v14551_v21  ;;  %v14592_v3 = vsub.f32 %v19475_v54, %v14591_v61 }
0x2121   : > { %17322 = vmatpush3.msra.mxu0 %v14065_v51  ;;  %17360 = vmatprep.subr.mxu1 %v17803_v0  ;;  %v14572_v51 = vand.u32 4294901760, %v14571_v41 }
0x2122   : > { %17323 = vmatprep.subr.mxu0 %v17803_v0  ;;  %17361 = vmatpush3.msra.mxu1 %v14558_v26  ;;  %v14593_v9 = vand.u32 4294901760, %v14592_v3  ;;  %v15011_v3 = vld [vmem:[#allocation7 + $0x18] sm:$0xff] }
0x2123   : > { %17324 = vmatpush3.msra.mxu0 %v14072_v55  ;;  %17362 = vmatprep.subr.mxu1 %v17803_v0  ;;  %v14578_v55 = vsub.f32 %v19452_v36, %v14577_v47 }
0x2124   : > { %17326 = vmatmul.mubr.f32.vlgmr.msra.gmra.mxu0 %v14014_v60  ;;  %17339 = vmatprep.subr.mxu0 %v17803_v0 }
0x2125   : > { %17355 = vmatprep.mubr.msk.f32.mxu0 %vm17804_vm0, %v17803_v0  ;;  %17340 = vmatpush3.msra.mxu0 %v19390_v27  ;;  %v14579_v63 = vand.u32 4294901760, %v14578_v55 }
0x2126   : > { %17341 = vmatprep.subr.mxu0 %v17803_v0  ;;  %17363 = vmatpush3.msra.mxu1 %v14565_v38 }
0x2127   : > { %17342 = vmatpush3.msra.mxu0 %v19398_v34  ;;  %17364 = vmatprep.subr.mxu1 %v17803_v0 }
0x2128   : > { %17343 = vmatprep.subr.mxu0 %v17803_v0  ;;  %17365 = vmatpush3.msra.mxu1 %v14572_v51 }
0x2129   : > { %17344 = vmatpush3.msra.mxu0 %v19409_v8  ;;  %17366 = vmatprep.subr.mxu1 %v17803_v0 }
0x212a   : > { %17345 = vmatprep.subr.mxu0 %v17803_v0  ;;  %17367 = vmatpush3.msra.mxu1 %v14579_v63 }
0x212b   : > { %17346 = vmatpush3.msra.mxu0 %v19423_v17  ;;  %17368 = vmatprep.subr.mxu1 %v17803_v0 }
0x212c   : > { %17347 = vmatprep.subr.mxu0 %v17803_v0  ;;  %17369 = vmatpush3.msra.mxu1 %v14586_v1 }
0x212d   : > { %17348 = vmatpush3.msra.mxu0 %v19438_v12  ;;  %17370 = vmatprep.subr.mxu1 %v17803_v0 }
0x212e   : > { %17349 = vmatprep.subr.mxu0 %v17803_v0  ;;  %17371 = vmatpush3.msra.mxu1 %v14593_v9  ;;  %v15010_v9 = vld [vmem:[#allocation7 + $0x10] sm:$0xff] }
0x212f   : > { %17350 = vmatpush3.msra.mxu0 %v19448_v33  ;;  %17372 = vmatprep.subr.mxu1 %v17803_v0 }
0x2130   : > { %17351 = vmatprep.subr.mxu0 %v17803_v0  ;;  %17373 = vmatpush3.msra.mxu1 %v14600_v14  ;;  %v19612_v14 = vand.u32 4294901760, %v15010_v9 }
0x2131   : > { %17352 = vmatpush3.msra.mxu0 %v19464_v44  ;;  %17396 = vmatprep.subr.mxu1 %v17803_v0 }
0x2132   : > { %17353 = vmatprep.subr.mxu0 %v17803_v0 }
0x2133   : > { %17354 = vmatpush3.msra.mxu0 %v19477_v11 }
0x2134   : > { %17377 = vmatprep.subr.mxu0 %v17803_v0 }
0x21ca   : > { %v14111_v18 = vpop.f32.mrf.mxu1 }
0x21cc   : > { %v17294_v19 = vpop.f32.mrf.mxu1 }
0x21cd   : > { %v19618_v19 = vsub.f32 %v15010_v9, %v19612_v14 }
0x21d2   : > { %v14268_v60 = vpop.f32.mrf.mxu1 }
0x21d3   : > { %v14020_v2 = vpop.f32.mrf.mxu0 }
0x21d4   : > { %v17316_v49 = vpop.f32.mrf.mxu1  ;;  %v14021_v23 = vadd.f32 %v14020_v2, %v13941_v50  ;;  %v15008_v2 = vld [vmem:[#allocation7] sm:$0xff]  ;;  %v15132_v50 = vand.u32 4294901760, %v19618_v19 }
0x21d5   : > { %v17283_v22 = vpop.f32.mrf.mxu0 }
0x21d6   : > { %v14112_v56 = vadd.f32 %v14111_v18, %v14021_v23  ;;  %v19631_v23 = vand.u32 4294901760, %v15008_v2 }
0x21db   : > { %v14191_v28 = vpop.f32.mrf.mxu0 }
0x21dc   : > { %v14426_v35 = vpop.f32.mrf.mxu1  ;;  %v14192_v21 = vadd.f32 %v14191_v28, %v14112_v56 }
0x21dd   : > { %v17305_v58 = vpop.f32.mrf.mxu0 }
0x21de   : > { %v17338_v20 = vpop.f32.mrf.mxu1  ;;  %v14269_v52 = vadd.f32 %v14268_v60, %v14192_v21  ;;  %v19640_v58 = vsub.f32 %v15008_v2, %v19631_v23 }
0x21e4   : > { %v14351_v57 = vpop.f32.mrf.mxu0 }
0x21e5   : > { %v14352_v26 = vadd.f32 %v14351_v57, %v14269_v52  ;;  %v15146_v52 = vand.u32 4294901760, %v19640_v58 }
0x21e6   : > { %v17327_v31 = vpop.f32.mrf.mxu0 }
0x21e7   : > { %v14427_v37 = vadd.f32 %v14426_v35, %v14352_v26  ;;  %v15133_v35 = vsub.f32 %v19618_v19, %v15132_v50  ;;  %v15147_v26 = vsub.f32 %v19640_v58, %v15146_v52 }
0x21e9   : > { %v14430_v38 = vmax.f32 %v14427_v37, 0.0  ;;  %v15134_v20 = vand.u32 4294901760, %v15133_v35  ;;  %v15148_v31 = vand.u32 4294901760, %v15147_v26 }
0x21eb   : > { %v14445_v41 = vsel %vm7370_vm4, %v14430_v38, 0 }
0x21ec   : > { %v19511_v48 = vand.u32 4294901760, %v14445_v41 }
0x21ee   : > { %v14521_v59 = vsub.f32 %v14445_v41, %v19511_v48  ;;  %17375 = vmatmul.mubr.f32.vlgmr.msra.gmra.mxu1 %v19511_v48 }
0x21ef   : > { %17397 = vmatpush3.msra.mxu1 %v19390_v27  ;;  %17412 = vmatprep.mubr.msk.f32.mxu1 %vm17804_vm0, %v17803_v0 }
0x21f0   : > { %v14522_v51 = vand.u32 4294901760, %v14521_v59  ;;  %17398 = vmatprep.subr.mxu1 %v17803_v0 }
0x21f1   : > { %17399 = vmatpush3.msra.mxu1 %v19398_v34 }
0x21f2   : > { %v14523_v55 = vsub.f32 %v14521_v59, %v14522_v51  ;;  %17400 = vmatprep.subr.mxu1 %v17803_v0 }
0x21f3   : > { %17401 = vmatpush3.msra.mxu1 %v19409_v8 }
0x21f4   : > { %v14524_v46 = vand.u32 4294901760, %v14523_v55  ;;  %17402 = vmatprep.subr.mxu1 %v17803_v0 }
0x21f5   : > { %17403 = vmatpush3.msra.mxu1 %v19423_v17 }
0x21f6   : > { %17404 = vmatprep.subr.mxu1 %v17803_v0  ;;  %17356 = vmatmul.mubr.f32.vlgmr.msra.gmra.mxu0 %v14524_v46 }
0x21f7   : > { %17378 = vmatpush3.msra.mxu0 %v19396_v30  ;;  %17405 = vmatpush3.msra.mxu1 %v19438_v12 }
0x21f8   : > { %17379 = vmatprep.subr.mxu0 %v17803_v0  ;;  %17406 = vmatprep.subr.mxu1 %v17803_v0 }
0x21f9   : > { %17380 = vmatpush3.msra.mxu0 %v19407_v6  ;;  %17407 = vmatpush3.msra.mxu1 %v19448_v33 }
0x21fa   : > { %17381 = vmatprep.subr.mxu0 %v17803_v0  ;;  %17408 = vmatprep.subr.mxu1 %v17803_v0 }
0x21fb   : > { %17382 = vmatpush3.msra.mxu0 %v19421_v16  ;;  %17409 = vmatpush3.msra.mxu1 %v19464_v44  ;;  %v14443_v16 = vrot.slane %v19261_v4, %v7368_v15 }
0x21fc   : > { %17383 = vmatprep.subr.mxu0 %v17803_v0  ;;  %17410 = vmatprep.subr.mxu1 %v17803_v0 }
0x21fd   : > { %17384 = vmatpush3.msra.mxu0 %v19435_v25  ;;  %17411 = vmatpush3.msra.mxu1 %v19477_v11 }
0x21fe   : > { %17385 = vmatprep.subr.mxu0 %v17803_v0  ;;  %17413 = vmatmul.mubr.f32.vlgmr.msra.gmra.mxu1 %v14522_v51  ;;  %v15006_v51 = vrot.slane %v19261_v4, %v7932_v43 }
0x21ff   : > { %17434 = vmatprep.subr.mxu1 %v17803_v0  ;;  %17386 = vmatpush3.msra.mxu0 %v19452_v36 }
0x2200   : > { %17435 = vmatpush3.msra.mxu1 %v19390_v27  ;;  %17387 = vmatprep.subr.mxu0 %v17803_v0 }
0x2201   : > { %17436 = vmatprep.subr.mxu1 %v17803_v0  ;;  %17388 = vmatpush3.msra.mxu0 %v19462_v42 }
0x2202   : > { %17437 = vmatpush3.msra.mxu1 %v19398_v34  ;;  %17389 = vmatprep.subr.mxu0 %v17803_v0 }
0x2203   : > { %17438 = vmatprep.subr.mxu1 %v17803_v0  ;;  %17390 = vmatpush3.msra.mxu0 %v19475_v54 }
0x2204   : > { %17439 = vmatpush3.msra.mxu1 %v19409_v8  ;;  %17391 = vmatprep.subr.mxu0 %v17803_v0 }
0x2205   : > { %17440 = vmatprep.subr.mxu1 %v17803_v0  ;;  %17392 = vmatpush3.msra.mxu0 %v19490_v62 }
0x2206   : > { %17393 = vmatprep.mubr.msk.f32.mxu0 %vm17804_vm0, %v17803_v0  ;;  %17441 = vmatpush3.msra.mxu1 %v19423_v17 }
0x2207   : > { %17394 = vmatmul.mubr.f32.vlgmr.msra.gmra.mxu0 %v14521_v59  ;;  %17415 = vmatprep.subr.mxu0 %v17803_v0 }
0x2208   : > { %17442 = vmatprep.subr.mxu1 %v17803_v0  ;;  %17416 = vmatpush3.msra.mxu0 %v14549_v39 }
0x2209   : > { %17443 = vmatpush3.msra.mxu1 %v19438_v12  ;;  %17417 = vmatprep.subr.mxu0 %v17803_v0 }
0x220a   : > { %17444 = vmatprep.subr.mxu1 %v17803_v0  ;;  %17418 = vmatpush3.msra.mxu0 %v14556_v10 }
0x220b   : > { %17445 = vmatpush3.msra.mxu1 %v19448_v33  ;;  %17419 = vmatprep.subr.mxu0 %v17803_v0 }
0x220c   : > { %17446 = vmatprep.subr.mxu1 %v17803_v0  ;;  %17420 = vmatpush3.msra.mxu0 %v14563_v24 }
0x220d   : > { %17447 = vmatpush3.msra.mxu1 %v19464_v44  ;;  %17421 = vmatprep.subr.mxu0 %v17803_v0 }
0x220e   : > { %17448 = vmatprep.subr.mxu1 %v17803_v0  ;;  %17422 = vmatpush3.msra.mxu0 %v14570_v32 }
0x220f   : > { %17449 = vmatpush3.msra.mxu1 %v19477_v11  ;;  %17450 = vmatprep.mubr.msk.f32.mxu1 %vm17804_vm0, %v17803_v0 }
0x2210   : > { %17423 = vmatprep.subr.mxu0 %v17803_v0  ;;  %17451 = vmatmul.mubr.f32.vlgmr.msra.gmra.mxu1 %v19511_v48 }
0x2211   : > { %17424 = vmatpush3.msra.mxu0 %v14577_v47  ;;  %17431 = vmatprep.mubr.msk.f32.mxu0 %vm17804_vm0, %v17803_v0 }
0x2212   : > { %17425 = vmatprep.subr.mxu0 %v17803_v0  ;;  %17464 = vmatprep.subr.mxu1 %v17803_v0 }
0x2213   : > { %17426 = vmatpush3.msra.mxu0 %v14584_v53  ;;  %17472 = vmatprep.mubr.msk.f32.mxu1 %vm17804_vm0, %v17803_v0 }
0x2214   : > { %17427 = vmatprep.subr.mxu0 %v17803_v0 }
0x2215   : > { %17428 = vmatpush3.msra.mxu0 %v14591_v61 }
0x2216   : > { %17429 = vmatprep.subr.mxu0 %v17803_v0 }
0x2217   : > { %17430 = vmatpush3.msra.mxu0 %v14598_v5  ;;  %v19607_v5 = vand.u32 4294901760, %v15011_v3 }
0x2218   : > { %17432 = vmatmul.mubr.f32.vlgmr.msra.gmra.mxu0 %v19511_v48  ;;  %17453 = vmatprep.subr.mxu0 %v17803_v0  ;;  %v15001_v48 = vrot.slane %v19261_v4, %v7927_v40 }
0x2219   : > { %17461 = vmatprep.mubr.msk.f32.mxu0 %vm17804_vm0, %v17803_v0  ;;  %v19610_v13 = vsub.f32 %v15011_v3, %v19607_v5  ;;  %17454 = vmatpush3.msra.mxu0 %v19607_v5 }
0x221a   : > { %17455 = vmatprep.subr.mxu0 %v17803_v0 }
0x221b   : > { %v15125_v18 = vand.u32 4294901760, %v19610_v13  ;;  %17456 = vmatpush3.msra.mxu0 %v19612_v14 }
0x221c   : > { %17457 = vmatprep.subr.mxu0 %v17803_v0 }
0x221d   : > { %v15126_v49 = vsub.f32 %v19610_v13, %v15125_v18 }
0x221f   : > { %v15127_v28 = vand.u32 4294901760, %v15126_v49 }
0x2221   : > { %17465 = vmatpush3.msra.mxu1 %v15127_v28 }
0x2222   : > { %17466 = vmatprep.subr.mxu1 %v17803_v0 }
0x2223   : > { %17467 = vmatpush3.msra.mxu1 %v15134_v20 }
0x2224   : > { %17468 = vmatprep.subr.mxu1 %v17803_v0 }
0x22ae   : > { %v14637_v27 = vpop.f32.mrf.mxu1 }
0x22b0   : > { %v17376_v30 = vpop.f32.mrf.mxu1 }
0x22b6   : > { %v14526_v34 = vpop.f32.mrf.mxu0 }
0x22b7   : > { %v14527_v24 = vadd.f32 %v14526_v34, %v14443_v16 }
0x22b8   : > { %v17357_v39 = vpop.f32.mrf.mxu0 }
0x22b9   : > { %v14638_v12 = vadd.f32 %v14637_v27, %v14527_v24 }
0x22be   : > { %v14806_v6 = vpop.f32.mrf.mxu1 }
0x22c0   : > { %v17414_v8 = vpop.f32.mrf.mxu1 }
0x22c7   : > { %v14725_v10 = vpop.f32.mrf.mxu0 }
0x22c8   : > { %v14726_v33 = vadd.f32 %v14725_v10, %v14638_v12 }
0x22c9   : > { %v17395_v17 = vpop.f32.mrf.mxu0 }
0x22ca   : > { %v14807_v36 = vadd.f32 %v14806_v6, %v14726_v33  ;;  %v17646_v17 = vld [vmem:[%s19734_s8] sm:$0x3] }
0x22cb   : > { %v15015_v24 = vrot.slane %v17646_v17, %v18472_v7 }
0x22d0   : > { %v14980_v25 = vpop.f32.mrf.mxu1 }
0x22d2   : > { %v17452_v32 = vpop.f32.mrf.mxu1 }
0x22d8   : > { %v14901_v42 = vpop.f32.mrf.mxu0 }
0x22d9   : > { %v14902_v44 = vadd.f32 %v14901_v42, %v14807_v36 }
0x22da   : > { %v17433_v47 = vpop.f32.mrf.mxu0 }
0x22db   : > { %v14981_v53 = vadd.f32 %v14980_v25, %v14902_v44 }
0x22dd   : > { %v14984_v54 = vadd.f32 %v14981_v53, %v19335_v29  ;;  %v15009_v29 = vld [vmem:[#allocation7 + $0x8] sm:$0xff] }
0x22de   : > { %v19620_v60 = vand.u32 4294901760, %v15009_v29 }
0x22df   : > { %v14985_v11 = vsel %vm876_vm2, %v14984_v54, 0.0 }
0x22e0   : > { %14986 = vadd.xlane.f32.xlu0 %v14985_v11  ;;  %v19629_v22 = vsub.f32 %v15009_v29, %v19620_v60  ;;  %17458 = vmatpush3.msra.mxu0 %v19620_v60 }
0x22e1   : > { %17459 = vmatprep.subr.mxu0 %v17803_v0 }
0x22e2   : > { %v15139_v56 = vand.u32 4294901760, %v19629_v22  ;;  %17460 = vmatpush3.msra.mxu0 %v19631_v23 }
0x22e3   : > { %17475 = vmatprep.subr.mxu0 %v17803_v0 }
0x22e4   : > { %v15140_v21 = vsub.f32 %v19629_v22, %v15139_v56 }
0x22e6   : > { %v15141_v57 = vand.u32 4294901760, %v15140_v21 }
0x22e8   : > { %17469 = vmatpush3.msra.mxu1 %v15141_v57 }
0x22e9   : > { %17470 = vmatprep.subr.mxu1 %v17803_v0 }
0x22ea   : > { %17471 = vmatpush3.msra.mxu1 %v15148_v31 }
0x22eb   : > { %17486 = vmatprep.subr.mxu1 %v17803_v0 }
0x2369   : > { %v14987_v61 = vpop.xlane.xlu0 %14986 }
0x236a   : > { %v14988_v62 = vmul.f32 0.03125, %v14987_v61 }
0x236c   : > { %v14989_v63 = vsub.f32 %v14984_v54, %v14988_v62 }
0x236e   : > { %v14990_v15 = vmul.f32 %v14989_v63, %v14989_v63 }
0x2370   : > { %v14991_v1 = vsel %vm876_vm2, %v14990_v15, 0.0 }
0x2371   : > { %14992 = vadd.xlane.f32.xlu0 %v14991_v1 }
0x23fa   : > { %v14993_v37 = vpop.xlane.xlu0 %14992 }
0x23fb   : > { %v14994_v38 = vmul.f32 0.03125, %v14993_v37 }
0x23fd   : > { %v14995_v41 = vadd.f32 1e-05, %v14994_v38 }
0x23ff   : > { %17642 = vrsqrt.f32 %v14995_v41 }
0x240c   : > { %v17643_v59 = vpop.eup %17642 }
0x240d   : > { %v14997_v55 = vmul.f32 %v17643_v59, %v14989_v63 }
0x240f   : > { %v15002_v46 = vmul.f32 %v15001_v48, %v14997_v55 }
0x2411   : > { %v15007_v27 = vadd.f32 %v15006_v51, %v15002_v46 }
0x2413   : > { %v15017_v30 = vsel %vm876_vm2, %v15007_v27, 0 }
0x2414   : > { %v15088_v34 = vand.u32 4294901760, %v15017_v30 }
0x2416   : > { %v15089_v39 = vsub.f32 %v15017_v30, %v15088_v34  ;;  %17473 = vmatmul.mubr.f32.vlgmr.msra.gmra.mxu1 %v15088_v34 }
0x2417   : > { %17487 = vmatpush3.msra.mxu1 %v19607_v5  ;;  %17494 = vmatprep.mubr.msk.f32.mxu1 %vm17804_vm0, %v17803_v0 }
0x2418   : > { %17488 = vmatprep.subr.mxu1 %v17803_v0  ;;  %v15090_v40 = vand.u32 4294901760, %v15089_v39 }
0x2419   : > { %17489 = vmatpush3.msra.mxu1 %v19612_v14 }
0x241a   : > { %17490 = vmatprep.subr.mxu1 %v17803_v0  ;;  %v15091_v45 = vsub.f32 %v15089_v39, %v15090_v40 }
0x241b   : > { %17491 = vmatpush3.msra.mxu1 %v19620_v60 }
0x241c   : > { %17492 = vmatprep.subr.mxu1 %v17803_v0  ;;  %v15092_v43 = vand.u32 4294901760, %v15091_v45 }
0x241d   : > { %17493 = vmatpush3.msra.mxu1 %v19631_v23 }
0x241e   : > { %17495 = vmatmul.mubr.f32.vlgmr.msra.gmra.mxu1 %v15090_v40  ;;  %17508 = vmatprep.subr.mxu1 %v17803_v0 }
0x241f   : > { %17462 = vmatmul.mubr.f32.vlgmr.msra.gmra.mxu0 %v15092_v43  ;;  %17509 = vmatpush3.msra.mxu1 %v19607_v5 }
0x2420   : > { %17476 = vmatpush3.msra.mxu0 %v19610_v13  ;;  %17510 = vmatprep.subr.mxu1 %v17803_v0 }
0x2421   : > { %17477 = vmatprep.subr.mxu0 %v17803_v0  ;;  %17511 = vmatpush3.msra.mxu1 %v19612_v14 }
0x2422   : > { %17478 = vmatpush3.msra.mxu0 %v19618_v19  ;;  %17512 = vmatprep.subr.mxu1 %v17803_v0 }
0x2423   : > { %17479 = vmatprep.subr.mxu0 %v17803_v0  ;;  %17513 = vmatpush3.msra.mxu1 %v19620_v60 }
0x2424   : > { %17480 = vmatpush3.msra.mxu0 %v19629_v22  ;;  %17514 = vmatprep.subr.mxu1 %v17803_v0 }
0x2425   : > { %17481 = vmatprep.subr.mxu0 %v17803_v0  ;;  %17483 = vmatprep.mubr.msk.f32.mxu0 %vm17804_vm0, %v17803_v0 }
0x2426   : > { %17482 = vmatpush3.msra.mxu0 %v19640_v58  ;;  %17515 = vmatpush3.msra.mxu1 %v19631_v23 }
0x2427   : > { %17516 = vmatprep.mubr.msk.f32.mxu1 %vm17804_vm0, %v17803_v0  ;;  %17484 = vmatmul.mubr.f32.vlgmr.msra.gmra.mxu0 %v15089_v39 }
0x2428   : > { %17497 = vmatprep.subr.mxu0 %v17803_v0  ;;  %17517 = vmatmul.mubr.f32.vlgmr.msra.gmra.mxu1 %v15088_v34 }
0x2429   : > { %17498 = vmatpush3.msra.mxu0 %v15125_v18  ;;  %17505 = vmatprep.mubr.msk.f32.mxu0 %vm17804_vm0, %v17803_v0 }
0x242a   : > { %17499 = vmatprep.subr.mxu0 %v17803_v0 }
0x242b   : > { %17500 = vmatpush3.msra.mxu0 %v15132_v50 }
0x242c   : > { %17501 = vmatprep.subr.mxu0 %v17803_v0 }
0x242d   : > { %17502 = vmatpush3.msra.mxu0 %v15139_v56 }
0x242e   : > { %17503 = vmatprep.subr.mxu0 %v17803_v0 }
0x242f   : > { %17504 = vmatpush3.msra.mxu0 %v15146_v52 }
0x2430   : > { %17506 = vmatmul.mubr.f32.vlgmr.msra.gmra.mxu0 %v15088_v34 }
0x24d6   : > { %v15185_v4 = vpop.f32.mrf.mxu1 }
0x24d8   : > { %v17474_v6 = vpop.f32.mrf.mxu1 }
0x24de   : > { %v15342_v8 = vpop.f32.mrf.mxu1 }
0x24df   : > { %v15094_v10 = vpop.f32.mrf.mxu0 }
0x24e0   : > { %v17496_v16 = vpop.f32.mrf.mxu1  ;;  %v15095_v12 = vadd.f32 %v15094_v10, %v15015_v24 }
0x24e1   : > { %v17463_v25 = vpop.f32.mrf.mxu0 }
0x24e2   : > { %v15186_v33 = vadd.f32 %v15185_v4, %v15095_v12 }
0x24e7   : > { %v15265_v32 = vpop.f32.mrf.mxu0 }
0x24e8   : > { %v15500_v0 = vpop.f32.mrf.mxu1  ;;  %v15266_v44 = vadd.f32 %v15265_v32, %v15186_v33 }
0x24e9   : > { %v17485_v36 = vpop.f32.mrf.mxu0 }
0x24ea   : > { %v17518_v42 = vpop.f32.mrf.mxu1  ;;  %v15343_v47 = vadd.f32 %v15342_v8, %v15266_v44 }
0x24f0   : > { %v15425_v53 = vpop.f32.mrf.mxu0 }
0x24f1   : > { %v15426_v54 = vadd.f32 %v15425_v53, %v15343_v47 }
0x24f2   : > { %v17507_v11 = vpop.f32.mrf.mxu0 }
0x24f3   : > { %v15501_v7 = vadd.f32 %v15500_v0, %v15426_v54 }
0x24f5   : > { %15504 = vst [vmem:[%s391_s28] sm:$0xff] %v15501_v7 }
0x24f6 PF: > { %p21_p4 = scmp.ge.s32.totalorder %s17936_s20, 4   ;;  %s19755_s30 = smov %s17787_s10 }
0x24f7   : > { %s19756_s10 = smov %s17791_s11  ;;  %s19757_s11 = smov %s17946_s18 }
0x24f8   : > { %s19758_s12 = smov %s17936_s20  ;;  %23 = sbr.rel (!%p21_p4) target bundleno = 5 (0x5), region = 113 }
0x24fd   :  { %15524 = vsyncpa [#allocation3], 1 }
0x24fe   :  { %15526 = vsyncpa [#allocation3 + $0x1], 1 }
0x24ff   :  { %15527 = vsyncpa [#allocation5], 1 }
0x2500   :  { %15528 = vsyncpa [#allocation8], 1 }

</bundles_post_ra>
